<compile_context>
chip_gen: v6e
topology: v6e:2x2x1
jax: 0.10.0
libtpu: 0.0.40
codegen_flags: <defaults>
</compile_context>

<pallas_src>
import jax
import jax.numpy as jnp
from jax import lax
from jax.experimental import pallas as pl
from jax.experimental.pallas import tpu as pltpu


_BN_EPS = 1e-5


# ------------------------------ fused kernel ---------------------------------


def _make_preact_block_kernel(H, W, Cin, P, has_sc_conv):
    HW = H * W

    def kernel(x_ref, w1_ref, w2t_ref, wsct_ref,
               s1_ref, b1_ref, s2_ref, b2_ref,
               o_ref, a1_ref, a2_ref):
        f32 = jnp.float32
        x = x_ref[0].astype(f32)                                   # (H, W, Cin)

        # ---- Stage 1: bn1 + relu.  Zero-fill the 1-padded scratch every step
        # (scratch persists per-core, but with a parallel grid a core may never
        # execute step 0, so the halo is re-zeroed unconditionally) and write
        # the activation into the interior so conv1's taps read exact zeros.
        a1 = jnp.maximum(x * s1_ref[...] + b1_ref[...], 0.0)       # (H, W, Cin)
        a1_ref[...] = jnp.zeros_like(a1_ref)
        a1_ref[1:H + 1, 1:W + 1, :] = a1

        # ---- Stage 2: conv1 as ONE im2col matmul, K = 9*Cin.
        # (kh shifts are leading-dim slices and free; the kw shifts are small
        # static sublane-offset reads -- at realistic shapes route them through
        # pltpu.roll or fold them into the packing.)
        taps1 = [a1_ref[kh:kh + H, kw:kw + W, :]
                 for kh in range(3) for kw in range(3)]
        patches1 = jnp.concatenate(taps1, axis=-1)                 # (H, W, 9*Cin)
        c1 = lax.dot_general(patches1, w1_ref[...],
                             dimension_numbers=(((2,), (0,)), ((), ())),
                             preferred_element_type=f32)           # (H, W, P)

        # ---- Stage 3: bn2 + relu into the interior of the zero-halo scratch,
        # producing exactly the zero-padded input conv2 needs.
        a2 = jnp.maximum(c1 * s2_ref[...] + b2_ref[...], 0.0)      # (H, W, P)
        a2_ref[...] = jnp.zeros_like(a2_ref)
        a2_ref[1:H + 1, 1:W + 1, :] = a2

        # ---- Stage 4: conv2 as ONE im2col matmul, computed channels-major so
        # the (P, H*W) result stores with full 128-lane vst's (lane-dense).
        taps2 = [a2_ref[kh:kh + H, kw:kw + W, :]
                 for kh in range(3) for kw in range(3)]
        patches2 = jnp.concatenate(taps2, axis=-1)                 # (H, W, 9*P)
        patches2 = patches2.reshape(HW, 9 * P)                     # leading-dim collapse
        c2t = lax.dot_general(w2t_ref[...], patches2,
                              dimension_numbers=(((1,), (1,)), ((), ())),
                              preferred_element_type=f32)          # (P, H*W)

        # ---- Fused shortcut, also (P, H*W): 1x1 projection of relu(bn1(x))
        # when planes change, otherwise identity (eye weight) on the raw input.
        sc_src = a1 if has_sc_conv else x
        sc_t = lax.dot_general(wsct_ref[...], sc_src.reshape(HW, Cin),
                               dimension_numbers=(((1,), (1,)), ((), ())),
                               preferred_element_type=f32)         # (P, H*W)

        o_ref[0] = (c2t + sc_t).astype(o_ref.dtype)

    return kernel


# -------------------------------- wrapper -------------------------------------


def _fold_bn(gamma, beta, mean, var):
    scale = gamma / jnp.sqrt(var + _BN_EPS)
    bias = beta - mean * scale
    return scale.astype(jnp.float32), bias.astype(jnp.float32)


def _vmem_limit_bytes(H, W, Cin, P):
    fb = 4  # float32 bytes
    per_step = (H * W * Cin            # input block
                + 9 * Cin * P          # w1 (im2col)
                + 9 * P * P            # w2^T (im2col, channels-major)
                + Cin * P              # shortcut weight
                + 2 * (Cin + P)        # folded BN scale/bias
                + P * H * W) * fb      # output block
    scratch = (H + 2) * (W + 2) * (Cin + P) * fb
    need = 2 * per_step + scratch + (8 << 20)   # x2: double-buffered pipeline
    return int(min(max(need, 16 << 20), 48 << 20))


def preact_block_forward(x_nchw, params, in_planes, planes, stride=1):
    assert stride == 1, "only stride=1 implemented"  # TODO(synk): strided path
    x = jnp.transpose(x_nchw, (0, 2, 3, 1))          # NCHW -> NHWC for the convs
    N, H, W, Cin = x.shape
    P = planes
    has_sc = (stride != 1) or (in_planes != planes)

    s1, b1 = _fold_bn(params["bn1_g"], params["bn1_b"],
                      params["bn1_m"], params["bn1_v"])
    s2, b2 = _fold_bn(params["bn2_g"], params["bn2_b"],
                      params["bn2_m"], params["bn2_v"])

    # im2col weight layouts (match the kh-major, kw, channel tap ordering).
    w1k = params["w1"].astype(jnp.float32).reshape(9 * Cin, P)     # (9*Cin, P)
    w2t = params["w2"].astype(jnp.float32).reshape(9 * P, P).T     # (P, 9*P)
    if has_sc:
        wsct = params["w_sc"].astype(jnp.float32).T                # (P, Cin)
    else:
        wsct = jnp.eye(P, dtype=jnp.float32)                       # identity shortcut

    kernel = _make_preact_block_kernel(H, W, Cin, P, has_sc)

    in_specs = [
        pl.BlockSpec((1, H, W, Cin), lambda n: (n, 0, 0, 0)),
        # Weights / BN params: constant index_map -> DMA'd once across steps.
        pl.BlockSpec((9 * Cin, P), lambda n: (0, 0)),
        pl.BlockSpec((P, 9 * P), lambda n: (0, 0)),
        pl.BlockSpec((P, Cin), lambda n: (0, 0)),
        pl.BlockSpec((1, Cin), lambda n: (0, 0)),
        pl.BlockSpec((1, Cin), lambda n: (0, 0)),
        pl.BlockSpec((1, P), lambda n: (0, 0)),
        pl.BlockSpec((1, P), lambda n: (0, 0)),
    ]
    args = [x, w1k, w2t, wsct,
            s1.reshape(1, Cin), b1.reshape(1, Cin),
            s2.reshape(1, P), b2.reshape(1, P)]

    out = pl.pallas_call(
        kernel,
        out_shape=jax.ShapeDtypeStruct((N, P, H * W), x.dtype),    # lane-dense
        grid=(N,),
        in_specs=in_specs,
        out_specs=pl.BlockSpec((1, P, H * W), lambda n: (n, 0, 0)),
        scratch_shapes=[
            pltpu.VMEM((H + 2, W + 2, Cin), jnp.float32),  # zero-halo relu(bn1(x))
            pltpu.VMEM((H + 2, W + 2, P), jnp.float32),    # zero-halo relu(bn2(conv1))
        ],
        compiler_params=pltpu.CompilerParams(
            dimension_semantics=("parallel",),
            vmem_limit_bytes=_vmem_limit_bytes(H, W, Cin, P)),
    )(*args)
    return out.reshape(N, P, H, W)                                 # already NCHW


# ------------------------------- reference ------------------------------------


def preact_block_reference(x_nchw, params, in_planes, planes, stride=1):
    x = jnp.transpose(x_nchw, (0, 2, 3, 1))
    dn = ("NHWC", "HWIO", "NHWC")

    def bn(v, g, b, m, var):
        return (v - m) / jnp.sqrt(var + _BN_EPS) * g + b

    out = jax.nn.relu(bn(x, params["bn1_g"], params["bn1_b"],
                         params["bn1_m"], params["bn1_v"]))
    if stride != 1 or in_planes != planes:
        w_sc = params["w_sc"].reshape(1, 1, in_planes, planes)
        shortcut = lax.conv_general_dilated(out, w_sc, (stride, stride),
                                            "VALID", dimension_numbers=dn)
    else:
        shortcut = x
    out = lax.conv_general_dilated(out, params["w1"], (stride, stride),
                                   "SAME", dimension_numbers=dn)
    out = jax.nn.relu(bn(out, params["bn2_g"], params["bn2_b"],
                         params["bn2_m"], params["bn2_v"]))
    out = lax.conv_general_dilated(out, params["w2"], (1, 1),
                                   "SAME", dimension_numbers=dn)
    out = out + shortcut
    return jnp.transpose(out, (0, 3, 1, 2))


# --------------------------------- main ----------------------------------------


def _make_params(key, in_planes, planes, with_sc):
    ks = jax.random.split(key, 11)
    p = {
        "bn1_g": 0.5 + jax.random.uniform(ks[0], (in_planes,), jnp.float32),
        "bn1_b": 0.1 * jax.random.normal(ks[1], (in_planes,), jnp.float32),
        "bn1_m": 0.1 * jax.random.normal(ks[2], (in_planes,), jnp.float32),
        "bn1_v": 0.5 + jax.random.uniform(ks[3], (in_planes,), jnp.float32),
        "w1": 0.2 * jax.random.normal(ks[4], (3, 3, in_planes, planes),
                                      jnp.float32),
        "bn2_g": 0.5 + jax.random.uniform(ks[5], (planes,), jnp.float32),
        "bn2_b": 0.1 * jax.random.normal(ks[6], (planes,), jnp.float32),
        "bn2_m": 0.1 * jax.random.normal(ks[7], (planes,), jnp.float32),
        "bn2_v": 0.5 + jax.random.uniform(ks[8], (planes,), jnp.float32),
        "w2": 0.2 * jax.random.normal(ks[9], (3, 3, planes, planes),
                                      jnp.float32),
    }
    if with_sc:
        p["w_sc"] = 0.2 * jax.random.normal(ks[10], (in_planes, planes),
                                            jnp.float32)
    return p


if __name__ == "__main__":
    key = jax.random.PRNGKey(0)
    k_p1, k_x1, k_p2, k_x2 = jax.random.split(key, 4)

    # Case 1: projection shortcut (in_planes != planes) -> fused 1x1 conv.
    N, in_planes, planes, H, W = 2, 4, 8, 16, 16
    params1 = _make_params(k_p1, in_planes, planes, with_sc=True)
    x1 = jax.random.normal(k_x1, (N, in_planes, H, W), jnp.float32)
    out1 = jax.block_until_ready(
        preact_block_forward(x1, params1, in_planes, planes, stride=1))
    ref1 = jax.block_until_ready(
        preact_block_reference(x1, params1, in_planes, planes, stride=1))
    assert out1.shape == (N, planes, H, W)
    assert jnp.allclose(out1, ref1, atol=5e-4, rtol=5e-4), (
        float(jnp.max(jnp.abs(out1 - ref1))))

    # Case 2: identity shortcut (in_planes == planes).
    params2 = _make_params(k_p2, planes, planes, with_sc=False)
    x2 = jax.random.normal(k_x2, (N, planes, H, W), jnp.float32)
    out2 = jax.block_until_ready(
        preact_block_forward(x2, params2, planes, planes, stride=1))
    ref2 = jax.block_until_ready(
        preact_block_reference(x2, params2, planes, planes, stride=1))
    assert out2.shape == (N, planes, H, W)
    assert jnp.allclose(out2, ref2, atol=5e-4, rtol=5e-4), (
        float(jnp.max(jnp.abs(out2 - ref2))))

    print("KERNEL_OK")
</pallas_src>

<mosaic_0001>
module attributes {stable_mosaic.version = 11 : i64} {
  func.func @kernel(%arg0: i32, %arg1: memref<1x16x16x4xf32, #tpu.memory_space<vmem>>, %arg2: memref<36x8xf32, #tpu.memory_space<vmem>>, %arg3: memref<8x72xf32, #tpu.memory_space<vmem>>, %arg4: memref<8x4xf32, #tpu.memory_space<vmem>>, %arg5: memref<1x4xf32, #tpu.memory_space<vmem>>, %arg6: memref<1x4xf32, #tpu.memory_space<vmem>>, %arg7: memref<1x8xf32, #tpu.memory_space<vmem>>, %arg8: memref<1x8xf32, #tpu.memory_space<vmem>>, %arg9: memref<1x8x256xf32, #tpu.memory_space<vmem>>, %arg10: memref<18x18x4xf32, #tpu.memory_space<vmem>>, %arg11: memref<18x18x8xf32, #tpu.memory_space<vmem>>) attributes {dimension_semantics = [#tpu.dimension_semantics<parallel>], iteration_bounds = array<i64: 2>, scalar_prefetch = 0 : i64, scratch_operands = 2 : i64, tpu.core_type = #tpu.core_type<tc>, window_params = [{transform_indices = @transform_0, window_bounds = array<i64: 1, 16, 16, 4>}, {pipeline_mode = #tpu.pipeline_mode<synchronous>, transform_indices = @transform_1, window_bounds = array<i64: 36, 8>}, {pipeline_mode = #tpu.pipeline_mode<synchronous>, transform_indices = @transform_2, window_bounds = array<i64: 8, 72>}, {pipeline_mode = #tpu.pipeline_mode<synchronous>, transform_indices = @transform_3, window_bounds = array<i64: 8, 4>}, {pipeline_mode = #tpu.pipeline_mode<synchronous>, transform_indices = @transform_4, window_bounds = array<i64: 1, 4>}, {pipeline_mode = #tpu.pipeline_mode<synchronous>, transform_indices = @transform_5, window_bounds = array<i64: 1, 4>}, {pipeline_mode = #tpu.pipeline_mode<synchronous>, transform_indices = @transform_6, window_bounds = array<i64: 1, 8>}, {pipeline_mode = #tpu.pipeline_mode<synchronous>, transform_indices = @transform_7, window_bounds = array<i64: 1, 8>}, {transform_indices = @transform_8, window_bounds = array<i64: 1, 8, 256>}]} {
    %c0 = arith.constant 0 : index
    %c0_0 = arith.constant 0 : index
    %c0_1 = arith.constant 0 : index
    %c0_2 = arith.constant 0 : index
    %0 = vector.load %arg1[%c0, %c0_0, %c0_1, %c0_2] : memref<1x16x16x4xf32, #tpu.memory_space<vmem>>, vector<1x16x16x4xf32>
    %1 = vector.shape_cast %0 : vector<1x16x16x4xf32> to vector<16x16x4xf32>
    %c0_3 = arith.constant 0 : index
    %c0_4 = arith.constant 0 : index
    %2 = vector.load %arg5[%c0_3, %c0_4] : memref<1x4xf32, #tpu.memory_space<vmem>>, vector<1x4xf32>
    %3 = vector.shape_cast %2 : vector<1x4xf32> to vector<1x1x4xf32>
    %4 = vector.broadcast %3 : vector<1x1x4xf32> to vector<16x16x4xf32>
    %5 = arith.mulf %1, %4 : vector<16x16x4xf32>
    %c0_5 = arith.constant 0 : index
    %c0_6 = arith.constant 0 : index
    %6 = vector.load %arg6[%c0_5, %c0_6] : memref<1x4xf32, #tpu.memory_space<vmem>>, vector<1x4xf32>
    %7 = vector.shape_cast %6 : vector<1x4xf32> to vector<1x1x4xf32>
    %8 = vector.broadcast %7 : vector<1x1x4xf32> to vector<16x16x4xf32>
    %9 = arith.addf %5, %8 : vector<16x16x4xf32>
    %cst = arith.constant 0.000000e+00 : f32
    %10 = vector.broadcast %cst : f32 to vector<16x16x4xf32>
    %11 = arith.maximumf %9, %10 : vector<16x16x4xf32>
    %cst_7 = arith.constant 0.000000e+00 : f32
    %12 = vector.broadcast %cst_7 : f32 to vector<18x18x4xf32>
    %c0_8 = arith.constant 0 : index
    %c0_9 = arith.constant 0 : index
    %c0_10 = arith.constant 0 : index
    %13 = vector.load %arg10[%c0_8, %c0_9, %c0_10] : memref<18x18x4xf32, #tpu.memory_space<vmem>>, vector<18x18x4xf32>
    tpu.vector_store %arg10[%c0_8, %c0_9, %c0_10], %12 {strides = array<i32>} : memref<18x18x4xf32, #tpu.memory_space<vmem>>, vector<18x18x4xf32>,
    %c1 = arith.constant 1 : index
    %c1_11 = arith.constant 1 : index
    %c0_12 = arith.constant 0 : index
    %14 = vector.load %arg10[%c1, %c1_11, %c0_12] : memref<18x18x4xf32, #tpu.memory_space<vmem>>, vector<16x16x4xf32>
    tpu.vector_store %arg10[%c1, %c1_11, %c0_12], %11 {strides = array<i32>} : memref<18x18x4xf32, #tpu.memory_space<vmem>>, vector<16x16x4xf32>,
    %c0_13 = arith.constant 0 : index
    %c0_14 = arith.constant 0 : index
    %c0_15 = arith.constant 0 : index
    %15 = vector.load %arg10[%c0_13, %c0_14, %c0_15] : memref<18x18x4xf32, #tpu.memory_space<vmem>>, vector<16x16x4xf32>
    %c0_16 = arith.constant 0 : index
    %c1_17 = arith.constant 1 : index
    %c0_18 = arith.constant 0 : index
    %16 = vector.load %arg10[%c0_16, %c1_17, %c0_18] : memref<18x18x4xf32, #tpu.memory_space<vmem>>, vector<16x16x4xf32>
    %c0_19 = arith.constant 0 : index
    %c2 = arith.constant 2 : index
    %c0_20 = arith.constant 0 : index
    %17 = vector.load %arg10[%c0_19, %c2, %c0_20] : memref<18x18x4xf32, #tpu.memory_space<vmem>>, vector<16x16x4xf32>
    %c1_21 = arith.constant 1 : index
    %c0_22 = arith.constant 0 : index
    %c0_23 = arith.constant 0 : index
    %18 = vector.load %arg10[%c1_21, %c0_22, %c0_23] : memref<18x18x4xf32, #tpu.memory_space<vmem>>, vector<16x16x4xf32>
    %c1_24 = arith.constant 1 : index
    %c1_25 = arith.constant 1 : index
    %c0_26 = arith.constant 0 : index
    %19 = vector.load %arg10[%c1_24, %c1_25, %c0_26] : memref<18x18x4xf32, #tpu.memory_space<vmem>>, vector<16x16x4xf32>
    %c1_27 = arith.constant 1 : index
    %c2_28 = arith.constant 2 : index
    %c0_29 = arith.constant 0 : index
    %20 = vector.load %arg10[%c1_27, %c2_28, %c0_29] : memref<18x18x4xf32, #tpu.memory_space<vmem>>, vector<16x16x4xf32>
    %c2_30 = arith.constant 2 : index
    %c0_31 = arith.constant 0 : index
    %c0_32 = arith.constant 0 : index
    %21 = vector.load %arg10[%c2_30, %c0_31, %c0_32] : memref<18x18x4xf32, #tpu.memory_space<vmem>>, vector<16x16x4xf32>
    %c2_33 = arith.constant 2 : index
    %c1_34 = arith.constant 1 : index
    %c0_35 = arith.constant 0 : index
    %22 = vector.load %arg10[%c2_33, %c1_34, %c0_35] : memref<18x18x4xf32, #tpu.memory_space<vmem>>, vector<16x16x4xf32>
    %c2_36 = arith.constant 2 : index
    %c2_37 = arith.constant 2 : index
    %c0_38 = arith.constant 0 : index
    %23 = vector.load %arg10[%c2_36, %c2_37, %c0_38] : memref<18x18x4xf32, #tpu.memory_space<vmem>>, vector<16x16x4xf32>
    %24 = tpu.concatenate %15, %16, %17, %18, %19, %20, %21, %22, %23 in 2 : vector<16x16x4xf32>, vector<16x16x4xf32>, vector<16x16x4xf32>, vector<16x16x4xf32>, vector<16x16x4xf32>, vector<16x16x4xf32>, vector<16x16x4xf32>, vector<16x16x4xf32>, vector<16x16x4xf32> -> vector<16x16x36xf32>
    %c0_39 = arith.constant 0 : index
    %c0_40 = arith.constant 0 : index
    %25 = vector.load %arg2[%c0_39, %c0_40] : memref<36x8xf32, #tpu.memory_space<vmem>>, vector<36x8xf32>
    %cst_41 = arith.constant dense<0.000000e+00> : vector<16x16x8xf32>
    %26 = tpu.matmul %24, %25, %cst_41 {dimension_numbers = #tpu.dot_dimension_numbers<[2], [0], [0, 1], [1], [0, 0, 0, 1, 1, 1], [], []>} : vector<16x16x36xf32>, vector<36x8xf32>, vector<16x16x8xf32> -> vector<16x16x8xf32>
    %c0_42 = arith.constant 0 : index
    %c0_43 = arith.constant 0 : index
    %27 = vector.load %arg7[%c0_42, %c0_43] : memref<1x8xf32, #tpu.memory_space<vmem>>, vector<1x8xf32>
    %28 = vector.shape_cast %27 : vector<1x8xf32> to vector<1x1x8xf32>
    %29 = vector.broadcast %28 : vector<1x1x8xf32> to vector<16x16x8xf32>
    %30 = arith.mulf %26, %29 : vector<16x16x8xf32>
    %c0_44 = arith.constant 0 : index
    %c0_45 = arith.constant 0 : index
    %31 = vector.load %arg8[%c0_44, %c0_45] : memref<1x8xf32, #tpu.memory_space<vmem>>, vector<1x8xf32>
    %32 = vector.shape_cast %31 : vector<1x8xf32> to vector<1x1x8xf32>
    %33 = vector.broadcast %32 : vector<1x1x8xf32> to vector<16x16x8xf32>
    %34 = arith.addf %30, %33 : vector<16x16x8xf32>
    %cst_46 = arith.constant 0.000000e+00 : f32
    %35 = vector.broadcast %cst_46 : f32 to vector<16x16x8xf32>
    %36 = arith.maximumf %34, %35 : vector<16x16x8xf32>
    %cst_47 = arith.constant 0.000000e+00 : f32
    %37 = vector.broadcast %cst_47 : f32 to vector<18x18x8xf32>
    %c0_48 = arith.constant 0 : index
    %c0_49 = arith.constant 0 : index
    %c0_50 = arith.constant 0 : index
    %38 = vector.load %arg11[%c0_48, %c0_49, %c0_50] : memref<18x18x8xf32, #tpu.memory_space<vmem>>, vector<18x18x8xf32>
    tpu.vector_store %arg11[%c0_48, %c0_49, %c0_50], %37 {strides = array<i32>} : memref<18x18x8xf32, #tpu.memory_space<vmem>>, vector<18x18x8xf32>,
    %c1_51 = arith.constant 1 : index
    %c1_52 = arith.constant 1 : index
    %c0_53 = arith.constant 0 : index
    %39 = vector.load %arg11[%c1_51, %c1_52, %c0_53] : memref<18x18x8xf32, #tpu.memory_space<vmem>>, vector<16x16x8xf32>
    tpu.vector_store %arg11[%c1_51, %c1_52, %c0_53], %36 {strides = array<i32>} : memref<18x18x8xf32, #tpu.memory_space<vmem>>, vector<16x16x8xf32>,
    %c0_54 = arith.constant 0 : index
    %c0_55 = arith.constant 0 : index
    %c0_56 = arith.constant 0 : index
    %40 = vector.load %arg11[%c0_54, %c0_55, %c0_56] : memref<18x18x8xf32, #tpu.memory_space<vmem>>, vector<16x16x8xf32>
    %c0_57 = arith.constant 0 : index
    %c1_58 = arith.constant 1 : index
    %c0_59 = arith.constant 0 : index
    %41 = vector.load %arg11[%c0_57, %c1_58, %c0_59] : memref<18x18x8xf32, #tpu.memory_space<vmem>>, vector<16x16x8xf32>
    %c0_60 = arith.constant 0 : index
    %c2_61 = arith.constant 2 : index
    %c0_62 = arith.constant 0 : index
    %42 = vector.load %arg11[%c0_60, %c2_61, %c0_62] : memref<18x18x8xf32, #tpu.memory_space<vmem>>, vector<16x16x8xf32>
    %c1_63 = arith.constant 1 : index
    %c0_64 = arith.constant 0 : index
    %c0_65 = arith.constant 0 : index
    %43 = vector.load %arg11[%c1_63, %c0_64, %c0_65] : memref<18x18x8xf32, #tpu.memory_space<vmem>>, vector<16x16x8xf32>
    %c1_66 = arith.constant 1 : index
    %c1_67 = arith.constant 1 : index
    %c0_68 = arith.constant 0 : index
    %44 = vector.load %arg11[%c1_66, %c1_67, %c0_68] : memref<18x18x8xf32, #tpu.memory_space<vmem>>, vector<16x16x8xf32>
    %c1_69 = arith.constant 1 : index
    %c2_70 = arith.constant 2 : index
    %c0_71 = arith.constant 0 : index
    %45 = vector.load %arg11[%c1_69, %c2_70, %c0_71] : memref<18x18x8xf32, #tpu.memory_space<vmem>>, vector<16x16x8xf32>
    %c2_72 = arith.constant 2 : index
    %c0_73 = arith.constant 0 : index
    %c0_74 = arith.constant 0 : index
    %46 = vector.load %arg11[%c2_72, %c0_73, %c0_74] : memref<18x18x8xf32, #tpu.memory_space<vmem>>, vector<16x16x8xf32>
    %c2_75 = arith.constant 2 : index
    %c1_76 = arith.constant 1 : index
    %c0_77 = arith.constant 0 : index
    %47 = vector.load %arg11[%c2_75, %c1_76, %c0_77] : memref<18x18x8xf32, #tpu.memory_space<vmem>>, vector<16x16x8xf32>
    %c2_78 = arith.constant 2 : index
    %c2_79 = arith.constant 2 : index
    %c0_80 = arith.constant 0 : index
    %48 = vector.load %arg11[%c2_78, %c2_79, %c0_80] : memref<18x18x8xf32, #tpu.memory_space<vmem>>, vector<16x16x8xf32>
    %49 = tpu.concatenate %40, %41, %42, %43, %44, %45, %46, %47, %48 in 2 : vector<16x16x8xf32>, vector<16x16x8xf32>, vector<16x16x8xf32>, vector<16x16x8xf32>, vector<16x16x8xf32>, vector<16x16x8xf32>, vector<16x16x8xf32>, vector<16x16x8xf32>, vector<16x16x8xf32> -> vector<16x16x72xf32>
    %50 = vector.shape_cast %49 : vector<16x16x72xf32> to vector<256x72xf32>
    %c0_81 = arith.constant 0 : index
    %c0_82 = arith.constant 0 : index
    %51 = vector.load %arg3[%c0_81, %c0_82] : memref<8x72xf32, #tpu.memory_space<vmem>>, vector<8x72xf32>
    %cst_83 = arith.constant dense<0.000000e+00> : vector<8x256xf32>
    %52 = tpu.matmul %51, %50, %cst_83 {dimension_numbers = #tpu.dot_dimension_numbers<[1], [1], [0], [0], [0, 0, 1, 0], [], []>} : vector<8x72xf32>, vector<256x72xf32>, vector<8x256xf32> -> vector<8x256xf32>
    %c0_84 = arith.constant 0 : index
    %c0_85 = arith.constant 0 : index
    %53 = vector.load %arg4[%c0_84, %c0_85] : memref<8x4xf32, #tpu.memory_space<vmem>>, vector<8x4xf32>
    %54 = vector.shape_cast %11 : vector<16x16x4xf32> to vector<256x4xf32>
    %cst_86 = arith.constant dense<0.000000e+00> : vector<8x256xf32>
    %55 = tpu.matmul %53, %54, %cst_86 {dimension_numbers = #tpu.dot_dimension_numbers<[1], [1], [0], [0], [0, 0, 1, 0], [], []>} : vector<8x4xf32>, vector<256x4xf32>, vector<8x256xf32> -> vector<8x256xf32>
    %56 = arith.addf %52, %55 : vector<8x256xf32>
    %c0_87 = arith.constant 0 : index
    %c0_88 = arith.constant 0 : index
    %c0_89 = arith.constant 0 : index
    %57 = vector.load %arg9[%c0_87, %c0_88, %c0_89] : memref<1x8x256xf32, #tpu.memory_space<vmem>>, vector<1x8x256xf32>
    %58 = vector.shape_cast %57 : vector<1x8x256xf32> to vector<8x256xf32>
    %59 = vector.shape_cast %56 : vector<8x256xf32> to vector<1x8x256xf32>
    tpu.vector_store %arg9[%c0_87, %c0_88, %c0_89], %59 {strides = array<i32>} : memref<1x8x256xf32, #tpu.memory_space<vmem>>, vector<1x8x256xf32>,
    return
  }
  func.func @transform_0(%arg0: i32) -> (i32, i32, i32, i32) {
    %c0_i32 = arith.constant 0 : i32
    %c0_i32_0 = arith.constant 0 : i32
    %c0_i32_1 = arith.constant 0 : i32
    %c0_i32_2 = arith.constant 0 : i32
    return %arg0, %c0_i32, %c0_i32_0, %c0_i32_1 : i32, i32, i32, i32
  }
  func.func @transform_1(%arg0: i32) -> (i32, i32) {
    %c0_i32 = arith.constant 0 : i32
    %c0_i32_0 = arith.constant 0 : i32
    %c0_i32_1 = arith.constant 0 : i32
    return %c0_i32, %c0_i32_0 : i32, i32
  }
  func.func @transform_2(%arg0: i32) -> (i32, i32) {
    %c0_i32 = arith.constant 0 : i32
    %c0_i32_0 = arith.constant 0 : i32
    %c0_i32_1 = arith.constant 0 : i32
    return %c0_i32, %c0_i32_0 : i32, i32
  }
  func.func @transform_3(%arg0: i32) -> (i32, i32) {
    %c0_i32 = arith.constant 0 : i32
    %c0_i32_0 = arith.constant 0 : i32
    %c0_i32_1 = arith.constant 0 : i32
    return %c0_i32, %c0_i32_0 : i32, i32
  }
  func.func @transform_4(%arg0: i32) -> (i32, i32) {
    %c0_i32 = arith.constant 0 : i32
    %c0_i32_0 = arith.constant 0 : i32
    %c0_i32_1 = arith.constant 0 : i32
    return %c0_i32, %c0_i32_0 : i32, i32
  }
  func.func @transform_5(%arg0: i32) -> (i32, i32) {
    %c0_i32 = arith.constant 0 : i32
    %c0_i32_0 = arith.constant 0 : i32
    %c0_i32_1 = arith.constant 0 : i32
    return %c0_i32, %c0_i32_0 : i32, i32
  }
  func.func @transform_6(%arg0: i32) -> (i32, i32) {
    %c0_i32 = arith.constant 0 : i32
    %c0_i32_0 = arith.constant 0 : i32
    %c0_i32_1 = arith.constant 0 : i32
    return %c0_i32, %c0_i32_0 : i32, i32
  }
  func.func @transform_7(%arg0: i32) -> (i32, i32) {
    %c0_i32 = arith.constant 0 : i32
    %c0_i32_0 = arith.constant 0 : i32
    %c0_i32_1 = arith.constant 0 : i32
    return %c0_i32, %c0_i32_0 : i32, i32
  }
  func.func @transform_8(%arg0: i32) -> (i32, i32, i32) {
    %c0_i32 = arith.constant 0 : i32
    %c0_i32_0 = arith.constant 0 : i32
    %c0_i32_1 = arith.constant 0 : i32
    return %arg0, %c0_i32, %c0_i32_0 : i32, i32, i32
  }
}

</mosaic_0001>

<bundles_post_ra>
// kernel: tpu_custom_call.1
= control target key start
LH: loop header
LB: loop body
LE: loop exit
PB: predicated region body
PF: predicated region fallthrough
CT: control target
= control target key end

     0   :  { %13 = vsyncpa [#allocation5], 0  ;;  %s8573_s0 = inlined_call_operand.vmem [shape: f32[2,16,16,4], index: 0, kind: input, shape index: {}]   ;;  %s8574_s1 = inlined_call_operand.vmem [shape: f32[36,8], index: 1, kind: input, shape index: {}]   ;;  %s8575_s2 = inlined_call_operand.vmem [shape: f32[8,72], index: 2, kind: input, shape index: {}]   ;;  %s8576_s3 = inlined_call_operand.vmem [shape: f32[8,4], index: 3, kind: input, shape index: {}]   ;;  %s8577_s4 = inlined_call_operand.vmem [shape: f32[1,4], index: 4, kind: input, shape index: {}]   ;;  %s8578_s5 = inlined_call_operand.vmem [shape: f32[1,4], index: 5, kind: input, shape index: {}]   ;;  %s8579_s6 = inlined_call_operand.vmem [shape: f32[1,8], index: 6, kind: input, shape index: {}]   ;;  %s8580_s7 = inlined_call_operand.vmem [shape: f32[1,8], index: 7, kind: input, shape index: {}]   ;;  %s8581_s8 = inlined_call_operand.hbm [shape: f32[2,8,256], index: 8, kind: output, shape index: {}]  }
   0x1   :  { %15 = vsyncpa [#allocation5 + $0x1], 0  ;;  %s5128_s27 = smov 0   ;;  %s5130_s28 = smov 0  }
   0x2   :  { %s5132_s29 = smov 0   ;;  %s5134_s30 = smov 0  }
   0x3 LB: > { %s5149_s9 = sadd.s32 4294967295, %s5067_s30   ;;  %s4632_s10 = sadd.s32 4294967294, %s5067_s30   ;;  %s5067_s30 = sphi %s5134_s30, %s9157_s30   ;;  %s5063_s29 = sphi %s5132_s29, %s9156_s29   ;;  %s5059_s28 = sphi %s5130_s28, %s9155_s28   ;;  %s5055_s27 = sphi %s5128_s27, %s9154_s27  }
   0x4   : > { %s5153_s11 = sadd.s32 1, %s5067_s30   ;;  %s201_s12 = sadd.s32 1, %s5063_s29 }
   0x5   : > { %s198_s13 = ssub.s32 %s5067_s30, %s5153_s11  ;;  %p211_p0 = scmp.ne.s32.totalorder %s5063_s29, %s5059_s28 }
   0x6   : > { %p199_p1 = scmp.eq.s32.totalorder %s198_s13, 0  ;;  %p212_p2 = scmp.eq.s32.totalorder %s5149_s9, 1 }
   0x7   : > { %p217_p3 = scmp.ne.s32.totalorder %s5059_s28, %s5055_s27  ;;  %p218_p4 = scmp.eq.s32.totalorder %s4632_s10, 1 }
   0x8   : > { %s5164_s14 = scalar_select %p199_p1, %s5063_s29, %s201_s12  }
   0x9   : > { %p5166_p5 = por %p212_p2, %p211_p0  ;;  %p5170_p6 = por %p218_p4, %p217_p3 }
   0xa   : > { %p4635_p7 = scmp.ge.s32.totalorder %s5067_s30, 1  ;;  %p265_p8 = scmp.lt.s32.totalorder %s5067_s30, 3 }
   0xc   : > { %p266_p9 = pnand %p4635_p7, %p265_p8 }
   0xe   : > { %269 = sbr.rel (%p266_p9) target bundleno = 1655 (0x677), region = 52 }
  0x13   : > { %vm446_vm0 = vcmask 31744   ;;  %vm449_vm1 = vcmask 25600   ;;  %p299_p10 = scmp.lt.s32.totalorder %s5149_s9, 1  ;;  %v8611_v0 = vmov 0.0   ;;  %v5291_v1 = vld [vmem:[%s8577_s4] ss:$0 sm:$0xff] }
  0x14   : > { %447 = vst.msk [vmem:[#allocation2] sm:$0xff] %vm446_vm0, %v8611_v0  ;;  %448 = vst.msk [vmem:[#allocation2 + $0x8] sm:$0xff] %vm446_vm0, %v8611_v0  ;;  %v5301_v2 = vld [vmem:[%s8578_s5] ss:$0 sm:$0xff]  ;;  %s5070_s26 = smov 4   ;;  %vm1880_vm2 = vcmask 64512  }
  0x15   : > { %451 = vst.msk [vmem:[#allocation2 + $0x18] sm:$0xff] %vm446_vm0, %v8611_v0  ;;  %452 = vst.msk [vmem:[#allocation2 + $0x20] sm:$0xff] %vm446_vm0, %v8611_v0  ;;  %s300_s17 = scalar_select %p299_p10, %s5149_s9, 1  ;;  %vm2213_vm3 = vcmask 1043456   ;;  %vm1913_vm4 = vcmask 97280   ;;  %vm1946_vm5 = vcmask 130048  }
  0x16   : > { %454 = vst.msk [vmem:[#allocation2 + $0x30] sm:$0xff] %vm446_vm0, %v8611_v0  ;;  %455 = vst.msk [vmem:[#allocation2 + $0x38] sm:$0xff] %vm446_vm0, %v8611_v0  ;;  %s5071_s10 = smov 8   ;;  %s5072_s12 = smov 12   ;;  %vm1979_vm6 = vcmask 162816   ;;  %vm2012_vm7 = vcmask 195584  }
  0x17   : > { %457 = vst.msk [vmem:[#allocation2 + $0x48] sm:$0xff] %vm446_vm0, %v8611_v0  ;;  %458 = vst.msk [vmem:[#allocation2 + $0x50] sm:$0xff] %vm446_vm0, %v8611_v0  ;;  %s4747_s18 = sshll.u32 %s300_s17, 8  ;;  %s5073_s13 = smov 16   ;;  %vm2045_vm8 = vcmask 228352   ;;  %vm2078_vm9 = vcmask 261120  }
  0x18   : > { %460 = vst.msk [vmem:[#allocation2 + $0x60] sm:$0xff] %vm446_vm0, %v8611_v0  ;;  %461 = vst.msk [vmem:[#allocation2 + $0x68] sm:$0xff] %vm446_vm0, %v8611_v0  ;;  %s5296_s23 = scalar_lea.vmem %s8573_s0, %s4747_s18  ;;  %s5074_s17 = smov 20   ;;  %vm2116_vm10 = vcmask 293888   ;;  %vm2554_vm11 = vcmask 58368   ;;  %vm4114_vm12 = vcmask 392192  }
  0x19   : > { %463 = vst.msk [vmem:[#allocation2 + $0x78] sm:$0xff] %vm446_vm0, %v8611_v0  ;;  %464 = vst.msk [vmem:[#allocation2 + $0x80] sm:$0xff] %vm446_vm0, %v8611_v0  ;;  %v306_v3 = vld [vmem:[%s5296_s23 + $0x10] sm:$0xff]  ;;  %v304_v4 = vld [vmem:[%s5296_s23] sm:$0xff]  ;;  %s5075_s18 = smov 24   ;;  %s5076_s19 = smov 28  }
  0x1a   : > { %466 = vst.msk [vmem:[#allocation2 + $0x90] sm:$0xff] %vm446_vm0, %v8611_v0  ;;  %467 = vst.msk [vmem:[#allocation2 + $0x98] sm:$0xff] %vm446_vm0, %v8611_v0  ;;  %v308_v5 = vld [vmem:[%s5296_s23 + $0x20] sm:$0xff]  ;;  %v345_v6 = vmul.f32 %v5291_v1, %v306_v3  ;;  %v343_v7 = vmul.f32 %v5291_v1, %v304_v4  ;;  %v305_v9 = vld [vmem:[%s5296_s23 + $0x8] sm:$0xff]  ;;  %s5077_s20 = smov 32   ;;  %s5080_s25 = smov 56  }
  0x1b   : > { %469 = vst.msk [vmem:[#allocation2 + $0xa8] sm:$0xff] %vm446_vm0, %v8611_v0  ;;  %470 = vst.msk [vmem:[#allocation2 + $0xb0] sm:$0xff] %vm446_vm0, %v8611_v0  ;;  %v347_v8 = vmul.f32 %v5291_v1, %v308_v5  ;;  %v310_v10 = vld [vmem:[%s5296_s23 + $0x30] sm:$0xff]  ;;  %v307_v11 = vld [vmem:[%s5296_s23 + $0x18] sm:$0xff]  ;;  %v344_v13 = vmul.f32 %v5291_v1, %v305_v9  ;;  %vm4081_vm13 = vcmask 326656   ;;  %vm4147_vm14 = vcmask 457728  }
  0x1c   : > { %472 = vst.msk [vmem:[#allocation2 + $0xc0] sm:$0xff] %vm446_vm0, %v8611_v0  ;;  %473 = vst.msk [vmem:[#allocation2 + $0xc8] sm:$0xff] %vm446_vm0, %v8611_v0  ;;  %v567_v12 = vld [vmem:[#allocation2 + $0x1] sm:$0xff]  ;;  %v349_v14 = vmul.f32 %v5291_v1, %v310_v10  ;;  %v346_v15 = vmul.f32 %v5291_v1, %v307_v11  ;;  %v5318_v18 = vadd.f32 %v5301_v2, %v345_v6  ;;  %v314_v27 = vld [vmem:[%s5296_s23 + $0x50] sm:$0xff]  ;;  %vm4180_vm15 = vcmask 523264   ;;  %s4748_s22 = sshll.u32 %s5149_s9, 8 }
  0x1d   : > { %475 = vst.msk [vmem:[#allocation2 + $0xd8] sm:$0xff] %vm446_vm0, %v8611_v0  ;;  %476 = vst.msk [vmem:[#allocation2 + $0xe0] sm:$0xff] %vm446_vm0, %v8611_v0  ;;  %v312_v16 = vld [vmem:[%s5296_s23 + $0x40] sm:$0xff]  ;;  %856 = vrot.lane.b32.xlu0 %v567_v12, %s5070_s26  ;;  %v5321_v19 = vadd.f32 %v5301_v2, %v343_v7  ;;  %v5324_v20 = vadd.f32 %v5301_v2, %v347_v8  ;;  %v309_v22 = vld [vmem:[%s5296_s23 + $0x28] sm:$0xff]  ;;  %v5329_v23 = vadd.f32 %v5301_v2, %v344_v13  ;;  %s5082_s9 = smov [#allocation4]  }
  0x1e   : > { %478 = vst.msk [vmem:[#allocation2 + $0xf0] sm:$0xff] %vm446_vm0, %v8611_v0  ;;  %479 = vst.msk [vmem:[#allocation2 + $0xf8] sm:$0xff] %vm446_vm0, %v8611_v0  ;;  %v351_v21 = vmul.f32 %v5291_v1, %v312_v16  ;;  %v5332_v24 = vadd.f32 %v5301_v2, %v349_v14  ;;  %v5335_v25 = vadd.f32 %v5301_v2, %v346_v15  ;;  %v311_v28 = vld [vmem:[%s5296_s23 + $0x38] sm:$0xff]  ;;  %v316_v29 = vld [vmem:[%s5296_s23 + $0x60] sm:$0xff]  ;;  %v8586_v30 = vmax.f32 %v5318_v18, 0.0 }
  0x1f   : > { %481 = vst.msk [vmem:[#allocation2 + $0x108] sm:$0xff] %vm446_vm0, %v8611_v0  ;;  %482 = vst.msk [vmem:[#allocation2 + $0x110] sm:$0xff] %vm446_vm0, %v8611_v0  ;;  %v348_v26 = vmul.f32 %v5291_v1, %v309_v22  ;;  %v8582_v31 = vmax.f32 %v5321_v19, 0.0  ;;  %v8590_v32 = vmax.f32 %v5324_v20, 0.0  ;;  %v313_v34 = vld [vmem:[%s5296_s23 + $0x48] sm:$0xff]  ;;  %v318_v35 = vld [vmem:[%s5296_s23 + $0x70] sm:$0xff]  ;;  %v353_v43 = vmul.f32 %v5291_v1, %v314_v27 }
  0x20   : > { %484 = vst.msk [vmem:[#allocation2 + $0x120] sm:$0xff] %vm446_vm0, %v8611_v0  ;;  %485 = vst.msk [vmem:[#allocation2 + $0x128] sm:$0xff] %vm446_vm0, %v8611_v0  ;;  %v5345_v33 = vadd.f32 %v5301_v2, %v351_v21  ;;  %v315_v36 = vld [vmem:[%s5296_s23 + $0x58] sm:$0xff]  ;;  %v8584_v37 = vmax.f32 %v5329_v23, 0.0  ;;  %v8594_v38 = vmax.f32 %v5332_v24, 0.0  ;;  %v8588_v39 = vmax.f32 %v5335_v25, 0.0 }
  0x21   : > { %487 = vst.msk [vmem:[#allocation2 + $0x138] sm:$0xff] %vm446_vm0, %v8611_v0  ;;  %488 = vst.msk [vmem:[#allocation2 + $0x140] sm:$0xff] %vm446_vm0, %v8611_v0  ;;  %v5354_v40 = vadd.f32 %v5301_v2, %v348_v26  ;;  %v320_v41 = vld [vmem:[%s5296_s23 + $0x80] sm:$0xff]  ;;  %v350_v44 = vmul.f32 %v5291_v1, %v311_v28  ;;  %v355_v45 = vmul.f32 %v5291_v1, %v316_v29  ;;  %v317_v46 = vld [vmem:[%s5296_s23 + $0x68] sm:$0xff] }
  0x22   : > { %490 = vst.msk [vmem:[#allocation2 + $0x150] sm:$0xff] %vm446_vm0, %v8611_v0  ;;  %491 = vst.msk [vmem:[#allocation2 + $0x158] sm:$0xff] %vm446_vm0, %v8611_v0  ;;  %v8598_v42 = vmax.f32 %v5345_v33, 0.0  ;;  %v352_v48 = vmul.f32 %v5291_v1, %v313_v34  ;;  %v357_v49 = vmul.f32 %v5291_v1, %v318_v35  ;;  %v354_v50 = vmul.f32 %v5291_v1, %v315_v36  ;;  %v322_v59 = vld [vmem:[%s5296_s23 + $0x90] sm:$0xff]  ;;  %v319_v60 = vld [vmem:[%s5296_s23 + $0x78] sm:$0xff] }
  0x23   : > { %493 = vst.msk [vmem:[#allocation2 + $0x168] sm:$0xff] %vm446_vm0, %v8611_v0  ;;  %494 = vst.msk [vmem:[#allocation2 + $0x170] sm:$0xff] %vm446_vm0, %v8611_v0  ;;  %v8592_v47 = vmax.f32 %v5354_v40, 0.0  ;;  %v5389_v51 = vadd.f32 %v5301_v2, %v353_v43  ;;  %v5392_v52 = vadd.f32 %v5301_v2, %v350_v44  ;;  %v5395_v53 = vadd.f32 %v5301_v2, %v355_v45  ;;  %v324_v61 = vld [vmem:[%s5296_s23 + $0xa0] sm:$0xff]  ;;  %v321_v5 = vld [vmem:[%s5296_s23 + $0x88] sm:$0xff] }
  0x24   : > { %496 = vst.msk [vmem:[#allocation2 + $0x180] sm:$0xff] %vm446_vm0, %v8611_v0  ;;  %497 = vst.msk [vmem:[#allocation2 + $0x188] sm:$0xff] %vm446_vm0, %v8611_v0  ;;  %v359_v54 = vmul.f32 %v5291_v1, %v320_v41  ;;  %v5402_v55 = vadd.f32 %v5301_v2, %v352_v48  ;;  %v5405_v56 = vadd.f32 %v5301_v2, %v357_v49  ;;  %v326_v6 = vld [vmem:[%s5296_s23 + $0xb0] sm:$0xff]  ;;  %v323_v7 = vld [vmem:[%s5296_s23 + $0x98] sm:$0xff] }
  0x25   : > { %499 = vst.msk [vmem:[#allocation2 + $0x198] sm:$0xff] %vm446_vm0, %v8611_v0  ;;  %500 = vst.msk [vmem:[#allocation2 + $0x1a0] sm:$0xff] %vm446_vm0, %v8611_v0  ;;  %v5408_v57 = vadd.f32 %v5301_v2, %v354_v50  ;;  %v356_v58 = vmul.f32 %v5291_v1, %v317_v46  ;;  %v8602_v62 = vmax.f32 %v5389_v51, 0.0  ;;  %v8596_v63 = vmax.f32 %v5392_v52, 0.0  ;;  %v328_v16 = vld [vmem:[%s5296_s23 + $0xc0] sm:$0xff]  ;;  %v325_v29 = vld [vmem:[%s5296_s23 + $0xa8] sm:$0xff] }
  0x26   : > { %450 = vst.msk [vmem:[#allocation2 + $0x10] sm:$0x3] %vm449_vm1, %v8611_v0  ;;  %453 = vst.msk [vmem:[#allocation2 + $0x28] sm:$0x3] %vm449_vm1, %v8611_v0  ;;  %v8606_v3 = vmax.f32 %v5395_v53, 0.0  ;;  %v5418_v4 = vadd.f32 %v5301_v2, %v359_v54  ;;  %v8600_v8 = vmax.f32 %v5402_v55, 0.0  ;;  %v361_v13 = vmul.f32 %v5291_v1, %v322_v59 }
  0x27   : > { %456 = vst.msk [vmem:[#allocation2 + $0x40] sm:$0x3] %vm449_vm1, %v8611_v0  ;;  %459 = vst.msk [vmem:[#allocation2 + $0x58] sm:$0x3] %vm449_vm1, %v8611_v0  ;;  %v8610_v9 = vmax.f32 %v5405_v56, 0.0  ;;  %v8604_v10 = vmax.f32 %v5408_v57, 0.0  ;;  %v5427_v11 = vadd.f32 %v5301_v2, %v356_v58  ;;  %v358_v14 = vmul.f32 %v5291_v1, %v319_v60 }
  0x28   : > { %462 = vst.msk [vmem:[#allocation2 + $0x70] sm:$0x3] %vm449_vm1, %v8611_v0  ;;  %465 = vst.msk [vmem:[#allocation2 + $0x88] sm:$0x3] %vm449_vm1, %v8611_v0  ;;  %v8583_v12 = vmax.f32 %v5418_v4, 0.0  ;;  %v363_v15 = vmul.f32 %v5291_v1, %v324_v61  ;;  %v360_v26 = vmul.f32 %v5291_v1, %v321_v5  ;;  %v365_v27 = vmul.f32 %v5291_v1, %v326_v6  ;;  %v330_v41 = vld [vmem:[%s5296_s23 + $0xd0] sm:$0xff] }
  0x29   : > { %468 = vst.msk [vmem:[#allocation2 + $0xa0] sm:$0x3] %vm449_vm1, %v8611_v0  ;;  %471 = vst.msk [vmem:[#allocation2 + $0xb8] sm:$0x3] %vm449_vm1, %v8611_v0  ;;  %v8608_v22 = vmax.f32 %v5427_v11, 0.0  ;;  %v362_v28 = vmul.f32 %v5291_v1, %v323_v7  ;;  %v5469_v34 = vadd.f32 %v5301_v2, %v361_v13  ;;  %v5472_v35 = vadd.f32 %v5301_v2, %v358_v14  ;;  %v327_v50 = vld [vmem:[%s5296_s23 + $0xb8] sm:$0xff] }
  0x2a   : > { %474 = vst.msk [vmem:[#allocation2 + $0xd0] sm:$0x3] %vm449_vm1, %v8611_v0  ;;  %477 = vst.msk [vmem:[#allocation2 + $0xe8] sm:$0x3] %vm449_vm1, %v8611_v0  ;;  %v5475_v36 = vadd.f32 %v5301_v2, %v363_v15  ;;  %v5486_v45 = vadd.f32 %v5301_v2, %v360_v26  ;;  %v5489_v46 = vadd.f32 %v5301_v2, %v365_v27  ;;  %v332_v61 = vld [vmem:[%s5296_s23 + $0xe0] sm:$0xff]  ;;  %v329_v5 = vld [vmem:[%s5296_s23 + $0xc8] sm:$0xff] }
  0x2b   : > { %480 = vst.msk [vmem:[#allocation2 + $0x100] sm:$0x3] %vm449_vm1, %v8611_v0  ;;  %483 = vst.msk [vmem:[#allocation2 + $0x118] sm:$0x3] %vm449_vm1, %v8611_v0  ;;  %v5492_v48 = vadd.f32 %v5301_v2, %v362_v28  ;;  %v367_v49 = vmul.f32 %v5291_v1, %v328_v16  ;;  %v8587_v54 = vmax.f32 %v5469_v34, 0.0  ;;  %v8613_v58 = vmax.f32 %v5472_v35, 0.0 }
  0x2c   : > { %486 = vst.msk [vmem:[#allocation2 + $0x130] sm:$0x3] %vm449_vm1, %v8611_v0  ;;  %489 = vst.msk [vmem:[#allocation2 + $0x148] sm:$0x3] %vm449_vm1, %v8611_v0  ;;  %v8591_v59 = vmax.f32 %v5475_v36, 0.0  ;;  %v364_v60 = vmul.f32 %v5291_v1, %v325_v29  ;;  %v331_v6 = vld [vmem:[%s5296_s23 + $0xd8] sm:$0xff]  ;;  %v369_v27 = vmul.f32 %v5291_v1, %v330_v41  ;;  %v366_v28 = vmul.f32 %v5291_v1, %v327_v50 }
  0x2d   : > { %492 = vst.msk [vmem:[#allocation2 + $0x160] sm:$0x3] %vm449_vm1, %v8611_v0  ;;  %495 = vst.msk [vmem:[#allocation2 + $0x178] sm:$0x3] %vm449_vm1, %v8611_v0  ;;  %v568_v17 = vld [vmem:[#allocation2 + $0x9] sm:$0xff]  ;;  %v8585_v7 = vmax.f32 %v5486_v45, 0.0  ;;  %v5507_v15 = vadd.f32 %v5301_v2, %v367_v49  ;;  %v371_v50 = vmul.f32 %v5291_v1, %v332_v61 }
  0x2e   : > { %498 = vst.msk [vmem:[#allocation2 + $0x190] sm:$0x3] %vm449_vm1, %v8611_v0  ;;  %501 = vst.msk [vmem:[#allocation2 + $0x1a8] sm:$0x3] %vm449_vm1, %v8611_v0  ;;  %858 = vrot.lane.b32.xlu0 %v568_v17, %s5070_s26  ;;  %v8595_v13 = vmax.f32 %v5489_v46, 0.0  ;;  %v8589_v14 = vmax.f32 %v5492_v48, 0.0  ;;  %v5524_v26 = vadd.f32 %v5301_v2, %v364_v60  ;;  %v368_v60 = vmul.f32 %v5291_v1, %v329_v5 }
  0x2f   : > { %505 = vst.msk [vmem:[#allocation2 + $0x31] sm:$0xff] %vm446_vm0, %v8586_v30  ;;  %503 = vst.msk [vmem:[#allocation2 + $0x19] sm:$0xff] %vm446_vm0, %v8582_v31  ;;  %v333_v16 = vld [vmem:[%s5296_s23 + $0xe8] sm:$0xff]  ;;  %v8599_v41 = vmax.f32 %v5507_v15, 0.0  ;;  %v370_v31 = vmul.f32 %v5291_v1, %v331_v6  ;;  %v5557_v61 = vadd.f32 %v5301_v2, %v371_v50  ;;  %vm4385_vm1 = vcmask 588800  }
  0x30   : > { %507 = vst.msk [vmem:[#allocation2 + $0x49] sm:$0xff] %vm446_vm0, %v8590_v32  ;;  %504 = vst.msk [vmem:[#allocation2 + $0x21] sm:$0xff] %vm446_vm0, %v8584_v37  ;;  %v5547_v37 = vadd.f32 %v5301_v2, %v369_v27  ;;  %v372_v30 = vmul.f32 %v5291_v1, %v333_v16  ;;  %v5560_v5 = vadd.f32 %v5301_v2, %v368_v60 }
  0x31   : > { %509 = vst.msk [vmem:[#allocation2 + $0x61] sm:$0xff] %vm446_vm0, %v8594_v38  ;;  %506 = vst.msk [vmem:[#allocation2 + $0x39] sm:$0xff] %vm446_vm0, %v8588_v39  ;;  %v5563_v6 = vadd.f32 %v5301_v2, %v370_v31  ;;  %v8607_v60 = vmax.f32 %v5557_v61, 0.0 }
  0x32   : > { %511 = vst.msk [vmem:[#allocation2 + $0x79] sm:$0xff] %vm446_vm0, %v8598_v42  ;;  %508 = vst.msk [vmem:[#allocation2 + $0x51] sm:$0xff] %vm446_vm0, %v8592_v47  ;;  %v8603_v16 = vmax.f32 %v5547_v37, 0.0 }
  0x33   : > { %513 = vst.msk [vmem:[#allocation2 + $0x91] sm:$0xff] %vm446_vm0, %v8602_v62  ;;  %510 = vst.msk [vmem:[#allocation2 + $0x69] sm:$0xff] %vm446_vm0, %v8596_v63  ;;  %v8605_v39 = vmax.f32 %v5563_v6, 0.0 }
  0x34   : > { %515 = vst.msk [vmem:[#allocation2 + $0xa9] sm:$0xff] %vm446_vm0, %v8606_v3  ;;  %512 = vst.msk [vmem:[#allocation2 + $0x81] sm:$0xff] %vm446_vm0, %v8600_v8 }
  0x35   : > { %517 = vst.msk [vmem:[#allocation2 + $0xc1] sm:$0xff] %vm446_vm0, %v8610_v9  ;;  %514 = vst.msk [vmem:[#allocation2 + $0x99] sm:$0xff] %vm446_vm0, %v8604_v10 }
  0x36   : > { %v5443_v17 = vld [vmem:[#allocation2 + $0x31] sm:$0xff]  ;;  %v5445_v21 = vld [vmem:[#allocation2 + $0x19] sm:$0xff]  ;;  %519 = vst.msk [vmem:[#allocation2 + $0xd9] sm:$0xff] %vm446_vm0, %v8583_v12  ;;  %516 = vst.msk [vmem:[#allocation2 + $0xb1] sm:$0xff] %vm446_vm0, %v8608_v22  ;;  %v8593_v12 = vmax.f32 %v5524_v26, 0.0 }
  0x37   : > { %864 = vrot.lane.b32.xlu0 %v5443_v17, %s5070_s26  ;;  %860 = vrot.lane.b32.xlu1 %v5445_v21, %s5070_s26  ;;  %v5478_v43 = vld [vmem:[#allocation2 + $0x49] sm:$0xff]  ;;  %v5480_v44 = vld [vmem:[#allocation2 + $0x21] sm:$0xff]  ;;  %521 = vst.msk [vmem:[#allocation2 + $0xf1] sm:$0xff] %vm446_vm0, %v8587_v54  ;;  %518 = vst.msk [vmem:[#allocation2 + $0xc9] sm:$0xff] %vm446_vm0, %v8613_v58  ;;  %v8601_v54 = vmax.f32 %v5560_v5, 0.0 }
  0x38   : > { %523 = vst.msk [vmem:[#allocation2 + $0x109] sm:$0xff] %vm446_vm0, %v8591_v59  ;;  %v5528_v29 = vld [vmem:[#allocation2 + $0x61] sm:$0xff]  ;;  %v5530_v49 = vld [vmem:[#allocation2 + $0x39] sm:$0xff]  ;;  %520 = vst.msk [vmem:[#allocation2 + $0xe1] sm:$0xff] %vm446_vm0, %v8585_v7  ;;  %v5550_v7 = vadd.f32 %v5301_v2, %v366_v28  ;;  %v5575_v28 = vadd.f32 %v5301_v2, %v372_v30 }
  0x39   : > { %525 = vst.msk [vmem:[#allocation2 + $0x121] sm:$0xff] %vm446_vm0, %v8595_v13  ;;  %522 = vst.msk [vmem:[#allocation2 + $0xf9] sm:$0xff] %vm446_vm0, %v8589_v14  ;;  %v5577_v50 = vld [vmem:[#allocation2 + $0x79] sm:$0xff]  ;;  %v5579_v31 = vld [vmem:[#allocation2 + $0x51] sm:$0xff] }
  0x3a   : > { %527 = vst.msk [vmem:[#allocation2 + $0x139] sm:$0xff] %vm446_vm0, %v8599_v41  ;;  %524 = vst.msk [vmem:[#allocation2 + $0x111] sm:$0xff] %vm446_vm0, %v8593_v12  ;;  %v8597_v27 = vmax.f32 %v5550_v7, 0.0  ;;  %v8609_v30 = vmax.f32 %v5575_v28, 0.0  ;;  %v5607_v14 = vld [vmem:[#allocation2 + $0x91] sm:$0xff]  ;;  %v5609_v32 = vld [vmem:[#allocation2 + $0x69] sm:$0xff] }
  0x3b   : > { %868 = vrot.lane.b32.xlu0 %v5478_v43, %s5070_s26  ;;  %862 = vrot.lane.b32.xlu1 %v5480_v44, %s5070_s26  ;;  %529 = vst.msk [vmem:[#allocation2 + $0x151] sm:$0xff] %vm446_vm0, %v8603_v16  ;;  %531 = vst.msk [vmem:[#allocation2 + $0x169] sm:$0xff] %vm446_vm0, %v8607_v60  ;;  %v5615_v59 = vld [vmem:[#allocation2 + $0xa9] sm:$0xff]  ;;  %v5617_v47 = vld [vmem:[#allocation2 + $0x81] sm:$0xff] }
  0x3c   : > { %526 = vst.msk [vmem:[#allocation2 + $0x129] sm:$0xff] %vm446_vm0, %v8597_v27  ;;  %528 = vst.msk [vmem:[#allocation2 + $0x141] sm:$0xff] %vm446_vm0, %v8601_v54  ;;  %v5623_v12 = vld [vmem:[#allocation2 + $0xc1] sm:$0xff]  ;;  %v5625_v38 = vld [vmem:[#allocation2 + $0x99] sm:$0xff] }
  0x3d   : > { %530 = vst.msk [vmem:[#allocation2 + $0x159] sm:$0xff] %vm446_vm0, %v8605_v39  ;;  %532 = vst.msk [vmem:[#allocation2 + $0x171] sm:$0xff] %vm446_vm0, %v8609_v30  ;;  %v5631_v13 = vld [vmem:[#allocation2 + $0xd9] sm:$0xff]  ;;  %v5633_v63 = vld [vmem:[#allocation2 + $0xb1] sm:$0xff] }
  0x3e   : > { %v5639_v27 = vld [vmem:[#allocation2 + $0xf1] sm:$0xff]  ;;  %v5641_v42 = vld [vmem:[#allocation2 + $0xc9] sm:$0xff]  ;;  %2552 = vst.msk [vmem:[#allocation3] sm:$0xff] %vm1880_vm2, %v8611_v0  ;;  %2553 = vst.msk [vmem:[#allocation3 + $0x8] sm:$0xff] %vm1880_vm2, %v8611_v0 }
  0x3f   : > { %872 = vrot.lane.b32.xlu0 %v5528_v29, %s5070_s26  ;;  %866 = vrot.lane.b32.xlu1 %v5530_v49, %s5070_s26  ;;  %v5647_v41 = vld [vmem:[#allocation2 + $0x109] sm:$0xff]  ;;  %v5649_v8 = vld [vmem:[#allocation2 + $0xe1] sm:$0xff]  ;;  %2556 = vst.msk [vmem:[#allocation3 + $0x18] sm:$0xff] %vm1880_vm2, %v8611_v0  ;;  %2557 = vst.msk [vmem:[#allocation3 + $0x20] sm:$0xff] %vm1880_vm2, %v8611_v0 }
  0x40   : > { %v5655_v54 = vld [vmem:[#allocation2 + $0x121] sm:$0xff]  ;;  %v5657_v62 = vld [vmem:[#allocation2 + $0xf9] sm:$0xff]  ;;  %v334_v16 = vld [vmem:[%s5296_s23 + $0xf0] sm:$0xff]  ;;  %2559 = vst.msk [vmem:[#allocation3 + $0x30] sm:$0xff] %vm1880_vm2, %v8611_v0 }
  0x41   : > { %v373_v10 = vmul.f32 %v5291_v1, %v334_v16  ;;  %v5666_v3 = vld [vmem:[#allocation2 + $0x139] sm:$0xff]  ;;  %v5668_v60 = vld [vmem:[#allocation2 + $0x111] sm:$0xff]  ;;  %2560 = vst.msk [vmem:[#allocation3 + $0x38] sm:$0xff] %vm1880_vm2, %v8611_v0  ;;  %2562 = vst.msk [vmem:[#allocation3 + $0x48] sm:$0xff] %vm1880_vm2, %v8611_v0 }
  0x42   : > { %8651 = vst [vmem:[#allocation7_spill] sm:$0xff] %v5668_v60  ;;  %2563 = vst.msk [vmem:[#allocation3 + $0x50] sm:$0xff] %vm1880_vm2, %v8611_v0  ;;  %v5747_v16 = vld [vmem:[#allocation2 + $0x151] sm:$0xff] }
  0x43   : > { %876 = vrot.lane.b32.xlu0 %v5577_v50, %s5070_s26  ;;  %870 = vrot.lane.b32.xlu1 %v5579_v31, %s5070_s26  ;;  %v412_v39 = vadd.f32 %v5301_v2, %v373_v10  ;;  %2565 = vst.msk [vmem:[#allocation3 + $0x60] sm:$0xff] %vm1880_vm2, %v8611_v0  ;;  %2566 = vst.msk [vmem:[#allocation3 + $0x68] sm:$0xff] %vm1880_vm2, %v8611_v0  ;;  %v5749_v22 = vld [vmem:[#allocation2 + $0x129] sm:$0xff]  ;;  %v335_v30 = vld [vmem:[%s5296_s23 + $0xf8] sm:$0xff] }
  0x44   : > { %2568 = vst.msk [vmem:[#allocation3 + $0x78] sm:$0xff] %vm1880_vm2, %v8611_v0  ;;  %2569 = vst.msk [vmem:[#allocation3 + $0x80] sm:$0xff] %vm1880_vm2, %v8611_v0  ;;  %v374_v9 = vmul.f32 %v5291_v1, %v335_v30  ;;  %v5760_v58 = vld [vmem:[#allocation2 + $0x141] sm:$0xff]  ;;  %v5767_v30 = vld [vmem:[#allocation2 + $0x159] sm:$0xff] }
  0x45   : > { %2571 = vst.msk [vmem:[#allocation3 + $0x90] sm:$0xff] %vm1880_vm2, %v8611_v0  ;;  %2572 = vst.msk [vmem:[#allocation3 + $0x98] sm:$0xff] %vm1880_vm2, %v8611_v0  ;;  %v444_v10 = vmax.f32 %v412_v39, 0.0  ;;  %v599_v1 = vld [vmem:[#allocation2 + $0x2] sm:$0xff] }
  0x46   : > { %2574 = vst.msk [vmem:[#allocation3 + $0xa8] sm:$0xff] %vm1880_vm2, %v8611_v0  ;;  %2575 = vst.msk [vmem:[#allocation3 + $0xb0] sm:$0xff] %vm1880_vm2, %v8611_v0  ;;  %v413_v39 = vadd.f32 %v5301_v2, %v374_v9  ;;  %v8653_v2 = vmax.f32 %v5472_v35, 0.0  ;;  %v5777_v9 = vld [vmem:[#allocation2 + $0x1a] sm:$0xff]  ;;  %v8655_v35 = vmax.f32 %v5575_v28, 0.0  ;;  %v5804_v28 = vld [vmem:[#allocation2 + $0x22] sm:$0xff] }
  0x47   : > { %880 = vrot.lane.b32.xlu0 %v5607_v14, %s5070_s26  ;;  %874 = vrot.lane.b32.xlu1 %v5609_v32, %s5070_s26  ;;  %2577 = vst.msk [vmem:[#allocation3 + $0xc0] sm:$0xff] %vm1880_vm2, %v8611_v0  ;;  %2578 = vst.msk [vmem:[#allocation3 + $0xc8] sm:$0xff] %vm1880_vm2, %v8611_v0 }
  0x48   : > { %2580 = vst.msk [vmem:[#allocation3 + $0xd8] sm:$0xff] %vm1880_vm2, %v8611_v0  ;;  %2581 = vst.msk [vmem:[#allocation3 + $0xe0] sm:$0xff] %vm1880_vm2, %v8611_v0 }
  0x49   : > { %2583 = vst.msk [vmem:[#allocation3 + $0xf0] sm:$0xff] %vm1880_vm2, %v8611_v0  ;;  %2584 = vst.msk [vmem:[#allocation3 + $0xf8] sm:$0xff] %vm1880_vm2, %v8611_v0 }
  0x4a   : > { %2586 = vst.msk [vmem:[#allocation3 + $0x108] sm:$0xff] %vm1880_vm2, %v8611_v0  ;;  %2587 = vst.msk [vmem:[#allocation3 + $0x110] sm:$0xff] %vm1880_vm2, %v8611_v0 }
  0x4b   : > { %884 = vrot.lane.b32.xlu0 %v5615_v59, %s5070_s26  ;;  %878 = vrot.lane.b32.xlu1 %v5617_v47, %s5070_s26  ;;  %2589 = vst.msk [vmem:[#allocation3 + $0x120] sm:$0xff] %vm1880_vm2, %v8611_v0  ;;  %2590 = vst.msk [vmem:[#allocation3 + $0x128] sm:$0xff] %vm1880_vm2, %v8611_v0 }
  0x4c   : > { %2592 = vst.msk [vmem:[#allocation3 + $0x138] sm:$0xff] %vm1880_vm2, %v8611_v0  ;;  %2593 = vst.msk [vmem:[#allocation3 + $0x140] sm:$0xff] %vm1880_vm2, %v8611_v0 }
  0x4d   : > { %2595 = vst.msk [vmem:[#allocation3 + $0x150] sm:$0xff] %vm1880_vm2, %v8611_v0  ;;  %2596 = vst.msk [vmem:[#allocation3 + $0x158] sm:$0xff] %vm1880_vm2, %v8611_v0 }
  0x4e   : > { %2598 = vst.msk [vmem:[#allocation3 + $0x168] sm:$0xff] %vm1880_vm2, %v8611_v0  ;;  %2599 = vst.msk [vmem:[#allocation3 + $0x170] sm:$0xff] %vm1880_vm2, %v8611_v0 }
  0x4f   : > { %888 = vrot.lane.b32.xlu0 %v5623_v12, %s5070_s26  ;;  %882 = vrot.lane.b32.xlu1 %v5625_v38, %s5070_s26  ;;  %2601 = vst.msk [vmem:[#allocation3 + $0x180] sm:$0xff] %vm1880_vm2, %v8611_v0  ;;  %2602 = vst.msk [vmem:[#allocation3 + $0x188] sm:$0xff] %vm1880_vm2, %v8611_v0 }
  0x50   : > { %2604 = vst.msk [vmem:[#allocation3 + $0x198] sm:$0xff] %vm1880_vm2, %v8611_v0  ;;  %2605 = vst.msk [vmem:[#allocation3 + $0x1a0] sm:$0xff] %vm1880_vm2, %v8611_v0  ;;  %v5758_v0 = vld [vmem:[#allocation2 + $0x169] sm:$0xff] }
  0x51   : > { %533 = vst.msk [vmem:[#allocation2 + $0x181] sm:$0xff] %vm446_vm0, %v444_v10  ;;  %8652 = vst [vmem:[#allocation8_spill] sm:$0xff] %v5760_v58 }
  0x53   : > { %892 = vrot.lane.b32.xlu0 %v5631_v13, %s5070_s26  ;;  %886 = vrot.lane.b32.xlu1 %v5633_v63, %s5070_s26 }
  0x57   : > { %896 = vrot.lane.b32.xlu0 %v5639_v27, %s5070_s26  ;;  %890 = vrot.lane.b32.xlu1 %v5641_v42, %s5070_s26 }
  0x5b   : > { %900 = vrot.lane.b32.xlu0 %v5647_v41, %s5070_s26  ;;  %894 = vrot.lane.b32.xlu1 %v5649_v8, %s5070_s26 }
  0x5f   : > { %904 = vrot.lane.b32.xlu0 %v5655_v54, %s5070_s26  ;;  %898 = vrot.lane.b32.xlu1 %v5657_v62, %s5070_s26 }
  0x63   : > { %908 = vrot.lane.b32.xlu0 %v5666_v3, %s5070_s26  ;;  %902 = vrot.lane.b32.xlu1 %v5668_v60, %s5070_s26  ;;  %v445_v60 = vmax.f32 %v413_v39, 0.0  ;;  %v5779_v39 = vld [vmem:[#allocation2 + $0x171] sm:$0xff] }
  0x65   : > { %534 = vst.msk [vmem:[#allocation2 + $0x189] sm:$0xff] %vm446_vm0, %v445_v60  ;;  %4786 = vmatprep.subr.msk.mxu1 %vm446_vm0, %v445_v60  ;;  %v5791_v60 = vld [vmem:[#allocation2 + $0x32] sm:$0xff] }
  0x66   : > { %4787 = vmatpush3.xpose.msk.msra.mxu1 %vm446_vm0, %v8653_v2  ;;  %v8658_v2 = vmax.f32 %v5395_v53, 0.0  ;;  %v8661_v53 = vmax.f32 %v5547_v37, 0.0  ;;  %v5844_v37 = vld [vmem:[#allocation2 + $0x92] sm:$0xff] }
  0x67   : > { %912 = vrot.lane.b32.xlu0 %v5747_v16, %s5070_s26  ;;  %906 = vrot.lane.b32.xlu1 %v5749_v22, %s5070_s26 }
  0x68   : > { %4788 = vmatprep.subr.msk.mxu1 %vm446_vm0, %v444_v10  ;;  %v600_v10 = vld [vmem:[#allocation2 + $0xa] sm:$0xff] }
  0x6b   : > { %916 = vrot.lane.b32.xlu0 %v5758_v0, %s5070_s26  ;;  %910 = vrot.lane.b32.xlu1 %v5760_v58, %s5070_s26  ;;  %v8654_v58 = vmax.f32 %v5405_v56, 0.0  ;;  %v8657_v56 = vmax.f32 %v5557_v61, 0.0  ;;  %v5816_v61 = vld [vmem:[#allocation2 + $0x62] sm:$0xff] }
  0x6d   : > { %4789 = vmatpush3.xpose.msk.msra.mxu1 %vm446_vm0, %v8654_v58  ;;  %v5802_v58 = vld [vmem:[#allocation2 + $0x4a] sm:$0xff] }
  0x6e   : > { %4790 = vmatprep.subr.msk.mxu1 %vm446_vm0, %v8655_v35  ;;  %v5818_v35 = vld [vmem:[#allocation2 + $0x3a] sm:$0xff] }
  0x6f   : > { %984 = vrot.lane.b32.xlu0 %v599_v1, %s5071_s10  ;;  %914 = vrot.lane.b32.xlu1 %v5767_v30, %s5070_s26  ;;  %v8656_v1 = vmax.f32 %v5427_v11, 0.0  ;;  %v8659_v11 = vmax.f32 %v5563_v6, 0.0  ;;  %v5830_v6 = vld [vmem:[#allocation2 + $0x7a] sm:$0xff] }
  0x71   : > { %4791 = vmatpush3.xpose.msk.msra.mxu1 %vm446_vm0, %v8656_v1  ;;  %v5832_v1 = vld [vmem:[#allocation2 + $0x52] sm:$0xff] }
  0x72   : > { %4792 = vmatprep.subr.msk.mxu1 %vm446_vm0, %v8657_v56  ;;  %v8662_v56 = vmax.f32 %v5389_v51, 0.0  ;;  %v8665_v51 = vmax.f32 %v5507_v15, 0.0  ;;  %v5872_v15 = vld [vmem:[#allocation2 + $0xc2] sm:$0xff] }
  0x73   : > { %988 = vrot.lane.b32.xlu0 %v5777_v9, %s5071_s10  ;;  %918 = vrot.lane.b32.xlu1 %v5779_v39, %s5070_s26  ;;  %s5081_s26 = smov 64  }
  0x75   : > { %4793 = vmatpush3.xpose.msk.msra.mxu1 %vm446_vm0, %v8658_v2  ;;  %v5846_v2 = vld [vmem:[#allocation2 + $0x6a] sm:$0xff] }
  0x76   : > { %4794 = vmatprep.subr.msk.mxu1 %vm446_vm0, %v8659_v11  ;;  %v8664_v11 = vmax.f32 %v5402_v55, 0.0  ;;  %v8667_v55 = vmax.f32 %v5550_v7, 0.0  ;;  %v5886_v7 = vld [vmem:[#allocation2 + $0xda] sm:$0xff] }
  0x77   : > { %992 = vrot.lane.b32.xlu0 %v5791_v60, %s5071_s10  ;;  %986 = vrot.lane.b32.xlu1 %v600_v10, %s5071_s10  ;;  %v8660_v10 = vmax.f32 %v5408_v57, 0.0  ;;  %v8663_v57 = vmax.f32 %v5560_v5, 0.0  ;;  %v5858_v5 = vld [vmem:[#allocation2 + $0xaa] sm:$0xff] }
  0x79   : > { %4795 = vmatpush3.xpose.msk.msra.mxu1 %vm446_vm0, %v8660_v10  ;;  %v5860_v10 = vld [vmem:[#allocation2 + $0x82] sm:$0xff] }
  0x7a   : > { %4796 = vmatprep.subr.msk.mxu1 %vm446_vm0, %v8661_v53  ;;  %v8666_v53 = vmax.f32 %v5345_v33, 0.0  ;;  %v8669_v33 = vmax.f32 %v5489_v46, 0.0  ;;  %v5900_v46 = vld [vmem:[#allocation2 + $0xf2] sm:$0xff] }
  0x7b   : > { %996 = vrot.lane.b32.xlu0 %v5802_v58, %s5071_s10  ;;  %990 = vrot.lane.b32.xlu1 %v5804_v28, %s5071_s10 }
  0x7d   : > { %4797 = vmatpush3.xpose.msk.msra.mxu1 %vm446_vm0, %v8662_v56  ;;  %v5874_v56 = vld [vmem:[#allocation2 + $0x9a] sm:$0xff] }
  0x7e   : > { %4798 = vmatprep.subr.msk.mxu1 %vm446_vm0, %v8663_v57  ;;  %v8668_v57 = vmax.f32 %v5392_v52, 0.0  ;;  %v8671_v52 = vmax.f32 %v5524_v26, 0.0  ;;  %v5914_v26 = vld [vmem:[#allocation2 + $0x10a] sm:$0xff] }
  0x7f   : > { %1000 = vrot.lane.b32.xlu0 %v5816_v61, %s5071_s10  ;;  %994 = vrot.lane.b32.xlu1 %v5818_v35, %s5071_s10 }
  0x81   : > { %4799 = vmatpush3.xpose.msk.msra.mxu1 %vm446_vm0, %v8664_v11  ;;  %v5888_v11 = vld [vmem:[#allocation2 + $0xb2] sm:$0xff] }
  0x82   : > { %4800 = vmatprep.subr.msk.mxu1 %vm446_vm0, %v8665_v51  ;;  %v8670_v51 = vmax.f32 %v5332_v24, 0.0  ;;  %v8673_v24 = vmax.f32 %v5475_v36, 0.0  ;;  %v5928_v36 = vld [vmem:[#allocation2 + $0x122] sm:$0xff] }
  0x83   : > { %1004 = vrot.lane.b32.xlu0 %v5830_v6, %s5071_s10  ;;  %998 = vrot.lane.b32.xlu1 %v5832_v1, %s5071_s10 }
  0x85   : > { %4801 = vmatpush3.xpose.msk.msra.mxu1 %vm446_vm0, %v8666_v53  ;;  %v5902_v53 = vld [vmem:[#allocation2 + $0xca] sm:$0xff] }
  0x86   : > { %4802 = vmatprep.subr.msk.mxu1 %vm446_vm0, %v8667_v55  ;;  %v8672_v55 = vmax.f32 %v5354_v40, 0.0  ;;  %v8675_v40 = vmax.f32 %v5492_v48, 0.0  ;;  %v8678_v48 = vmax.f32 %v5469_v34, 0.0 }
  0x87   : > { %1008 = vrot.lane.b32.xlu0 %v5844_v37, %s5071_s10  ;;  %1002 = vrot.lane.b32.xlu1 %v5846_v2, %s5071_s10 }
  0x89   : > { %4803 = vmatpush3.xpose.msk.msra.mxu1 %vm446_vm0, %v8668_v57  ;;  %v5916_v57 = vld [vmem:[#allocation2 + $0xe2] sm:$0xff] }
  0x8a   : > { %4804 = vmatprep.subr.msk.mxu1 %vm446_vm0, %v8669_v33  ;;  %v8674_v33 = vmax.f32 %v5324_v20, 0.0  ;;  %v8677_v20 = vmax.f32 %v5335_v25, 0.0  ;;  %v8680_v25 = vmax.f32 %v5486_v45, 0.0  ;;  %v8683_v45 = vmax.f32 %v5418_v4, 0.0  ;;  %v5989_v4 = vld [vmem:[#allocation2 + $0x15a] sm:$0xff] }
  0x8b   : > { %1012 = vrot.lane.b32.xlu0 %v5858_v5, %s5071_s10  ;;  %1006 = vrot.lane.b32.xlu1 %v5860_v10, %s5071_s10  ;;  %8688 = vst [vmem:[#allocation14_spill] sm:$0xff] %v5989_v4 }
  0x8d   : > { %4805 = vmatpush3.xpose.msk.msra.mxu1 %vm446_vm0, %v8670_v51  ;;  %v5930_v51 = vld [vmem:[#allocation2 + $0xfa] sm:$0xff] }
  0x8e   : > { %4806 = vmatprep.subr.msk.mxu1 %vm446_vm0, %v8671_v52 }
  0x8f   : > { %1016 = vrot.lane.b32.xlu0 %v5872_v15, %s5071_s10  ;;  %1010 = vrot.lane.b32.xlu1 %v5874_v56, %s5071_s10  ;;  %v5932_v52 = vpop.permute.xlu0 %856 }
  0x90   : > { %8676 = vst [vmem:[#allocation9_spill] sm:$0xff] %v5932_v52  ;;  %v5995_v52 = vld [vmem:[#allocation2 + $0x18] sm:$0xff] }
  0x91   : > { %4807 = vmatpush3.xpose.msk.msra.mxu1 %vm446_vm0, %v8672_v55  ;;  %v5944_v55 = vld [vmem:[#allocation2 + $0x13a] sm:$0xff]  ;;  %8691 = vst [vmem:[#allocation17_spill] sm:$0xff] %v5995_v52 }
  0x92   : > { %4808 = vmatprep.subr.msk.mxu1 %vm446_vm0, %v8673_v24  ;;  %v5946_v24 = vld [vmem:[#allocation2 + $0x112] sm:$0xff] }
  0x93   : > { %1020 = vrot.lane.b32.xlu0 %v5886_v7, %s5071_s10  ;;  %1014 = vrot.lane.b32.xlu1 %v5888_v11, %s5071_s10 }
  0x95   : > { %4809 = vmatpush3.xpose.msk.msra.mxu1 %vm446_vm0, %v8674_v33  ;;  %v8679_v33 = vmax.f32 %v5318_v18, 0.0  ;;  %v8682_v18 = vmax.f32 %v5329_v23, 0.0  ;;  %v8687_v23 = vmax.f32 %v5321_v19, 0.0  ;;  %v6001_v19 = vld [vmem:[#allocation2 + $0x172] sm:$0xff] }
  0x96   : > { %4810 = vmatprep.subr.msk.mxu1 %vm446_vm0, %v8675_v40  ;;  %v5960_v40 = vld [vmem:[#allocation2 + $0x152] sm:$0xff]  ;;  %8692 = vst [vmem:[#allocation18_spill] sm:$0xff] %v6001_v19 }
  0x97   : > { %1024 = vrot.lane.b32.xlu0 %v5900_v46, %s5071_s10  ;;  %1018 = vrot.lane.b32.xlu1 %v5902_v53, %s5071_s10 }
  0x99   : > { %4811 = vmatpush3.xpose.msk.msra.mxu1 %vm446_vm0, %v8677_v20  ;;  %v5962_v20 = vld [vmem:[#allocation2 + $0x12a] sm:$0xff] }
  0x9a   : > { %4812 = vmatprep.subr.msk.mxu1 %vm446_vm0, %v8678_v48  ;;  %v5974_v48 = vld [vmem:[#allocation2 + $0x16a] sm:$0xff] }
  0x9b   : > { %1028 = vrot.lane.b32.xlu0 %v5914_v26, %s5071_s10  ;;  %1022 = vrot.lane.b32.xlu1 %v5916_v57, %s5071_s10 }
  0x9d   : > { %4813 = vmatpush3.xpose.msk.msra.mxu1 %vm446_vm0, %v8679_v33  ;;  %v5976_v33 = vld [vmem:[#allocation2 + $0x142] sm:$0xff] }
  0x9e   : > { %4814 = vmatprep.subr.msk.mxu1 %vm446_vm0, %v8680_v25  ;;  %8684 = vst [vmem:[#allocation11_spill] sm:$0xff] %v5976_v33 }
  0x9f   : > { %1032 = vrot.lane.b32.xlu0 %v5928_v36, %s5071_s10  ;;  %1026 = vrot.lane.b32.xlu1 %v5930_v51, %s5071_s10 }
  0xa0   : > { %v5958_v34 = vpop.permute.xlu0 %858 }
  0xa1   : > { %8681 = vst [vmem:[#allocation10_spill] sm:$0xff] %v5958_v34  ;;  %4815 = vmatpush3.xpose.msk.msra.mxu1 %vm446_vm0, %v8682_v18 }
  0xa2   : > { %4816 = vmatprep.subr.msk.mxu1 %vm446_vm0, %v8683_v45 }
  0xa3   : > { %1036 = vrot.lane.b32.xlu0 %v5944_v55, %s5071_s10  ;;  %1030 = vrot.lane.b32.xlu1 %v5946_v24, %s5071_s10 }
  0xa5   : > { %4817 = vmatpush3.xpose.msk.msra.mxu1 %vm446_vm0, %v8687_v23 }
  0xa7   : > { %1040 = vrot.lane.b32.xlu0 %v5960_v40, %s5071_s10  ;;  %1034 = vrot.lane.b32.xlu1 %v5962_v20, %s5071_s10 }
  0xa9   : > { %v5978_v25 = vpop.permute.xlu0 %864  ;;  %v5980_v34 = vpop.permute.xlu1 %860 }
  0xaa   : > { %8685 = vst [vmem:[#allocation12_spill] sm:$0xff] %v5978_v25  ;;  %8686 = vst [vmem:[#allocation13_spill] sm:$0xff] %v5980_v34  ;;  %v6007_v34 = vld [vmem:[#allocation2 + $0x30] sm:$0xff] }
  0xab   : > { %1044 = vrot.lane.b32.xlu0 %v5974_v48, %s5071_s10  ;;  %1038 = vrot.lane.b32.xlu1 %v5976_v33, %s5071_s10  ;;  %8695 = vst [vmem:[#allocation21_spill] sm:$0xff] %v6007_v34  ;;  %v6158_v33 = vld [vmem:[#allocation2 + $0x140] sm:$0xff] }
  0xad   : > { %v5991_v18 = vpop.permute.xlu0 %868  ;;  %v5993_v45 = vpop.permute.xlu1 %862 }
  0xae   : > { %8689 = vst [vmem:[#allocation15_spill] sm:$0xff] %v5991_v18  ;;  %8690 = vst [vmem:[#allocation16_spill] sm:$0xff] %v5993_v45 }
  0xaf   : > { %1112 = vrot.lane.b32.xlu0 %v5995_v52, %s5072_s12  ;;  %1042 = vrot.lane.b32.xlu1 %v5989_v4, %s5071_s10  ;;  %v6017_v52 = vld [vmem:[#allocation2 + $0x48] sm:$0xff]  ;;  %v6019_v4 = vld [vmem:[#allocation2 + $0x20] sm:$0xff] }
  0xb0   : > { %8698 = vst [vmem:[#allocation24_spill] sm:$0xff] %v6017_v52  ;;  %8699 = vst [vmem:[#allocation25_spill] sm:$0xff] %v6019_v4 }
  0xb1   : > { %v6003_v23 = vpop.permute.xlu0 %872  ;;  %v6005_v25 = vpop.permute.xlu1 %866 }
  0xb2   : > { %8693 = vst [vmem:[#allocation19_spill] sm:$0xff] %v6003_v23  ;;  %8694 = vst [vmem:[#allocation20_spill] sm:$0xff] %v6005_v25 }
  0xb3   : > { %1116 = vrot.lane.b32.xlu0 %v6007_v34, %s5072_s12  ;;  %1046 = vrot.lane.b32.xlu1 %v6001_v19, %s5071_s10  ;;  %v6029_v34 = vld [vmem:[#allocation2 + $0x60] sm:$0xff]  ;;  %v6031_v19 = vld [vmem:[#allocation2 + $0x38] sm:$0xff] }
  0xb4   : > { %8702 = vst [vmem:[#allocation28_spill] sm:$0xff] %v6029_v34  ;;  %8703 = vst [vmem:[#allocation29_spill] sm:$0xff] %v6031_v19 }
  0xb5   : > { %v6013_v18 = vpop.permute.xlu0 %876  ;;  %v6015_v45 = vpop.permute.xlu1 %870 }
  0xb6   : > { %8696 = vst [vmem:[#allocation22_spill] sm:$0xff] %v6013_v18  ;;  %8697 = vst [vmem:[#allocation23_spill] sm:$0xff] %v6015_v45 }
  0xb7   : > { %1120 = vrot.lane.b32.xlu0 %v6017_v52, %s5072_s12  ;;  %1114 = vrot.lane.b32.xlu1 %v6019_v4, %s5072_s12  ;;  %v6041_v52 = vld [vmem:[#allocation2 + $0x78] sm:$0xff]  ;;  %v6043_v4 = vld [vmem:[#allocation2 + $0x50] sm:$0xff] }
  0xb8   : > { %8706 = vst [vmem:[#allocation32_spill] sm:$0xff] %v6041_v52  ;;  %8707 = vst [vmem:[#allocation33_spill] sm:$0xff] %v6043_v4 }
  0xb9   : > { %v6025_v23 = vpop.permute.xlu0 %880  ;;  %v6027_v25 = vpop.permute.xlu1 %874 }
  0xba   : > { %8700 = vst [vmem:[#allocation26_spill] sm:$0xff] %v6025_v23  ;;  %8701 = vst [vmem:[#allocation27_spill] sm:$0xff] %v6027_v25 }
  0xbb   : > { %1124 = vrot.lane.b32.xlu0 %v6029_v34, %s5072_s12  ;;  %1118 = vrot.lane.b32.xlu1 %v6031_v19, %s5072_s12  ;;  %v6053_v34 = vld [vmem:[#allocation2 + $0x90] sm:$0xff]  ;;  %v6055_v19 = vld [vmem:[#allocation2 + $0x68] sm:$0xff] }
  0xbc   : > { %8710 = vst [vmem:[#allocation36_spill] sm:$0xff] %v6053_v34  ;;  %8711 = vst [vmem:[#allocation37_spill] sm:$0xff] %v6055_v19 }
  0xbd   : > { %v6037_v18 = vpop.permute.xlu0 %884  ;;  %v6039_v45 = vpop.permute.xlu1 %878 }
  0xbe   : > { %8704 = vst [vmem:[#allocation30_spill] sm:$0xff] %v6037_v18  ;;  %8705 = vst [vmem:[#allocation31_spill] sm:$0xff] %v6039_v45 }
  0xbf   : > { %1128 = vrot.lane.b32.xlu0 %v6041_v52, %s5072_s12  ;;  %1122 = vrot.lane.b32.xlu1 %v6043_v4, %s5072_s12  ;;  %v6065_v52 = vld [vmem:[#allocation2 + $0xa8] sm:$0xff]  ;;  %v6067_v4 = vld [vmem:[#allocation2 + $0x80] sm:$0xff] }
  0xc0   : > { %8714 = vst [vmem:[#allocation40_spill] sm:$0xff] %v6065_v52  ;;  %8715 = vst [vmem:[#allocation41_spill] sm:$0xff] %v6067_v4 }
  0xc1   : > { %v6049_v23 = vpop.permute.xlu0 %888  ;;  %v6051_v25 = vpop.permute.xlu1 %882 }
  0xc2   : > { %8708 = vst [vmem:[#allocation34_spill] sm:$0xff] %v6049_v23  ;;  %8709 = vst [vmem:[#allocation35_spill] sm:$0xff] %v6051_v25 }
  0xc3   : > { %1132 = vrot.lane.b32.xlu0 %v6053_v34, %s5072_s12  ;;  %1126 = vrot.lane.b32.xlu1 %v6055_v19, %s5072_s12  ;;  %v6077_v34 = vld [vmem:[#allocation2 + $0xc0] sm:$0xff]  ;;  %v6079_v19 = vld [vmem:[#allocation2 + $0x98] sm:$0xff] }
  0xc4   : > { %8718 = vst [vmem:[#allocation44_spill] sm:$0xff] %v6077_v34  ;;  %8719 = vst [vmem:[#allocation45_spill] sm:$0xff] %v6079_v19 }
  0xc5   : > { %v6061_v18 = vpop.permute.xlu0 %892  ;;  %v6063_v45 = vpop.permute.xlu1 %886 }
  0xc6   : > { %8712 = vst [vmem:[#allocation38_spill] sm:$0xff] %v6061_v18  ;;  %8713 = vst [vmem:[#allocation39_spill] sm:$0xff] %v6063_v45 }
  0xc7   : > { %1136 = vrot.lane.b32.xlu0 %v6065_v52, %s5072_s12  ;;  %1130 = vrot.lane.b32.xlu1 %v6067_v4, %s5072_s12  ;;  %v6089_v52 = vld [vmem:[#allocation2 + $0xd8] sm:$0xff]  ;;  %v6091_v4 = vld [vmem:[#allocation2 + $0xb0] sm:$0xff] }
  0xc8   : > { %8722 = vst [vmem:[#allocation48_spill] sm:$0xff] %v6089_v52  ;;  %8723 = vst [vmem:[#allocation49_spill] sm:$0xff] %v6091_v4 }
  0xc9   : > { %v6073_v23 = vpop.permute.xlu0 %896  ;;  %v6075_v25 = vpop.permute.xlu1 %890 }
  0xca   : > { %8716 = vst [vmem:[#allocation42_spill] sm:$0xff] %v6073_v23  ;;  %8717 = vst [vmem:[#allocation43_spill] sm:$0xff] %v6075_v25 }
  0xcb   : > { %1140 = vrot.lane.b32.xlu0 %v6077_v34, %s5072_s12  ;;  %1134 = vrot.lane.b32.xlu1 %v6079_v19, %s5072_s12  ;;  %v6101_v34 = vld [vmem:[#allocation2 + $0xf0] sm:$0xff]  ;;  %v6103_v19 = vld [vmem:[#allocation2 + $0xc8] sm:$0xff] }
  0xcc   : > { %8726 = vst [vmem:[#allocation52_spill] sm:$0xff] %v6101_v34  ;;  %8727 = vst [vmem:[#allocation53_spill] sm:$0xff] %v6103_v19 }
  0xcd   : > { %v6085_v18 = vpop.permute.xlu0 %900  ;;  %v6087_v45 = vpop.permute.xlu1 %894 }
  0xce   : > { %8720 = vst [vmem:[#allocation46_spill] sm:$0xff] %v6085_v18  ;;  %8721 = vst [vmem:[#allocation47_spill] sm:$0xff] %v6087_v45 }
  0xcf   : > { %1144 = vrot.lane.b32.xlu0 %v6089_v52, %s5072_s12  ;;  %1138 = vrot.lane.b32.xlu1 %v6091_v4, %s5072_s12  ;;  %v6113_v52 = vld [vmem:[#allocation2 + $0x108] sm:$0xff]  ;;  %v6115_v4 = vld [vmem:[#allocation2 + $0xe0] sm:$0xff] }
  0xd0   : > { %8730 = vst [vmem:[#allocation56_spill] sm:$0xff] %v6113_v52  ;;  %8731 = vst [vmem:[#allocation57_spill] sm:$0xff] %v6115_v4 }
  0xd1   : > { %v6097_v23 = vpop.permute.xlu0 %904  ;;  %v6099_v25 = vpop.permute.xlu1 %898 }
  0xd2   : > { %8724 = vst [vmem:[#allocation50_spill] sm:$0xff] %v6097_v23  ;;  %8725 = vst [vmem:[#allocation51_spill] sm:$0xff] %v6099_v25 }
  0xd3   : > { %1148 = vrot.lane.b32.xlu0 %v6101_v34, %s5072_s12  ;;  %1142 = vrot.lane.b32.xlu1 %v6103_v19, %s5072_s12  ;;  %v6125_v34 = vld [vmem:[#allocation2 + $0x120] sm:$0xff]  ;;  %v6127_v19 = vld [vmem:[#allocation2 + $0xf8] sm:$0xff] }
  0xd4   : > { %8734 = vst [vmem:[#allocation60_spill] sm:$0xff] %v6125_v34  ;;  %8735 = vst [vmem:[#allocation61_spill] sm:$0xff] %v6127_v19 }
  0xd5   : > { %v6109_v18 = vpop.permute.xlu0 %908  ;;  %v6111_v45 = vpop.permute.xlu1 %902 }
  0xd6   : > { %8728 = vst [vmem:[#allocation54_spill] sm:$0xff] %v6109_v18  ;;  %8729 = vst [vmem:[#allocation55_spill] sm:$0xff] %v6111_v45 }
  0xd7   : > { %1152 = vrot.lane.b32.xlu0 %v6113_v52, %s5072_s12  ;;  %1146 = vrot.lane.b32.xlu1 %v6115_v4, %s5072_s12  ;;  %v6137_v52 = vld [vmem:[#allocation2 + $0x138] sm:$0xff]  ;;  %v6139_v4 = vld [vmem:[#allocation2 + $0x110] sm:$0xff] }
  0xd8   : > { %8738 = vst [vmem:[#allocation64_spill] sm:$0xff] %v6137_v52  ;;  %8739 = vst [vmem:[#allocation65_spill] sm:$0xff] %v6139_v4 }
  0xd9   : > { %v6121_v23 = vpop.permute.xlu0 %912  ;;  %v6123_v25 = vpop.permute.xlu1 %906 }
  0xda   : > { %8732 = vst [vmem:[#allocation58_spill] sm:$0xff] %v6121_v23  ;;  %8733 = vst [vmem:[#allocation59_spill] sm:$0xff] %v6123_v25 }
  0xdb   : > { %1156 = vrot.lane.b32.xlu0 %v6125_v34, %s5072_s12  ;;  %1150 = vrot.lane.b32.xlu1 %v6127_v19, %s5072_s12  ;;  %v563_v34 = vld [vmem:[#allocation2 + $0x150] sm:$0xff]  ;;  %v6149_v19 = vld [vmem:[#allocation2 + $0x128] sm:$0xff] }
  0xdc   : > { %8742 = vst [vmem:[#allocation68_spill] sm:$0xff] %v6149_v19 }
  0xdd   : > { %v6133_v18 = vpop.permute.xlu0 %916  ;;  %v6135_v45 = vpop.permute.xlu1 %910 }
  0xde   : > { %8736 = vst [vmem:[#allocation62_spill] sm:$0xff] %v6133_v18  ;;  %8737 = vst [vmem:[#allocation63_spill] sm:$0xff] %v6135_v45 }
  0xdf   : > { %1160 = vrot.lane.b32.xlu0 %v6137_v52, %s5072_s12  ;;  %1154 = vrot.lane.b32.xlu1 %v6139_v4, %s5072_s12  ;;  %v565_v52 = vld [vmem:[#allocation2 + $0x168] sm:$0xff] }
  0xe1   : > { %v6145_v23 = vpop.permute.xlu0 %984  ;;  %v6147_v25 = vpop.permute.xlu1 %914 }
  0xe2   : > { %8740 = vst [vmem:[#allocation66_spill] sm:$0xff] %v6145_v23  ;;  %8741 = vst [vmem:[#allocation67_spill] sm:$0xff] %v6147_v25  ;;  %v661_v25 = vld [vmem:[#allocation2 + $0x180] sm:$0xff] }
  0xe3   : > { %1164 = vrot.lane.b32.xlu0 %v563_v34, %s5072_s12  ;;  %1158 = vrot.lane.b32.xlu1 %v6149_v19, %s5072_s12  ;;  %v564_v34 = vld [vmem:[#allocation2 + $0x158] sm:$0xff]  ;;  %v566_v19 = vld [vmem:[#allocation2 + $0x170] sm:$0xff] }
  0xe5   : > { %v6154_v18 = vpop.permute.xlu0 %988  ;;  %v6156_v45 = vpop.permute.xlu1 %918 }
  0xe6   : > { %8743 = vst [vmem:[#allocation69_spill] sm:$0xff] %v6154_v18  ;;  %8744 = vst [vmem:[#allocation70_spill] sm:$0xff] %v6156_v45 }
  0xe7   : > { %1168 = vrot.lane.b32.xlu0 %v565_v52, %s5072_s12  ;;  %1162 = vrot.lane.b32.xlu1 %v6158_v33, %s5072_s12  ;;  %v662_v52 = vld [vmem:[#allocation2 + $0x188] sm:$0xff] }
  0xe9   : > { %v6163_v23 = vpop.permute.xlu0 %992  ;;  %v6165_v4 = vpop.permute.xlu1 %986 }
  0xea   : > { %8745 = vst [vmem:[#allocation71_spill] sm:$0xff] %v6163_v23  ;;  %8746 = vst [vmem:[#allocation72_spill] sm:$0xff] %v6165_v4 }
  0xeb   : > { %1172 = vrot.lane.b32.xlu0 %v661_v25, %s5072_s12  ;;  %1166 = vrot.lane.b32.xlu1 %v564_v34, %s5072_s12 }
  0xed   : > { %v6169_v18 = vpop.permute.xlu0 %996  ;;  %v6171_v45 = vpop.permute.xlu1 %990 }
  0xef   : > { %1240 = vrot.lane.b32.xlu0 %v5445_v21, %s5073_s13  ;;  %1170 = vrot.lane.b32.xlu1 %v566_v19, %s5072_s12 }
  0xf1   : > { %v6176_v23 = vpop.permute.xlu0 %1000  ;;  %v6178_v4 = vpop.permute.xlu1 %994 }
  0xf3   : > { %1244 = vrot.lane.b32.xlu0 %v5443_v17, %s5073_s13  ;;  %1174 = vrot.lane.b32.xlu1 %v662_v52, %s5072_s12  ;;  %s5011_s12 = sshll.u32 %s5082_s9, 4  ;;  %s5012_s12 = int_to_ptr.vmem [resolvable:$false] %s5011_s12 }
  0xf5   : > { %v6183_v25 = vpop.permute.xlu0 %1004  ;;  %v6185_v34 = vpop.permute.xlu1 %998 }
  0xf7   : > { %1248 = vrot.lane.b32.xlu0 %v5478_v43, %s5073_s13  ;;  %1242 = vrot.lane.b32.xlu1 %v5480_v44, %s5073_s13 }
  0xf9   : > { %v6191_v21 = vpop.permute.xlu0 %1008  ;;  %v6193_v19 = vpop.permute.xlu1 %1002 }
  0xfa   : > { %8747 = vst [vmem:[#allocation73_spill] sm:$0xff] %v6191_v21 }
  0xfb   : > { %1252 = vrot.lane.b32.xlu0 %v5528_v29, %s5073_s13  ;;  %1246 = vrot.lane.b32.xlu1 %v5530_v49, %s5073_s13 }
  0xfd   : > { %v6199_v17 = vpop.permute.xlu0 %1012  ;;  %v6201_v52 = vpop.permute.xlu1 %1006 }
  0xfe   : > { %8748 = vst [vmem:[#allocation74_spill] sm:$0xff] %v6199_v17  ;;  %8749 = vst [vmem:[#allocation75_spill] sm:$0xff] %v6201_v52 }
  0xff   : > { %1256 = vrot.lane.b32.xlu0 %v5577_v50, %s5073_s13  ;;  %1250 = vrot.lane.b32.xlu1 %v5579_v31, %s5073_s13 }
 0x101   : > { %v6207_v43 = vpop.permute.xlu0 %1016  ;;  %v6209_v44 = vpop.permute.xlu1 %1010 }
 0x102   : > { %8750 = vst [vmem:[#allocation76_spill] sm:$0xff] %v6207_v43  ;;  %8751 = vst [vmem:[#allocation77_spill] sm:$0xff] %v6209_v44 }
 0x103   : > { %1260 = vrot.lane.b32.xlu0 %v5607_v14, %s5073_s13  ;;  %1254 = vrot.lane.b32.xlu1 %v5609_v32, %s5073_s13 }
 0x105   : > { %v6215_v29 = vpop.permute.xlu0 %1020  ;;  %v6217_v49 = vpop.permute.xlu1 %1014 }
 0x106   : > { %8752 = vst [vmem:[#allocation78_spill] sm:$0xff] %v6215_v29  ;;  %8753 = vst [vmem:[#allocation79_spill] sm:$0xff] %v6217_v49 }
 0x107   : > { %1264 = vrot.lane.b32.xlu0 %v5615_v59, %s5073_s13  ;;  %1258 = vrot.lane.b32.xlu1 %v5617_v47, %s5073_s13 }
 0x109   : > { %v6223_v50 = vpop.permute.xlu0 %1024  ;;  %v6225_v31 = vpop.permute.xlu1 %1018 }
 0x10a   : > { %8754 = vst [vmem:[#allocation80_spill] sm:$0xff] %v6223_v50  ;;  %8755 = vst [vmem:[#allocation81_spill] sm:$0xff] %v6225_v31  ;;  %v8815_v50 = vld [vmem:[#allocation48_spill] sm:$0xff] }
 0x10b   : > { %1268 = vrot.lane.b32.xlu0 %v5623_v12, %s5073_s13  ;;  %1262 = vrot.lane.b32.xlu1 %v5625_v38, %s5073_s13 }
 0x10d   : > { %v6231_v32 = vpop.permute.xlu0 %1028  ;;  %v6233_v14 = vpop.permute.xlu1 %1022 }
 0x10e   : > { %8756 = vst [vmem:[#allocation82_spill] sm:$0xff] %v6231_v32  ;;  %8757 = vst [vmem:[#allocation83_spill] sm:$0xff] %v6233_v14  ;;  %v8807_v32 = vld [vmem:[#allocation40_spill] sm:$0xff] }
 0x10f   : > { %1272 = vrot.lane.b32.xlu0 %v5631_v13, %s5073_s13  ;;  %1266 = vrot.lane.b32.xlu1 %v5633_v63, %s5073_s13 }
 0x111   : > { %v6239_v47 = vpop.permute.xlu0 %1032  ;;  %v6241_v59 = vpop.permute.xlu1 %1026 }
 0x112   : > { %8758 = vst [vmem:[#allocation84_spill] sm:$0xff] %v6239_v47  ;;  %8759 = vst [vmem:[#allocation85_spill] sm:$0xff] %v6241_v59 }
 0x113   : > { %1276 = vrot.lane.b32.xlu0 %v5639_v27, %s5073_s13  ;;  %1270 = vrot.lane.b32.xlu1 %v5641_v42, %s5073_s13 }
 0x115   : > { %v6247_v38 = vpop.permute.xlu0 %1036  ;;  %v6249_v12 = vpop.permute.xlu1 %1030 }
 0x116   : > { %8760 = vst [vmem:[#allocation86_spill] sm:$0xff] %v6247_v38  ;;  %8761 = vst [vmem:[#allocation87_spill] sm:$0xff] %v6249_v12 }
 0x117   : > { %1280 = vrot.lane.b32.xlu0 %v5647_v41, %s5073_s13  ;;  %1274 = vrot.lane.b32.xlu1 %v5649_v8, %s5073_s13  ;;  %v8766_v41 = vld [vmem:[#allocation7_spill] sm:$0xff] }
 0x119   : > { %v6255_v63 = vpop.permute.xlu0 %1040  ;;  %v6257_v13 = vpop.permute.xlu1 %1034 }
 0x11a   : > { %8762 = vst [vmem:[#allocation88_spill] sm:$0xff] %v6255_v63  ;;  %8763 = vst [vmem:[#allocation89_spill] sm:$0xff] %v6257_v13 }
 0x11b   : > { %1284 = vrot.lane.b32.xlu0 %v5655_v54, %s5073_s13  ;;  %1278 = vrot.lane.b32.xlu1 %v5657_v62, %s5073_s13 }
 0x11d   : > { %v6263_v42 = vpop.permute.xlu0 %1044  ;;  %v6265_v27 = vpop.permute.xlu1 %1038 }
 0x11e   : > { %8764 = vst [vmem:[#allocation90_spill] sm:$0xff] %v6263_v42  ;;  %8765 = vst [vmem:[#allocation91_spill] sm:$0xff] %v6265_v27 }
 0x11f   : > { %1288 = vrot.lane.b32.xlu0 %v5666_v3, %s5073_s13  ;;  %1282 = vrot.lane.b32.xlu1 %v8766_v41, %s5073_s13  ;;  %v8769_v3 = vld [vmem:[#allocation8_spill] sm:$0xff] }
 0x120   : > { %v6287_v41 = vld [vmem:[#allocation2 + $0x181] sm:$0xff] }
 0x121   : > { %v6271_v8 = vpop.permute.xlu0 %1112  ;;  %v6273_v63 = vpop.permute.xlu1 %1042 }
 0x122   : > { %8767 = vst [vmem:[#allocation7_spill] sm:$0xff] %v6273_v63 }
 0x123   : > { %1292 = vrot.lane.b32.xlu0 %v5747_v16, %s5073_s13  ;;  %1286 = vrot.lane.b32.xlu1 %v5749_v22, %s5073_s13 }
 0x125   : > { %v6279_v62 = vpop.permute.xlu0 %1116  ;;  %v6281_v54 = vpop.permute.xlu1 %1046 }
 0x126   : > { %8768 = vst [vmem:[#allocation92_spill] sm:$0xff] %v6281_v54 }
 0x127   : > { %1296 = vrot.lane.b32.xlu0 %v5758_v0, %s5073_s13  ;;  %1290 = vrot.lane.b32.xlu1 %v8769_v3, %s5073_s13  ;;  %v6305_v0 = vld [vmem:[#allocation2 + $0x189] sm:$0xff] }
 0x129   : > { %v6289_v42 = vpop.permute.xlu0 %1120  ;;  %v6291_v63 = vpop.permute.xlu1 %1114 }
 0x12b   : > { %1300 = vrot.lane.b32.xlu0 %v6287_v41, %s5073_s13  ;;  %1294 = vrot.lane.b32.xlu1 %v5767_v30, %s5073_s13 }
 0x12d   : > { %v6297_v22 = vpop.permute.xlu0 %1124  ;;  %v6299_v16 = vpop.permute.xlu1 %1118 }
 0x12f   : > { %1368 = vrot.lane.b32.xlu0 %v5777_v9, %s5074_s17  ;;  %1298 = vrot.lane.b32.xlu1 %v5779_v39, %s5073_s13 }
 0x131   : > { %v6307_v3 = vpop.permute.xlu0 %1128  ;;  %v6309_v54 = vpop.permute.xlu1 %1122 }
 0x133   : > { %1372 = vrot.lane.b32.xlu0 %v5791_v60, %s5074_s17  ;;  %1302 = vrot.lane.b32.xlu1 %v6305_v0, %s5073_s13 }
 0x135   : > { %v6315_v30 = vpop.permute.xlu0 %1132  ;;  %v6317_v27 = vpop.permute.xlu1 %1126 }
 0x137   : > { %1376 = vrot.lane.b32.xlu0 %v5802_v58, %s5074_s17  ;;  %1370 = vrot.lane.b32.xlu1 %v5804_v28, %s5074_s17 }
 0x139   : > { %v6323_v9 = vpop.permute.xlu0 %1136  ;;  %v6325_v39 = vpop.permute.xlu1 %1130 }
 0x13a   : > { %8770 = vst [vmem:[#allocation8_spill] sm:$0xff] %v6323_v9 }
 0x13b   : > { %1380 = vrot.lane.b32.xlu0 %v5816_v61, %s5074_s17  ;;  %1374 = vrot.lane.b32.xlu1 %v5818_v35, %s5074_s17 }
 0x13d   : > { %v6331_v60 = vpop.permute.xlu0 %1140  ;;  %v6333_v38 = vpop.permute.xlu1 %1134 }
 0x13e   : > { %8771 = vst [vmem:[#allocation93_spill] sm:$0xff] %v6331_v60  ;;  %8772 = vst [vmem:[#allocation94_spill] sm:$0xff] %v6333_v38 }
 0x13f   : > { %1384 = vrot.lane.b32.xlu0 %v5830_v6, %s5074_s17  ;;  %1378 = vrot.lane.b32.xlu1 %v5832_v1, %s5074_s17 }
 0x141   : > { %v6339_v58 = vpop.permute.xlu0 %1144  ;;  %v6341_v28 = vpop.permute.xlu1 %1138 }
 0x142   : > { %8773 = vst [vmem:[#allocation95_spill] sm:$0xff] %v6339_v58  ;;  %8774 = vst [vmem:[#allocation96_spill] sm:$0xff] %v6341_v28 }
 0x143   : > { %1388 = vrot.lane.b32.xlu0 %v5844_v37, %s5074_s17  ;;  %1382 = vrot.lane.b32.xlu1 %v5846_v2, %s5074_s17 }
 0x145   : > { %v6347_v61 = vpop.permute.xlu0 %1148  ;;  %v6349_v35 = vpop.permute.xlu1 %1142 }
 0x146   : > { %8775 = vst [vmem:[#allocation97_spill] sm:$0xff] %v6347_v61  ;;  %8776 = vst [vmem:[#allocation98_spill] sm:$0xff] %v6349_v35 }
 0x147   : > { %1392 = vrot.lane.b32.xlu0 %v5858_v5, %s5074_s17  ;;  %1386 = vrot.lane.b32.xlu1 %v5860_v10, %s5074_s17 }
 0x149   : > { %v6355_v6 = vpop.permute.xlu0 %1152  ;;  %v6357_v1 = vpop.permute.xlu1 %1146 }
 0x14a   : > { %8777 = vst [vmem:[#allocation99_spill] sm:$0xff] %v6355_v6  ;;  %8778 = vst [vmem:[#allocation100_spill] sm:$0xff] %v6357_v1  ;;  %v8811_v6 = vld [vmem:[#allocation44_spill] sm:$0xff] }
 0x14b   : > { %1396 = vrot.lane.b32.xlu0 %v5872_v15, %s5074_s17  ;;  %1390 = vrot.lane.b32.xlu1 %v5874_v56, %s5074_s17  ;;  %v8819_v1 = vld [vmem:[#allocation52_spill] sm:$0xff] }
 0x14d   : > { %v6363_v37 = vpop.permute.xlu0 %1156  ;;  %v6365_v2 = vpop.permute.xlu1 %1150 }
 0x14e   : > { %8779 = vst [vmem:[#allocation101_spill] sm:$0xff] %v6363_v37  ;;  %8780 = vst [vmem:[#allocation102_spill] sm:$0xff] %v6365_v2  ;;  %v8803_v37 = vld [vmem:[#allocation36_spill] sm:$0xff] }
 0x14f   : > { %1400 = vrot.lane.b32.xlu0 %v5886_v7, %s5074_s17  ;;  %1394 = vrot.lane.b32.xlu1 %v5888_v11, %s5074_s17 }
 0x151   : > { %v6371_v5 = vpop.permute.xlu0 %1160  ;;  %v6373_v10 = vpop.permute.xlu1 %1154 }
 0x152   : > { %8781 = vst [vmem:[#allocation103_spill] sm:$0xff] %v6371_v5  ;;  %8782 = vst [vmem:[#allocation104_spill] sm:$0xff] %v6373_v10 }
 0x153   : > { %1404 = vrot.lane.b32.xlu0 %v5900_v46, %s5074_s17  ;;  %1398 = vrot.lane.b32.xlu1 %v5902_v53, %s5074_s17 }
 0x155   : > { %v6379_v15 = vpop.permute.xlu0 %1164  ;;  %v6381_v56 = vpop.permute.xlu1 %1158 }
 0x156   : > { %8783 = vst [vmem:[#allocation105_spill] sm:$0xff] %v6379_v15  ;;  %8784 = vst [vmem:[#allocation106_spill] sm:$0xff] %v6381_v56  ;;  %v8799_v56 = vld [vmem:[#allocation32_spill] sm:$0xff] }
 0x157   : > { %1408 = vrot.lane.b32.xlu0 %v5914_v26, %s5074_s17  ;;  %1402 = vrot.lane.b32.xlu1 %v5916_v57, %s5074_s17 }
 0x159   : > { %v6387_v7 = vpop.permute.xlu0 %1168  ;;  %v6389_v11 = vpop.permute.xlu1 %1162 }
 0x15a   : > { %8785 = vst [vmem:[#allocation107_spill] sm:$0xff] %v6387_v7  ;;  %8786 = vst [vmem:[#allocation108_spill] sm:$0xff] %v6389_v11  ;;  %v6437_v7 = vld [vmem:[#allocation2 + $0x18a] sm:$0xff] }
 0x15b   : > { %1412 = vrot.lane.b32.xlu0 %v5928_v36, %s5074_s17  ;;  %1406 = vrot.lane.b32.xlu1 %v5930_v51, %s5074_s17  ;;  %v8795_v11 = vld [vmem:[#allocation24_spill] sm:$0xff] }
 0x15d   : > { %v6395_v46 = vpop.permute.xlu0 %1172  ;;  %v6397_v53 = vpop.permute.xlu1 %1166 }
 0x15e   : > { %8787 = vst [vmem:[#allocation109_spill] sm:$0xff] %v6395_v46  ;;  %8788 = vst [vmem:[#allocation110_spill] sm:$0xff] %v6397_v53 }
 0x15f   : > { %1416 = vrot.lane.b32.xlu0 %v5944_v55, %s5074_s17  ;;  %1410 = vrot.lane.b32.xlu1 %v5946_v24, %s5074_s17  ;;  %v8791_v55 = vld [vmem:[#allocation11_spill] sm:$0xff] }
 0x160   : > { %v6419_v24 = vld [vmem:[#allocation2 + $0x182] sm:$0xff] }
 0x161   : > { %v6403_v26 = vpop.permute.xlu0 %1240  ;;  %v6405_v57 = vpop.permute.xlu1 %1170 }
 0x162   : > { %8789 = vst [vmem:[#allocation111_spill] sm:$0xff] %v6405_v57 }
 0x163   : > { %1420 = vrot.lane.b32.xlu0 %v5960_v40, %s5074_s17  ;;  %1414 = vrot.lane.b32.xlu1 %v5962_v20, %s5074_s17  ;;  %v8792_v40 = vld [vmem:[#allocation14_spill] sm:$0xff] }
 0x165   : > { %v6411_v36 = vpop.permute.xlu0 %1244  ;;  %v6413_v51 = vpop.permute.xlu1 %1174 }
 0x166   : > { %8790 = vst [vmem:[#allocation112_spill] sm:$0xff] %v6413_v51 }
 0x167   : > { %1424 = vrot.lane.b32.xlu0 %v5974_v48, %s5074_s17  ;;  %1418 = vrot.lane.b32.xlu1 %v8791_v55, %s5074_s17  ;;  %v8793_v48 = vld [vmem:[#allocation21_spill] sm:$0xff]  ;;  %v8794_v55 = vld [vmem:[#allocation18_spill] sm:$0xff] }
 0x169   : > { %v6421_v46 = vpop.permute.xlu0 %1248  ;;  %v6423_v57 = vpop.permute.xlu1 %1242 }
 0x16b   : > { %1428 = vrot.lane.b32.xlu0 %v6419_v24, %s5074_s17  ;;  %1422 = vrot.lane.b32.xlu1 %v8792_v40, %s5074_s17 }
 0x16d   : > { %v6429_v20 = vpop.permute.xlu0 %1252  ;;  %v6431_v51 = vpop.permute.xlu1 %1246 }
 0x16f   : > { %1496 = vrot.lane.b32.xlu0 %v8793_v48, %s5075_s18  ;;  %1426 = vrot.lane.b32.xlu1 %v8794_v55, %s5074_s17  ;;  %v8796_v48 = vld [vmem:[#allocation28_spill] sm:$0xff]  ;;  %v8797_v55 = vld [vmem:[#allocation29_spill] sm:$0xff] }
 0x171   : > { %v6439_v53 = vpop.permute.xlu0 %1256  ;;  %v6441_v15 = vpop.permute.xlu1 %1250 }
 0x173   : > { %1500 = vrot.lane.b32.xlu0 %v8795_v11, %s5075_s18  ;;  %1430 = vrot.lane.b32.xlu1 %v6437_v7, %s5074_s17  ;;  %v8800_v11 = vld [vmem:[#allocation33_spill] sm:$0xff]  ;;  %s5013_s17 = scalar_lea.vmem %s5012_s12, 512 }
 0x175   : > { %v6447_v40 = vpop.permute.xlu0 %1260  ;;  %v6449_v13 = vpop.permute.xlu1 %1254 }
 0x177   : > { %1504 = vrot.lane.b32.xlu0 %v8796_v48, %s5075_s18  ;;  %1498 = vrot.lane.b32.xlu1 %v8797_v55, %s5075_s18  ;;  %v8804_v48 = vld [vmem:[#allocation37_spill] sm:$0xff] }
 0x179   : > { %v6455_v5 = vpop.permute.xlu0 %1264  ;;  %v6457_v47 = vpop.permute.xlu1 %1258 }
 0x17a   : > { %8798 = vst [vmem:[#allocation11_spill] sm:$0xff] %v6455_v5 }
 0x17b   : > { %1508 = vrot.lane.b32.xlu0 %v8799_v56, %s5075_s18  ;;  %1502 = vrot.lane.b32.xlu1 %v8800_v11, %s5075_s18  ;;  %v8808_v56 = vld [vmem:[#allocation41_spill] sm:$0xff] }
 0x17d   : > { %v6463_v12 = vpop.permute.xlu0 %1268  ;;  %v6465_v10 = vpop.permute.xlu1 %1262 }
 0x17e   : > { %8801 = vst [vmem:[#allocation14_spill] sm:$0xff] %v6463_v12  ;;  %8802 = vst [vmem:[#allocation21_spill] sm:$0xff] %v6465_v10 }
 0x17f   : > { %1512 = vrot.lane.b32.xlu0 %v8803_v37, %s5075_s18  ;;  %1506 = vrot.lane.b32.xlu1 %v8804_v48, %s5075_s18  ;;  %v8812_v37 = vld [vmem:[#allocation45_spill] sm:$0xff] }
 0x181   : > { %v6471_v55 = vpop.permute.xlu0 %1272  ;;  %v6473_v59 = vpop.permute.xlu1 %1266 }
 0x182   : > { %8805 = vst [vmem:[#allocation18_spill] sm:$0xff] %v6471_v55  ;;  %8806 = vst [vmem:[#allocation24_spill] sm:$0xff] %v6473_v59 }
 0x183   : > { %1516 = vrot.lane.b32.xlu0 %v8807_v32, %s5075_s18  ;;  %1510 = vrot.lane.b32.xlu1 %v8808_v56, %s5075_s18  ;;  %v8816_v32 = vld [vmem:[#allocation49_spill] sm:$0xff] }
 0x185   : > { %v6479_v11 = vpop.permute.xlu0 %1276  ;;  %v6481_v2 = vpop.permute.xlu1 %1270 }
 0x186   : > { %8809 = vst [vmem:[#allocation28_spill] sm:$0xff] %v6479_v11  ;;  %8810 = vst [vmem:[#allocation29_spill] sm:$0xff] %v6481_v2 }
 0x187   : > { %1520 = vrot.lane.b32.xlu0 %v8811_v6, %s5075_s18  ;;  %1514 = vrot.lane.b32.xlu1 %v8812_v37, %s5075_s18  ;;  %v8820_v6 = vld [vmem:[#allocation53_spill] sm:$0xff] }
 0x189   : > { %v6487_v48 = vpop.permute.xlu0 %1280  ;;  %v6489_v14 = vpop.permute.xlu1 %1274 }
 0x18a   : > { %8813 = vst [vmem:[#allocation32_spill] sm:$0xff] %v6487_v48  ;;  %8814 = vst [vmem:[#allocation33_spill] sm:$0xff] %v6489_v14  ;;  %v8823_v14 = vld [vmem:[#allocation56_spill] sm:$0xff] }
 0x18b   : > { %1524 = vrot.lane.b32.xlu0 %v8815_v50, %s5075_s18  ;;  %1518 = vrot.lane.b32.xlu1 %v8816_v32, %s5075_s18  ;;  %v8824_v50 = vld [vmem:[#allocation57_spill] sm:$0xff]  ;;  %v2115_v32 = vld [vmem:[%s8574_s1 + $0x20] sm:$0xf] }
 0x18c   : > { %4854 = vmatprep.subr.msk.mxu0 %vm2213_vm3, %v2115_v32 }
 0x18d   : > { %v6495_v56 = vpop.permute.xlu0 %1284  ;;  %v6497_v11 = vpop.permute.xlu1 %1278  ;;  %4855 = vmatpush3.msk.msra.mxu0 %vm2213_vm3, %v2115_v32  ;;  %v2112_v32 = vld [vmem:[%s8574_s1 + $0x8] sm:$0xff] }
 0x18e   : > { %8817 = vst [vmem:[#allocation36_spill] sm:$0xff] %v6495_v56  ;;  %8818 = vst [vmem:[#allocation37_spill] sm:$0xff] %v6497_v11 }
 0x18f   : > { %1528 = vrot.lane.b32.xlu0 %v8819_v1, %s5075_s18  ;;  %1522 = vrot.lane.b32.xlu1 %v8820_v6, %s5075_s18  ;;  %v2114_v6 = vld [vmem:[%s8574_s1 + $0x18] sm:$0xff] }
 0x190   : > { %4856 = vmatprep.subr.mxu0 %v2114_v6 }
 0x191   : > { %v6503_v37 = vpop.permute.xlu0 %1288  ;;  %v6505_v48 = vpop.permute.xlu1 %1282  ;;  %4857 = vmatpush3.msra.mxu0 %v2114_v6  ;;  %v2111_v6 = vld [vmem:[%s8574_s1] sm:$0xff] }
 0x192   : > { %8821 = vst [vmem:[#allocation40_spill] sm:$0xff] %v6503_v37  ;;  %8822 = vst [vmem:[#allocation41_spill] sm:$0xff] %v6505_v48  ;;  %v2113_v37 = vld [vmem:[%s8574_s1 + $0x10] sm:$0xff] }
 0x193   : > { %1532 = vrot.lane.b32.xlu0 %v8823_v14, %s5075_s18  ;;  %1526 = vrot.lane.b32.xlu1 %v8824_v50, %s5075_s18  ;;  %v8827_v14 = vld [vmem:[#allocation60_spill] sm:$0xff]  ;;  %v8828_v50 = vld [vmem:[#allocation61_spill] sm:$0xff] }
 0x194   : > { %4858 = vmatprep.subr.mxu0 %v2113_v37 }
 0x195   : > { %v6514_v1 = vpop.permute.xlu0 %1292  ;;  %v6516_v56 = vpop.permute.xlu1 %1286  ;;  %4859 = vmatpush3.msra.mxu0 %v2113_v37 }
 0x196   : > { %8825 = vst [vmem:[#allocation44_spill] sm:$0xff] %v6514_v1  ;;  %8826 = vst [vmem:[#allocation45_spill] sm:$0xff] %v6516_v56  ;;  %v760_v56 = vld [vmem:[#allocation2 + $0x31] sm:$0xff]  ;;  %4860 = vmatprep.subr.mxu0 %v2112_v32 }
 0x197   : > { %1536 = vrot.lane.b32.xlu0 %v8827_v14, %s5075_s18  ;;  %1530 = vrot.lane.b32.xlu1 %v8828_v50, %s5075_s18  ;;  %v8831_v14 = vld [vmem:[#allocation64_spill] sm:$0xff]  ;;  %v8832_v50 = vld [vmem:[#allocation65_spill] sm:$0xff] }
 0x198   : > { %4861 = vmatpush3.msra.mxu0 %v2112_v32  ;;  %v762_v32 = vld [vmem:[#allocation2 + $0x49] sm:$0xff] }
 0x199   : > { %v6528_v48 = vpop.permute.xlu0 %1296  ;;  %v6530_v1 = vpop.permute.xlu1 %1290  ;;  %4862 = vmatprep.subr.mxu0 %v2111_v6 }
 0x19a   : > { %8829 = vst [vmem:[#allocation48_spill] sm:$0xff] %v6528_v48  ;;  %8830 = vst [vmem:[#allocation49_spill] sm:$0xff] %v6530_v1  ;;  %v792_v48 = vld [vmem:[#allocation2 + $0x32] sm:$0xff]  ;;  %4863 = vmatpush3.msra.mxu0 %v2111_v6  ;;  %v793_v1 = vld [vmem:[#allocation2 + $0x3a] sm:$0xff] }
 0x19b   : > { %1540 = vrot.lane.b32.xlu0 %v8831_v14, %s5075_s18  ;;  %1534 = vrot.lane.b32.xlu1 %v8832_v50, %s5075_s18  ;;  %v8835_v14 = vld [vmem:[#allocation68_spill] sm:$0xff] }
 0x19d   : > { %v6539_v11 = vpop.permute.xlu0 %1300  ;;  %v6541_v61 = vpop.permute.xlu1 %1294 }
 0x19e   : > { %8833 = vst [vmem:[#allocation52_spill] sm:$0xff] %v6539_v11  ;;  %8834 = vst [vmem:[#allocation53_spill] sm:$0xff] %v6541_v61  ;;  %v761_v11 = vld [vmem:[#allocation2 + $0x39] sm:$0xff] }
 0x19f   : > { %1624 = vrot.lane.b32.xlu0 %v760_v56, %s5076_s19  ;;  %1538 = vrot.lane.b32.xlu1 %v8835_v14, %s5075_s18  ;;  %v794_v14 = vld [vmem:[#allocation2 + $0x4a] sm:$0xff] }
 0x1a1   : > { %v6549_v50 = vpop.permute.xlu0 %1368  ;;  %v6551_v37 = vpop.permute.xlu1 %1298 }
 0x1a2   : > { %8836 = vst [vmem:[#allocation56_spill] sm:$0xff] %v6551_v37 }
 0x1a3   : > { %1752 = vrot.lane.b32.xlu0 %v792_v48, %s5077_s20  ;;  %1542 = vrot.lane.b32.xlu1 %v6158_v33, %s5075_s18  ;;  %v764_v33 = vld [vmem:[#allocation2 + $0x61] sm:$0xff]  ;;  %v763_v48 = vld [vmem:[#allocation2 + $0x51] sm:$0xff] }
 0x1a5   : > { %v6556_v61 = vpop.permute.xlu0 %1372  ;;  %v6558_v56 = vpop.permute.xlu1 %1302 }
 0x1a6   : > { %8837 = vst [vmem:[#allocation57_spill] sm:$0xff] %v6558_v56 }
 0x1a7   : > { %1628 = vrot.lane.b32.xlu0 %v762_v32, %s5076_s19  ;;  %1626 = vrot.lane.b32.xlu1 %v761_v11, %s5076_s19  ;;  %v796_v11 = vld [vmem:[#allocation2 + $0x62] sm:$0xff]  ;;  %v795_v32 = vld [vmem:[#allocation2 + $0x52] sm:$0xff] }
 0x1a9   : > { %v6562_v37 = vpop.permute.xlu0 %1376  ;;  %v6564_v6 = vpop.permute.xlu1 %1370 }
 0x1ab   : > { %1756 = vrot.lane.b32.xlu0 %v794_v14, %s5077_s20  ;;  %1754 = vrot.lane.b32.xlu1 %v793_v1, %s5077_s20  ;;  %v766_v1 = vld [vmem:[#allocation2 + $0x79] sm:$0xff]  ;;  %v765_v14 = vld [vmem:[#allocation2 + $0x69] sm:$0xff] }
 0x1ad   : > { %v6568_v31 = vpop.permute.xlu0 %1380  ;;  %v6570_v29 = vpop.permute.xlu1 %1374 }
 0x1af   : > { %1632 = vrot.lane.b32.xlu0 %v764_v33, %s5076_s19  ;;  %1630 = vrot.lane.b32.xlu1 %v763_v48, %s5076_s19  ;;  %v798_v33 = vld [vmem:[#allocation2 + $0x7a] sm:$0xff]  ;;  %v797_v48 = vld [vmem:[#allocation2 + $0x6a] sm:$0xff] }
 0x1b1   : > { %v6574_v56 = vpop.permute.xlu0 %1384  ;;  %v6576_v2 = vpop.permute.xlu1 %1378 }
 0x1b3   : > { %1760 = vrot.lane.b32.xlu0 %v796_v11, %s5077_s20  ;;  %1758 = vrot.lane.b32.xlu1 %v795_v32, %s5077_s20  ;;  %v768_v11 = vld [vmem:[#allocation2 + $0x91] sm:$0xff]  ;;  %v767_v32 = vld [vmem:[#allocation2 + $0x81] sm:$0xff] }
 0x1b5   : > { %v6580_v55 = vpop.permute.xlu0 %1388  ;;  %v6582_v35 = vpop.permute.xlu1 %1382 }
 0x1b7   : > { %1636 = vrot.lane.b32.xlu0 %v766_v1, %s5076_s19  ;;  %1634 = vrot.lane.b32.xlu1 %v765_v14, %s5076_s19  ;;  %v800_v1 = vld [vmem:[#allocation2 + $0x92] sm:$0xff]  ;;  %v799_v14 = vld [vmem:[#allocation2 + $0x82] sm:$0xff] }
 0x1b9   : > { %v6586_v58 = vpop.permute.xlu0 %1392  ;;  %v6588_v49 = vpop.permute.xlu1 %1386 }
 0x1ba   : > { %8838 = vst [vmem:[#allocation60_spill] sm:$0xff] %v6586_v58  ;;  %8839 = vst [vmem:[#allocation61_spill] sm:$0xff] %v6588_v49 }
 0x1bb   : > { %1764 = vrot.lane.b32.xlu0 %v798_v33, %s5077_s20  ;;  %1762 = vrot.lane.b32.xlu1 %v797_v48, %s5077_s20  ;;  %v770_v33 = vld [vmem:[#allocation2 + $0xa9] sm:$0xff]  ;;  %v769_v48 = vld [vmem:[#allocation2 + $0x99] sm:$0xff] }
 0x1bd   : > { %v6592_v43 = vpop.permute.xlu0 %1396  ;;  %v6594_v59 = vpop.permute.xlu1 %1390 }
 0x1be   : > { %8840 = vst [vmem:[#allocation64_spill] sm:$0xff] %v6592_v43  ;;  %8841 = vst [vmem:[#allocation65_spill] sm:$0xff] %v6594_v59 }
 0x1bf   : > { %1640 = vrot.lane.b32.xlu0 %v768_v11, %s5076_s19  ;;  %1638 = vrot.lane.b32.xlu1 %v767_v32, %s5076_s19  ;;  %v802_v11 = vld [vmem:[#allocation2 + $0xaa] sm:$0xff]  ;;  %v801_v32 = vld [vmem:[#allocation2 + $0x9a] sm:$0xff] }
 0x1c1   : > { %v6598_v12 = vpop.permute.xlu0 %1400  ;;  %v6600_v28 = vpop.permute.xlu1 %1394 }
 0x1c2   : > { %8842 = vst [vmem:[#allocation68_spill] sm:$0xff] %v6598_v12  ;;  %8843 = vst [vmem:[#allocation113_spill] sm:$0xff] %v6600_v28 }
 0x1c3   : > { %1768 = vrot.lane.b32.xlu0 %v800_v1, %s5077_s20  ;;  %1766 = vrot.lane.b32.xlu1 %v799_v14, %s5077_s20  ;;  %v772_v1 = vld [vmem:[#allocation2 + $0xc1] sm:$0xff]  ;;  %v771_v14 = vld [vmem:[#allocation2 + $0xb1] sm:$0xff] }
 0x1c5   : > { %v6604_v60 = vpop.permute.xlu0 %1404  ;;  %v6606_v43 = vpop.permute.xlu1 %1398 }
 0x1c6   : > { %8844 = vst [vmem:[#allocation114_spill] sm:$0xff] %v6604_v60  ;;  %8845 = vst [vmem:[#allocation115_spill] sm:$0xff] %v6606_v43 }
 0x1c7   : > { %1644 = vrot.lane.b32.xlu0 %v770_v33, %s5076_s19  ;;  %1642 = vrot.lane.b32.xlu1 %v769_v48, %s5076_s19  ;;  %v804_v33 = vld [vmem:[#allocation2 + $0xc2] sm:$0xff]  ;;  %v803_v48 = vld [vmem:[#allocation2 + $0xb2] sm:$0xff] }
 0x1c9   : > { %v6610_v44 = vpop.permute.xlu0 %1408  ;;  %v6612_v12 = vpop.permute.xlu1 %1402 }
 0x1ca   : > { %8846 = vst [vmem:[#allocation116_spill] sm:$0xff] %v6610_v44  ;;  %8847 = vst [vmem:[#allocation117_spill] sm:$0xff] %v6612_v12 }
 0x1cb   : > { %1772 = vrot.lane.b32.xlu0 %v802_v11, %s5077_s20  ;;  %1770 = vrot.lane.b32.xlu1 %v801_v32, %s5077_s20  ;;  %v774_v11 = vld [vmem:[#allocation2 + $0xd9] sm:$0xff]  ;;  %v773_v32 = vld [vmem:[#allocation2 + $0xc9] sm:$0xff] }
 0x1cd   : > { %v6616_v28 = vpop.permute.xlu0 %1412  ;;  %v6618_v60 = vpop.permute.xlu1 %1406 }
 0x1ce   : > { %8848 = vst [vmem:[#allocation118_spill] sm:$0xff] %v6616_v28  ;;  %8849 = vst [vmem:[#allocation119_spill] sm:$0xff] %v6618_v60 }
 0x1cf   : > { %1648 = vrot.lane.b32.xlu0 %v772_v1, %s5076_s19  ;;  %1646 = vrot.lane.b32.xlu1 %v771_v14, %s5076_s19  ;;  %v806_v1 = vld [vmem:[#allocation2 + $0xda] sm:$0xff]  ;;  %v805_v14 = vld [vmem:[#allocation2 + $0xca] sm:$0xff] }
 0x1d1   : > { %v6622_v43 = vpop.permute.xlu0 %1416  ;;  %v6624_v44 = vpop.permute.xlu1 %1410 }
 0x1d2   : > { %8850 = vst [vmem:[#allocation120_spill] sm:$0xff] %v6622_v43  ;;  %8851 = vst [vmem:[#allocation121_spill] sm:$0xff] %v6624_v44 }
 0x1d3   : > { %1776 = vrot.lane.b32.xlu0 %v804_v33, %s5077_s20  ;;  %1774 = vrot.lane.b32.xlu1 %v803_v48, %s5077_s20  ;;  %v776_v33 = vld [vmem:[#allocation2 + $0xf1] sm:$0xff]  ;;  %v775_v48 = vld [vmem:[#allocation2 + $0xe1] sm:$0xff] }
 0x1d5   : > { %v6628_v12 = vpop.permute.xlu0 %1420  ;;  %v6630_v28 = vpop.permute.xlu1 %1414 }
 0x1d6   : > { %8852 = vst [vmem:[#allocation122_spill] sm:$0xff] %v6628_v12  ;;  %8853 = vst [vmem:[#allocation123_spill] sm:$0xff] %v6630_v28 }
 0x1d7   : > { %1652 = vrot.lane.b32.xlu0 %v774_v11, %s5076_s19  ;;  %1650 = vrot.lane.b32.xlu1 %v773_v32, %s5076_s19  ;;  %v808_v11 = vld [vmem:[#allocation2 + $0xf2] sm:$0xff]  ;;  %v807_v32 = vld [vmem:[#allocation2 + $0xe2] sm:$0xff] }
 0x1d9   : > { %v6634_v60 = vpop.permute.xlu0 %1424  ;;  %v6636_v43 = vpop.permute.xlu1 %1418 }
 0x1da   : > { %8854 = vst [vmem:[#allocation124_spill] sm:$0xff] %v6634_v60  ;;  %8855 = vst [vmem:[#allocation125_spill] sm:$0xff] %v6636_v43 }
 0x1db   : > { %1780 = vrot.lane.b32.xlu0 %v806_v1, %s5077_s20  ;;  %1778 = vrot.lane.b32.xlu1 %v805_v14, %s5077_s20  ;;  %v778_v1 = vld [vmem:[#allocation2 + $0x109] sm:$0xff]  ;;  %v777_v14 = vld [vmem:[#allocation2 + $0xf9] sm:$0xff] }
 0x1dd   : > { %v6640_v44 = vpop.permute.xlu0 %1428  ;;  %v6642_v12 = vpop.permute.xlu1 %1422 }
 0x1de   : > { %8856 = vst [vmem:[#allocation126_spill] sm:$0xff] %v6640_v44  ;;  %8857 = vst [vmem:[#allocation127_spill] sm:$0xff] %v6642_v12 }
 0x1df   : > { %1656 = vrot.lane.b32.xlu0 %v776_v33, %s5076_s19  ;;  %1654 = vrot.lane.b32.xlu1 %v775_v48, %s5076_s19  ;;  %v810_v33 = vld [vmem:[#allocation2 + $0x10a] sm:$0xff]  ;;  %v809_v48 = vld [vmem:[#allocation2 + $0xfa] sm:$0xff] }
 0x1e1   : > { %v6646_v28 = vpop.permute.xlu0 %1496  ;;  %v6648_v60 = vpop.permute.xlu1 %1426 }
 0x1e2   : > { %8858 = vst [vmem:[#allocation128_spill] sm:$0xff] %v6648_v60 }
 0x1e3   : > { %1784 = vrot.lane.b32.xlu0 %v808_v11, %s5077_s20  ;;  %1782 = vrot.lane.b32.xlu1 %v807_v32, %s5077_s20  ;;  %v780_v11 = vld [vmem:[#allocation2 + $0x121] sm:$0xff]  ;;  %v779_v32 = vld [vmem:[#allocation2 + $0x111] sm:$0xff] }
 0x1e5   : > { %v6652_v43 = vpop.permute.xlu0 %1500  ;;  %v6654_v44 = vpop.permute.xlu1 %1430 }
 0x1e6   : > { %8859 = vst [vmem:[#allocation129_spill] sm:$0xff] %v6654_v44 }
 0x1e7   : > { %1660 = vrot.lane.b32.xlu0 %v778_v1, %s5076_s19  ;;  %1658 = vrot.lane.b32.xlu1 %v777_v14, %s5076_s19  ;;  %v812_v1 = vld [vmem:[#allocation2 + $0x122] sm:$0xff]  ;;  %v811_v14 = vld [vmem:[#allocation2 + $0x112] sm:$0xff] }
 0x1e9   : > { %v6658_v12 = vpop.permute.xlu0 %1504  ;;  %v6660_v17 = vpop.permute.xlu1 %1498 }
 0x1eb   : > { %1788 = vrot.lane.b32.xlu0 %v810_v33, %s5077_s20  ;;  %1786 = vrot.lane.b32.xlu1 %v809_v48, %s5077_s20  ;;  %v782_v33 = vld [vmem:[#allocation2 + $0x139] sm:$0xff]  ;;  %v781_v48 = vld [vmem:[#allocation2 + $0x129] sm:$0xff] }
 0x1ed   : > { %v6664_v60 = vpop.permute.xlu0 %1508  ;;  %v6666_v59 = vpop.permute.xlu1 %1502 }
 0x1ef   : > { %1664 = vrot.lane.b32.xlu0 %v780_v11, %s5076_s19  ;;  %1662 = vrot.lane.b32.xlu1 %v779_v32, %s5076_s19  ;;  %v814_v11 = vld [vmem:[#allocation2 + $0x13a] sm:$0xff]  ;;  %v813_v32 = vld [vmem:[#allocation2 + $0x12a] sm:$0xff] }
 0x1f1   : > { %v6670_v44 = vpop.permute.xlu0 %1512  ;;  %v6672_v58 = vpop.permute.xlu1 %1506 }
 0x1f3   : > { %1792 = vrot.lane.b32.xlu0 %v812_v1, %s5077_s20  ;;  %1790 = vrot.lane.b32.xlu1 %v811_v14, %s5077_s20  ;;  %v752_v1 = vld [vmem:[#allocation2 + $0x150] sm:$0xff]  ;;  %v783_v14 = vld [vmem:[#allocation2 + $0x141] sm:$0xff] }
 0x1f5   : > { %v6676_v10 = vpop.permute.xlu0 %1516  ;;  %v6678_v5 = vpop.permute.xlu1 %1510 }
 0x1f6   : > { %8860 = vst [vmem:[#allocation130_spill] sm:$0xff] %v6676_v10 }
 0x1f7   : > { %1668 = vrot.lane.b32.xlu0 %v782_v33, %s5076_s19  ;;  %1666 = vrot.lane.b32.xlu1 %v781_v48, %s5076_s19  ;;  %v784_v33 = vld [vmem:[#allocation2 + $0x151] sm:$0xff]  ;;  %v815_v48 = vld [vmem:[#allocation2 + $0x142] sm:$0xff] }
 0x1f9   : > { %v6682_v38 = vpop.permute.xlu0 %1520  ;;  %v6684_v9 = vpop.permute.xlu1 %1514 }
 0x1fa   : > { %8861 = vst [vmem:[#allocation131_spill] sm:$0xff] %v6682_v38  ;;  %8862 = vst [vmem:[#allocation132_spill] sm:$0xff] %v6684_v9 }
 0x1fb   : > { %1796 = vrot.lane.b32.xlu0 %v814_v11, %s5077_s20  ;;  %1794 = vrot.lane.b32.xlu1 %v813_v32, %s5077_s20  ;;  %v816_v11 = vld [vmem:[#allocation2 + $0x152] sm:$0xff] }
 0x1fc   : > { %v753_v32 = vld [vmem:[#allocation2 + $0x158] sm:$0xff] }
 0x1fd   : > { %v6688_v52 = vpop.permute.xlu0 %1524  ;;  %v6690_v21 = vpop.permute.xlu1 %1518 }
 0x1fe   : > { %8863 = vst [vmem:[#allocation133_spill] sm:$0xff] %v6688_v52  ;;  %8864 = vst [vmem:[#allocation134_spill] sm:$0xff] %v6690_v21 }
 0x1ff   : > { %1544 = vrot.lane.b32.xlu0 %v752_v1, %s5075_s18  ;;  %1670 = vrot.lane.b32.xlu1 %v783_v14, %s5076_s19  ;;  %v754_v1 = vld [vmem:[#allocation2 + $0x168] sm:$0xff]  ;;  %v785_v14 = vld [vmem:[#allocation2 + $0x159] sm:$0xff] }
 0x201   : > { %v6694_v10 = vpop.permute.xlu0 %1528  ;;  %v6696_v38 = vpop.permute.xlu1 %1522 }
 0x202   : > { %8865 = vst [vmem:[#allocation135_spill] sm:$0xff] %v6694_v10  ;;  %8866 = vst [vmem:[#allocation136_spill] sm:$0xff] %v6696_v38  ;;  %v817_v38 = vld [vmem:[#allocation2 + $0x15a] sm:$0xff] }
 0x203   : > { %1672 = vrot.lane.b32.xlu0 %v784_v33, %s5076_s19  ;;  %1798 = vrot.lane.b32.xlu1 %v815_v48, %s5077_s20  ;;  %v535_v33 = vld [vmem:[#allocation2] sm:$0xff]  ;;  %v786_v48 = vld [vmem:[#allocation2 + $0x169] sm:$0xff] }
 0x205   : > { %v6700_v9 = vpop.permute.xlu0 %1532  ;;  %v6702_v52 = vpop.permute.xlu1 %1526 }
 0x206   : > { %8867 = vst [vmem:[#allocation137_spill] sm:$0xff] %v6700_v9  ;;  %8868 = vst [vmem:[#allocation138_spill] sm:$0xff] %v6702_v52 }
 0x207   : > { %1800 = vrot.lane.b32.xlu0 %v816_v11, %s5077_s20  ;;  %1546 = vrot.lane.b32.xlu1 %v753_v32, %s5075_s18  ;;  %v8873_v11 = vld [vmem:[#allocation9_spill] sm:$0xff] }
 0x208   : > { %v1848_v32 = vsel %vm446_vm0, %v535_v33, %v8873_v11 }
 0x209   : > { %v6706_v21 = vpop.permute.xlu0 %1536  ;;  %v6708_v10 = vpop.permute.xlu1 %1530 }
 0x20a   : > { %8869 = vst [vmem:[#allocation139_spill] sm:$0xff] %v6706_v21  ;;  %8870 = vst [vmem:[#allocation140_spill] sm:$0xff] %v6708_v10  ;;  %v8874_v21 = vld [vmem:[#allocation66_spill] sm:$0xff]  ;;  %v755_v10 = vld [vmem:[#allocation2 + $0x170] sm:$0xff] }
 0x20b   : > { %1548 = vrot.lane.b32.xlu0 %v754_v1, %s5075_s18  ;;  %1674 = vrot.lane.b32.xlu1 %v785_v14, %s5076_s19  ;;  %v1881_v1 = vsel %vm1880_vm2, %v1848_v32, %v8874_v21  ;;  %v818_v14 = vld [vmem:[#allocation2 + $0x16a] sm:$0xff] }
 0x20c   : > { %v536_v21 = vld [vmem:[#allocation2 + $0x8] sm:$0xff] }
 0x20d   : > { %v6712_v9 = vpop.permute.xlu0 %1540  ;;  %v6714_v52 = vpop.permute.xlu1 %1534 }
 0x20e   : > { %8871 = vst [vmem:[#allocation141_spill] sm:$0xff] %v6712_v9  ;;  %8872 = vst [vmem:[#allocation142_spill] sm:$0xff] %v6714_v52  ;;  %v1914_v9 = vsel %vm1913_vm4, %v1881_v1, %v6271_v8 }
 0x20f   : > { %1676 = vrot.lane.b32.xlu0 %v786_v48, %s5076_s19  ;;  %1802 = vrot.lane.b32.xlu1 %v817_v38, %s5077_s20  ;;  %v1947_v33 = vsel %vm1946_vm5, %v1914_v9, %v6403_v26  ;;  %v756_v48 = vld [vmem:[#allocation2 + $0x180] sm:$0xff]  ;;  %v787_v9 = vld [vmem:[#allocation2 + $0x171] sm:$0xff] }
 0x210   : > { %v1980_v38 = vsel %vm1979_vm6, %v1947_v33, %v6549_v50  ;;  %v8876_v50 = vld [vmem:[#allocation10_spill] sm:$0xff]  ;;  %v8877_v33 = vld [vmem:[#allocation13_spill] sm:$0xff] }
 0x211   : > { %v1625_v52 = vpop.permute.xlu0 %1624  ;;  %v6724_v49 = vpop.permute.xlu1 %1538  ;;  %v2013_v8 = vsel %vm2012_vm7, %v1980_v38, %v6646_v28  ;;  %v8879_v28 = vld [vmem:[#allocation69_spill] sm:$0xff]  ;;  %v8880_v38 = vld [vmem:[#allocation72_spill] sm:$0xff] }
 0x212   : > { %8875 = vst [vmem:[#allocation9_spill] sm:$0xff] %v6724_v49  ;;  %v2046_v11 = vsel %vm2045_vm8, %v2013_v8, %v1625_v52 }
 0x213   : > { %1804 = vrot.lane.b32.xlu0 %v818_v14, %s5077_s20  ;;  %1550 = vrot.lane.b32.xlu1 %v755_v10, %s5075_s18  ;;  %v1849_v14 = vsel %vm446_vm0, %v536_v21, %v8876_v50  ;;  %v8878_v10 = vld [vmem:[#allocation17_spill] sm:$0xff] }
 0x214   : > { %v1850_v49 = vsel %vm446_vm0, %v8878_v10, %v8877_v33  ;;  %v1882_v8 = vsel %vm1880_vm2, %v1849_v14, %v8880_v38  ;;  %v819_v33 = vld [vmem:[#allocation2 + $0x172] sm:$0xff]  ;;  %v757_v10 = vld [vmem:[#allocation2 + $0x188] sm:$0xff] }
 0x215   : > { %v1753_v32 = vpop.permute.xlu0 %1752  ;;  %v6735_v1 = vpop.permute.xlu1 %1542  ;;  %v1883_v52 = vsel %vm1880_vm2, %v1850_v49, %v8879_v28  ;;  %v1915_v21 = vsel %vm1913_vm4, %v1882_v8, %v6291_v63  ;;  %v8882_v38 = vld [vmem:[#allocation16_spill] sm:$0xff]  ;;  %v8883_v8 = vld [vmem:[#allocation25_spill] sm:$0xff] }
 0x216   : > { %v2079_v26 = vsel %vm2078_vm9, %v2046_v11, %v1753_v32  ;;  %v1916_v11 = vsel %vm1913_vm4, %v1883_v52, %v6279_v62  ;;  %v1948_v49 = vsel %vm1946_vm5, %v1915_v21, %v6423_v57  ;;  %v8881_v52 = vld [vmem:[#allocation12_spill] sm:$0xff] }
 0x217   : > { %1552 = vrot.lane.b32.xlu0 %v756_v48, %s5075_s18  ;;  %4864 = vmatprep.mubr.msk.f32.mxu0 %vm2116_vm10, %v2079_v26  ;;  %v1949_v48 = vsel %vm1946_vm5, %v1916_v11, %v6411_v36  ;;  %v8884_v11 = vld [vmem:[#allocation71_spill] sm:$0xff] }
 0x218   : > { %1678 = vrot.lane.b32.xlu1 %v787_v9, %s5076_s19  ;;  %v1982_v26 = vsel %vm1979_vm6, %v1949_v48, %v6556_v61  ;;  %v1981_v9 = vsel %vm1979_vm6, %v1948_v49, %v6564_v6 }
 0x219   : > { %v1629_v32 = vpop.permute.xlu0 %1628  ;;  %v1627_v50 = vpop.permute.xlu1 %1626  ;;  %v2015_v63 = vsel %vm2012_vm7, %v1982_v26, %v6652_v43  ;;  %v2014_v62 = vsel %vm2012_vm7, %v1981_v9, %v6660_v17  ;;  %v1851_v17 = vsel %vm446_vm0, %v8883_v8, %v8882_v38 }
 0x21a   : > { %v2048_v36 = vsel %vm2045_vm8, %v2015_v63, %v1629_v32  ;;  %v2047_v57 = vsel %vm2045_vm8, %v2014_v62, %v1627_v50  ;;  %v1884_v32 = vsel %vm1880_vm2, %v1851_v17, %v6171_v45  ;;  %v758_v50 = vld [vmem:[#allocation2 + $0x198] sm:$0xff]  ;;  %v759_v17 = vld [vmem:[#allocation2 + $0x1a0] sm:$0xff] }
 0x21b   : > { %1680 = vrot.lane.b32.xlu0 %v6287_v41, %s5076_s19  ;;  %v4964_v41 = vld [vmem:[#allocation2 + $0x30] sm:$0xff]  ;;  %v1917_v48 = vsel %vm1913_vm4, %v1884_v32, %v6299_v16 }
 0x21c   : > { %1806 = vrot.lane.b32.xlu1 %v819_v33, %s5077_s20  ;;  %v1852_v43 = vsel %vm446_vm0, %v4964_v41, %v8881_v52  ;;  %v1950_v9 = vsel %vm1946_vm5, %v1917_v48, %v6431_v51  ;;  %v822_v41 = vld [vmem:[#allocation2 + $0x19a] sm:$0xff] }
 0x21d   : > { %v1757_v14 = vpop.permute.xlu0 %1756  ;;  %v1755_v61 = vpop.permute.xlu1 %1754  ;;  %v1885_v21 = vsel %vm1880_vm2, %v1852_v43, %v8884_v11  ;;  %v1983_v63 = vsel %vm1979_vm6, %v1950_v9, %v6570_v29  ;;  %v8887_v48 = vld [vmem:[#allocation19_spill] sm:$0xff] }
 0x21e   : > { %v2081_v6 = vsel %vm2078_vm9, %v2048_v36, %v1757_v14  ;;  %v2080_v28 = vsel %vm2078_vm9, %v2047_v57, %v1755_v61  ;;  %v1918_v33 = vsel %vm1913_vm4, %v1885_v21, %v6289_v42  ;;  %v2016_v16 = vsel %vm2012_vm7, %v1983_v63, %v6666_v59  ;;  %v4965_v14 = vld [vmem:[#allocation2 + $0x48] sm:$0xff]  ;;  %v8885_v61 = vld [vmem:[#allocation15_spill] sm:$0xff] }
 0x21f   : > { %1808 = vrot.lane.b32.xlu0 %v6419_v24, %s5077_s20  ;;  %4865 = vmatmul.mubr.msk.f32.vlgmr.msra.gmra.mxu0 %vm2116_vm10, %v2080_v28  ;;  %v1951_v26 = vsel %vm1946_vm5, %v1918_v33, %v6421_v46  ;;  %v790_v46 = vld [vmem:[#allocation2 + $0x199] sm:$0xff]  ;;  %v8886_v59 = vld [vmem:[#allocation20_spill] sm:$0xff] }
 0x220   : > { %1554 = vrot.lane.b32.xlu1 %v757_v10, %s5075_s18  ;;  %4867 = vmatprep.mubr.msk.f32.mxu0 %vm2116_vm10, %v2081_v6  ;;  %v1984_v45 = vsel %vm1979_vm6, %v1951_v26, %v6562_v37  ;;  %v4966_v10 = vld [vmem:[#allocation2 + $0x38] sm:$0xff]  ;;  %v4967_v33 = vld [vmem:[#allocation2 + $0x60] sm:$0xff] }
 0x221   : > { %v1633_v24 = vpop.permute.xlu0 %1632  ;;  %v1631_v49 = vpop.permute.xlu1 %1630  ;;  %v2017_v42 = vsel %vm2012_vm7, %v1984_v45, %v6658_v12  ;;  %v1854_v12 = vsel %vm446_vm0, %v4965_v14, %v8885_v61  ;;  %v1853_v6 = vsel %vm446_vm0, %v4966_v10, %v8886_v59  ;;  %v8890_v61 = vld [vmem:[#allocation27_spill] sm:$0xff] }
 0x222   : > { %v2050_v51 = vsel %vm2045_vm8, %v2017_v42, %v1633_v24  ;;  %v2049_v62 = vsel %vm2045_vm8, %v2016_v16, %v1631_v49  ;;  %v1886_v28 = vsel %vm1880_vm2, %v1853_v6, %v6178_v4  ;;  %v4968_v24 = vld [vmem:[#allocation2 + $0x50] sm:$0xff]  ;;  %v8888_v49 = vld [vmem:[#allocation23_spill] sm:$0xff] }
 0x223   : > { %1556 = vrot.lane.b32.xlu0 %v758_v50, %s5075_s18  ;;  %v1919_v43 = vsel %vm1913_vm4, %v1886_v28, %v6309_v54 }
 0x224   : > { %1682 = vrot.lane.b32.xlu1 %v6305_v0, %s5076_s19  ;;  %v1887_v0 = vsel %vm1880_vm2, %v1854_v12, %v6169_v18  ;;  %v1952_v4 = vsel %vm1946_vm5, %v1919_v43, %v6441_v15 }
 0x225   : > { %v1761_v37 = vpop.permute.xlu0 %1760  ;;  %v1759_v36 = vpop.permute.xlu1 %1758  ;;  %v1920_v52 = vsel %vm1913_vm4, %v1887_v0, %v6297_v22  ;;  %v1985_v11 = vsel %vm1979_vm6, %v1952_v4, %v6576_v2 }
 0x226   : > { %v2083_v29 = vsel %vm2078_vm9, %v2050_v51, %v1761_v37  ;;  %v2082_v57 = vsel %vm2078_vm9, %v2049_v62, %v1759_v36  ;;  %v1953_v18 = vsel %vm1946_vm5, %v1920_v52, %v6429_v20  ;;  %v2018_v22 = vsel %vm2012_vm7, %v1985_v11, %v6672_v58  ;;  %v8894_v11 = vld [vmem:[#allocation26_spill] sm:$0xff] }
 0x227   : > { %1684 = vrot.lane.b32.xlu0 %v790_v46, %s5076_s19  ;;  %4868 = vmatmul.mubr.msk.f32.gmra.mxu0 %vm2116_vm10, %v2082_v57  ;;  %v1855_v58 = vsel %vm446_vm0, %v4968_v24, %v8888_v49  ;;  %v823_v46 = vld [vmem:[#allocation2 + $0x1a2] sm:$0xff]  ;;  %v4969_v57 = vld [vmem:[#allocation2 + $0x78] sm:$0xff] }
 0x228   : > { %1810 = vrot.lane.b32.xlu1 %v6437_v7, %s5077_s20  ;;  %4870 = vmatprep.mubr.msk.f32.mxu0 %vm2116_vm10, %v2083_v29  ;;  %v1986_v7 = vsel %vm1979_vm6, %v1953_v18, %v6568_v31  ;;  %v791_v31 = vld [vmem:[#allocation2 + $0x1a1] sm:$0xff]  ;;  %v1888_v9 = vsel %vm1880_vm2, %v1855_v58, %v6185_v34 }
 0x229   : > { %v1637_v38 = vpop.permute.xlu0 %1636  ;;  %v1635_v8 = vpop.permute.xlu1 %1634  ;;  %v2019_v54 = vsel %vm2012_vm7, %v1986_v7, %v6664_v60  ;;  %v1856_v60 = vsel %vm446_vm0, %v4967_v33, %v8887_v48  ;;  %v1921_v63 = vsel %vm1913_vm4, %v1888_v9, %v6317_v27  ;;  %v8899_v48 = vld [vmem:[#allocation94_spill] sm:$0xff]  ;;  %v8900_v58 = vld [vmem:[#allocation11_spill] sm:$0xff]  ;;  %v8901_v9 = vld [vmem:[#allocation21_spill] sm:$0xff] }
 0x22a   : > { %v2052_v20 = vsel %vm2045_vm8, %v2019_v54, %v1637_v38  ;;  %v2051_v15 = vsel %vm2045_vm8, %v2018_v22, %v1635_v8  ;;  %v1889_v26 = vsel %vm1880_vm2, %v1856_v60, %v6176_v23  ;;  %v1954_v23 = vsel %vm1946_vm5, %v1921_v63, %v6449_v13  ;;  %v8892_v38 = vld [vmem:[#allocation130_spill] sm:$0xff]  ;;  %v8893_v8 = vld [vmem:[#allocation132_spill] sm:$0xff]  ;;  %v4972_v22 = vld [vmem:[#allocation2 + $0x80] sm:$0xff] }
 0x22b   : > { %1812 = vrot.lane.b32.xlu0 %v822_v41, %s5077_s20  ;;  %v1922_v45 = vsel %vm1913_vm4, %v1889_v26, %v6307_v3  ;;  %v1987_v62 = vsel %vm1979_vm6, %v1954_v23, %v6582_v35  ;;  %v8889_v35 = vld [vmem:[#allocation22_spill] sm:$0xff]  ;;  %v8902_v63 = vld [vmem:[#allocation60_spill] sm:$0xff] }
 0x22c   : > { %1558 = vrot.lane.b32.xlu1 %v759_v17, %s5075_s18  ;;  %v1955_v51 = vsel %vm1946_vm5, %v1922_v45, %v6439_v53  ;;  %v2020_v27 = vsel %vm2012_vm7, %v1987_v62, %v6678_v5  ;;  %v1858_v14 = vsel %vm446_vm0, %v4969_v57, %v8889_v35  ;;  %v4974_v35 = vld [vmem:[#allocation2 + $0x98] sm:$0xff] }
 0x22d   : > { %v1765_v21 = vpop.permute.xlu0 %1764  ;;  %v1763_v32 = vpop.permute.xlu1 %1762  ;;  %v1988_v34 = vsel %vm1979_vm6, %v1955_v51, %v6574_v56  ;;  %v1891_v12 = vsel %vm1880_vm2, %v1858_v14, %v6183_v25  ;;  %v8904_v51 = vld [vmem:[#allocation131_spill] sm:$0xff] }
 0x22e   : > { %v2085_v50 = vsel %vm2078_vm9, %v2052_v20, %v1765_v21  ;;  %v2084_v2 = vsel %vm2078_vm9, %v2051_v15, %v1763_v32  ;;  %v2021_v3 = vsel %vm2012_vm7, %v1988_v34, %v6670_v44  ;;  %v4970_v44 = vld [vmem:[#allocation2 + $0x68] sm:$0xff]  ;;  %v1924_v59 = vsel %vm1913_vm4, %v1891_v12, %v6315_v30  ;;  %v8895_v20 = vld [vmem:[#allocation31_spill] sm:$0xff]  ;;  %v8896_v21 = vld [vmem:[#allocation73_spill] sm:$0xff] }
 0x22f   : > { %4871 = vmatmul.mubr.msk.f32.gmra.mxu0 %vm2116_vm10, %v2084_v2  ;;  %v1857_v5 = vsel %vm446_vm0, %v4970_v44, %v8890_v61  ;;  %v1957_v41 = vsel %vm1946_vm5, %v1924_v59, %v6447_v40  ;;  %v1859_v15 = vsel %vm446_vm0, %v4972_v22, %v8895_v20  ;;  %v8898_v2 = vld [vmem:[#allocation8_spill] sm:$0xff]  ;;  %v8905_v34 = vld [vmem:[#allocation134_spill] sm:$0xff]  ;;  %v8907_v14 = vld [vmem:[#allocation35_spill] sm:$0xff] }
 0x230   : > { %1686 = vrot.lane.b32.xlu1 %v791_v31, %s5076_s19  ;;  %4873 = vmatprep.mubr.msk.f32.mxu0 %vm2116_vm10, %v2085_v50  ;;  %v1890_v10 = vsel %vm1880_vm2, %v1857_v5, %v6193_v19  ;;  %v1990_v25 = vsel %vm1979_vm6, %v1957_v41, %v6580_v55  ;;  %v8891_v19 = vld [vmem:[#allocation61_spill] sm:$0xff]  ;;  %v8897_v31 = vld [vmem:[#allocation75_spill] sm:$0xff]  ;;  %v1861_v44 = vsel %vm446_vm0, %v4974_v35, %v8907_v14  ;;  %v8908_v61 = vld [vmem:[#allocation74_spill] sm:$0xff] }
 0x231   : > { %v1641_v42 = vpop.permute.xlu0 %1640  ;;  %v1639_v16 = vpop.permute.xlu1 %1638  ;;  %v1923_v6 = vsel %vm1913_vm4, %v1890_v10, %v6325_v39  ;;  %v2023_v30 = vsel %vm2012_vm7, %v1990_v25, %v8892_v38  ;;  %v4971_v55 = vld [vmem:[#allocation2 + $0x90] sm:$0xff]  ;;  %v1892_v50 = vsel %vm1880_vm2, %v1859_v15, %v8897_v31  ;;  %v8912_v25 = vld [vmem:[#allocation14_spill] sm:$0xff]  ;;  %v4975_v15 = vld [vmem:[#allocation2 + $0xc0] sm:$0xff] }
 0x232   : > { %v2054_v37 = vsel %vm2045_vm8, %v2021_v3, %v1641_v42  ;;  %v2053_v53 = vsel %vm2045_vm8, %v2020_v27, %v1639_v16  ;;  %v1956_v52 = vsel %vm1946_vm5, %v1923_v6, %v6457_v47  ;;  %v1860_v54 = vsel %vm446_vm0, %v4971_v55, %v8894_v11  ;;  %v8903_v16 = vld [vmem:[#allocation65_spill] sm:$0xff] }
 0x233   : > { %v1989_v43 = vsel %vm1979_vm6, %v1956_v52, %v8891_v19  ;;  %v1893_v32 = vsel %vm1880_vm2, %v1860_v54, %v8896_v21  ;;  %v1925_v60 = vsel %vm1913_vm4, %v1892_v50, %v8899_v48  ;;  %v8909_v12 = vld [vmem:[#allocation77_spill] sm:$0xff]  ;;  %v8918_v21 = vld [vmem:[#allocation34_spill] sm:$0xff]  ;;  %v8919_v50 = vld [vmem:[#allocation39_spill] sm:$0xff] }
 0x234   : > { %1814 = vrot.lane.b32.xlu1 %v823_v46, %s5077_s20  ;;  %v2022_v39 = vsel %vm2012_vm7, %v1989_v43, %v8893_v8  ;;  %v1926_v33 = vsel %vm1913_vm4, %v1893_v32, %v8898_v2  ;;  %v1958_v45 = vsel %vm1946_vm5, %v1925_v60, %v8901_v9  ;;  %v1894_v10 = vsel %vm1880_vm2, %v1861_v44, %v8909_v12  ;;  %v8910_v59 = vld [vmem:[#allocation93_spill] sm:$0xff]  ;;  %v8913_v43 = vld [vmem:[#allocation24_spill] sm:$0xff]  ;;  %v8921_v60 = vld [vmem:[#allocation79_spill] sm:$0xff] }
 0x235   : > { %v1769_v36 = vpop.permute.xlu0 %1768  ;;  %v1767_v13 = vpop.permute.xlu1 %1766  ;;  %v1959_v26 = vsel %vm1946_vm5, %v1926_v33, %v8900_v58  ;;  %v1991_v46 = vsel %vm1979_vm6, %v1958_v45, %v8903_v16  ;;  %v1864_v32 = vsel %vm446_vm0, %v4975_v15, %v8918_v21  ;;  %v4976_v31 = vld [vmem:[#allocation2 + $0xb0] sm:$0xff]  ;;  %v8920_v33 = vld [vmem:[#allocation76_spill] sm:$0xff]  ;;  %v4977_v44 = vld [vmem:[#allocation2 + $0xd8] sm:$0xff] }
 0x236   : > { %v2087_v29 = vsel %vm2078_vm9, %v2054_v37, %v1769_v36  ;;  %v2086_v56 = vsel %vm2078_vm9, %v2053_v53, %v1767_v13  ;;  %v1992_v42 = vsel %vm1979_vm6, %v1959_v26, %v8902_v63  ;;  %v2024_v62 = vsel %vm2012_vm7, %v1991_v46, %v8905_v34  ;;  %v8923_v26 = vld [vmem:[#allocation98_spill] sm:$0xff]  ;;  %v8925_v46 = vld [vmem:[#allocation29_spill] sm:$0xff]  ;;  %v4978_v12 = vld [vmem:[#allocation2 + $0xc8] sm:$0xff] }
 0x237   : > { %4874 = vmatmul.mubr.msk.f32.gmra.mxu0 %vm2116_vm10, %v2086_v56  ;;  %v2025_v23 = vsel %vm2012_vm7, %v1992_v42, %v8904_v51  ;;  %v8906_v56 = vld [vmem:[#allocation30_spill] sm:$0xff]  ;;  %v1863_v2 = vsel %vm446_vm0, %v4976_v31, %v8919_v50  ;;  %v1897_v48 = vsel %vm1880_vm2, %v1864_v32, %v8920_v33 }
 0x238   : > { %4876 = vmatprep.mubr.msk.f32.mxu0 %vm2116_vm10, %v2087_v29  ;;  %v4973_v29 = vld [vmem:[#allocation2 + $0xa8] sm:$0xff]  ;;  %v8924_v42 = vld [vmem:[#allocation18_spill] sm:$0xff] }
 0x239   : > { %v1645_v0 = vpop.permute.xlu0 %1644  ;;  %v1643_v28 = vpop.permute.xlu1 %1642  ;;  %v1862_v57 = vsel %vm446_vm0, %v4973_v29, %v8906_v56  ;;  %v8942_v33 = vld [vmem:[#allocation42_spill] sm:$0xff] }
 0x23a   : > { %v2056_v17 = vsel %vm2045_vm8, %v2023_v30, %v1645_v0  ;;  %v2055_v18 = vsel %vm2045_vm8, %v2022_v39, %v1643_v28  ;;  %v1895_v5 = vsel %vm1880_vm2, %v1862_v57, %v8908_v61  ;;  %v8911_v0 = vld [vmem:[#allocation96_spill] sm:$0xff]  ;;  %v8915_v39 = vld [vmem:[#allocation113_spill] sm:$0xff]  ;;  %v8930_v61 = vld [vmem:[#allocation38_spill] sm:$0xff] }
 0x23b   : > { %v1928_v6 = vsel %vm1913_vm4, %v1895_v5, %v8910_v59  ;;  %v1927_v28 = vsel %vm1913_vm4, %v1894_v10, %v8911_v0  ;;  %v8914_v30 = vld [vmem:[#allocation64_spill] sm:$0xff]  ;;  %v1866_v5 = vsel %vm446_vm0, %v4977_v44, %v8930_v61  ;;  %v8931_v10 = vld [vmem:[#allocation43_spill] sm:$0xff] }
 0x23c   : > { %v1961_v19 = vsel %vm1946_vm5, %v1928_v6, %v8912_v25  ;;  %v1960_v38 = vsel %vm1946_vm5, %v1927_v28, %v8913_v43  ;;  %v1865_v59 = vsel %vm446_vm0, %v4978_v12, %v8931_v10  ;;  %v8932_v6 = vld [vmem:[#allocation78_spill] sm:$0xff]  ;;  %v8933_v28 = vld [vmem:[#allocation81_spill] sm:$0xff] }
 0x23d   : > { %v1773_v40 = vpop.permute.xlu0 %1772  ;;  %v1771_v4 = vpop.permute.xlu1 %1770  ;;  %v1994_v8 = vsel %vm1979_vm6, %v1961_v19, %v8914_v30  ;;  %v1899_v0 = vsel %vm1880_vm2, %v1866_v5, %v8932_v6  ;;  %v8935_v19 = vld [vmem:[#allocation100_spill] sm:$0xff] }
 0x23e   : > { %v2089_v47 = vsel %vm2078_vm9, %v2056_v17, %v1773_v40  ;;  %v2088_v7 = vsel %vm2078_vm9, %v2055_v18, %v1771_v4  ;;  %v1993_v17 = vsel %vm1979_vm6, %v1960_v38, %v8915_v39  ;;  %v8916_v18 = vld [vmem:[#allocation133_spill] sm:$0xff]  ;;  %v8917_v4 = vld [vmem:[#allocation136_spill] sm:$0xff] }
 0x23f   : > { %4877 = vmatmul.mubr.msk.f32.gmra.mxu0 %vm2116_vm10, %v2088_v7  ;;  %v2027_v40 = vsel %vm2012_vm7, %v1994_v8, %v8916_v18  ;;  %v8936_v8 = vld [vmem:[#allocation28_spill] sm:$0xff] }
 0x240   : > { %4879 = vmatprep.mubr.msk.f32.mxu0 %vm2116_vm10, %v2089_v47  ;;  %v2026_v47 = vsel %vm2012_vm7, %v1993_v17, %v8917_v4  ;;  %v8937_v17 = vld [vmem:[#allocation33_spill] sm:$0xff]  ;;  %v4981_v6 = vld [vmem:[#allocation2 + $0x108] sm:$0xff] }
 0x241   : > { %v1649_v24 = vpop.permute.xlu0 %1648  ;;  %v1647_v49 = vpop.permute.xlu1 %1646 }
 0x242   : > { %v2058_v3 = vsel %vm2045_vm8, %v2025_v23, %v1649_v24  ;;  %v2057_v27 = vsel %vm2045_vm8, %v2024_v62, %v1647_v49  ;;  %v1896_v24 = vsel %vm1880_vm2, %v1863_v2, %v8921_v60  ;;  %v8922_v49 = vld [vmem:[#allocation95_spill] sm:$0xff]  ;;  %v8926_v23 = vld [vmem:[#allocation68_spill] sm:$0xff]  ;;  %v4979_v2 = vld [vmem:[#allocation2 + $0xf0] sm:$0xff] }
 0x243   : > { %v1930_v58 = vsel %vm1913_vm4, %v1897_v48, %v8922_v49  ;;  %v1929_v9 = vsel %vm1913_vm4, %v1896_v24, %v8923_v26  ;;  %v8927_v62 = vld [vmem:[#allocation115_spill] sm:$0xff]  ;;  %v1868_v48 = vsel %vm446_vm0, %v4979_v2, %v8942_v33  ;;  %v2672_v33 = vld [vmem:[#allocation3 + $0x1] sm:$0xff] }
 0x244   : > { %v1963_v16 = vsel %vm1946_vm5, %v1930_v58, %v8924_v42  ;;  %v1962_v51 = vsel %vm1946_vm5, %v1929_v9, %v8925_v46  ;;  %v4980_v60 = vld [vmem:[#allocation2 + $0xe0] sm:$0xff]  ;;  %v8944_v58 = vld [vmem:[#allocation80_spill] sm:$0xff]  ;;  %2961 = vrot.lane.b32.xlu0 %v2672_v33, %s5071_s10 }
 0x245   : > { %v1777_v37 = vpop.permute.xlu0 %1776  ;;  %v1775_v53 = vpop.permute.xlu1 %1774  ;;  %v1996_v34 = vsel %vm1979_vm6, %v1963_v16, %v8926_v23  ;;  %v8943_v24 = vld [vmem:[#allocation47_spill] sm:$0xff]  ;;  %v1901_v26 = vsel %vm1880_vm2, %v1868_v48, %v8944_v58  ;;  %v8947_v16 = vld [vmem:[#allocation102_spill] sm:$0xff] }
 0x246   : > { %v2091_v36 = vsel %vm2078_vm9, %v2058_v3, %v1777_v37  ;;  %v2090_v13 = vsel %vm2078_vm9, %v2057_v27, %v1775_v53  ;;  %v1995_v3 = vsel %vm1979_vm6, %v1962_v51, %v8927_v62  ;;  %v8928_v27 = vld [vmem:[#allocation135_spill] sm:$0xff]  ;;  %v8929_v53 = vld [vmem:[#allocation138_spill] sm:$0xff]  ;;  %v1867_v49 = vsel %vm446_vm0, %v4980_v60, %v8943_v24 }
 0x247   : > { %4880 = vmatmul.mubr.msk.f32.gmra.mxu0 %vm2116_vm10, %v2090_v13  ;;  %v2029_v37 = vsel %vm2012_vm7, %v1996_v34, %v8928_v27  ;;  %v8945_v9 = vld [vmem:[#allocation83_spill] sm:$0xff]  ;;  %v8948_v34 = vld [vmem:[#allocation32_spill] sm:$0xff] }
 0x248   : > { %4882 = vmatprep.mubr.msk.f32.mxu0 %vm2116_vm10, %v2091_v36  ;;  %v2028_v36 = vsel %vm2012_vm7, %v1995_v3, %v8929_v53  ;;  %v8949_v3 = vld [vmem:[#allocation37_spill] sm:$0xff] }
 0x249   : > { %v1653_v41 = vpop.permute.xlu0 %1652  ;;  %v1651_v52 = vpop.permute.xlu1 %1650 }
 0x24a   : > { %v2060_v7 = vsel %vm2045_vm8, %v2027_v40, %v1653_v41  ;;  %v2059_v55 = vsel %vm2045_vm8, %v2026_v47, %v1651_v52  ;;  %v1898_v41 = vsel %vm1880_vm2, %v1865_v59, %v8933_v28  ;;  %v8934_v52 = vld [vmem:[#allocation97_spill] sm:$0xff]  ;;  %v8938_v40 = vld [vmem:[#allocation114_spill] sm:$0xff] }
 0x24b   : > { %v1932_v25 = vsel %vm1913_vm4, %v1899_v0, %v8934_v52  ;;  %v1931_v43 = vsel %vm1913_vm4, %v1898_v41, %v8935_v19  ;;  %v8939_v47 = vld [vmem:[#allocation117_spill] sm:$0xff]  ;;  %v8955_v0 = vld [vmem:[#allocation46_spill] sm:$0xff]  ;;  %v8956_v52 = vld [vmem:[#allocation51_spill] sm:$0xff] }
 0x24c   : > { %v1965_v39 = vsel %vm1946_vm5, %v1932_v25, %v8936_v8  ;;  %v1964_v18 = vsel %vm1946_vm5, %v1931_v43, %v8937_v17  ;;  %v1870_v28 = vsel %vm446_vm0, %v4981_v6, %v8955_v0  ;;  %v4982_v41 = vld [vmem:[#allocation2 + $0xf8] sm:$0xff]  ;;  %v8959_v8 = vld [vmem:[#allocation101_spill] sm:$0xff]  ;;  %v8960_v17 = vld [vmem:[#allocation104_spill] sm:$0xff] }
 0x24d   : > { %v1781_v11 = vpop.permute.xlu0 %1780  ;;  %v1779_v54 = vpop.permute.xlu1 %1778  ;;  %v1998_v4 = vsel %vm1979_vm6, %v1965_v39, %v8938_v40  ;;  %v1869_v25 = vsel %vm446_vm0, %v4982_v41, %v8956_v52  ;;  %v8957_v19 = vld [vmem:[#allocation82_spill] sm:$0xff]  ;;  %v8976_v6 = vld [vmem:[#allocation120_spill] sm:$0xff] }
 0x24e   : > { %v2093_v22 = vsel %vm2078_vm9, %v2060_v7, %v1781_v11  ;;  %v2092_v20 = vsel %vm2078_vm9, %v2059_v55, %v1779_v54  ;;  %v1997_v7 = vsel %vm1979_vm6, %v1964_v18, %v8939_v47  ;;  %v8940_v55 = vld [vmem:[#allocation137_spill] sm:$0xff]  ;;  %v8941_v54 = vld [vmem:[#allocation140_spill] sm:$0xff]  ;;  %v1903_v43 = vsel %vm1880_vm2, %v1870_v28, %v8957_v19 }
 0x24f   : > { %4883 = vmatmul.mubr.msk.f32.gmra.mxu0 %vm2116_vm10, %v2092_v20  ;;  %v2031_v11 = vsel %vm2012_vm7, %v1998_v4, %v8940_v55  ;;  %v1936_v39 = vsel %vm1913_vm4, %v1903_v43, %v8959_v8  ;;  %v8961_v47 = vld [vmem:[#allocation36_spill] sm:$0xff]  ;;  %v8962_v55 = vld [vmem:[#allocation41_spill] sm:$0xff]  ;;  %v8977_v43 = vld [vmem:[#allocation59_spill] sm:$0xff] }
 0x250   : > { %4885 = vmatprep.mubr.msk.f32.mxu0 %vm2116_vm10, %v2093_v22  ;;  %v2030_v22 = vsel %vm2012_vm7, %v1997_v7, %v8941_v54  ;;  %v1969_v7 = vsel %vm1946_vm5, %v1936_v39, %v8961_v47  ;;  %v4985_v19 = vld [vmem:[#allocation2 + $0x128] sm:$0xff] }
 0x251   : > { %v1657_v45 = vpop.permute.xlu0 %1656  ;;  %v1655_v63 = vpop.permute.xlu1 %1654  ;;  %v8979_v39 = vld [vmem:[#allocation108_spill] sm:$0xff] }
 0x252   : > { %v2062_v13 = vsel %vm2045_vm8, %v2029_v37, %v1657_v45  ;;  %v2061_v29 = vsel %vm2045_vm8, %v2028_v36, %v1655_v63  ;;  %v1900_v45 = vsel %vm1880_vm2, %v1867_v49, %v8945_v9  ;;  %v8946_v63 = vld [vmem:[#allocation99_spill] sm:$0xff]  ;;  %v8950_v37 = vld [vmem:[#allocation116_spill] sm:$0xff]  ;;  %v4983_v9 = vld [vmem:[#allocation2 + $0x110] sm:$0xff] }
 0x253   : > { %v1934_v42 = vsel %vm1913_vm4, %v1901_v26, %v8946_v63  ;;  %v1933_v46 = vsel %vm1913_vm4, %v1900_v45, %v8947_v16  ;;  %v8951_v36 = vld [vmem:[#allocation119_spill] sm:$0xff] }
 0x254   : > { %v1967_v62 = vsel %vm1946_vm5, %v1934_v42, %v8948_v34  ;;  %v1966_v27 = vsel %vm1946_vm5, %v1933_v46, %v8949_v3  ;;  %v8967_v45 = vld [vmem:[#allocation55_spill] sm:$0xff]  ;;  %v8969_v46 = vld [vmem:[#allocation106_spill] sm:$0xff] }
 0x255   : > { %v1785_v56 = vpop.permute.xlu0 %1784  ;;  %v1783_v57 = vpop.permute.xlu1 %1782  ;;  %v2000_v53 = vsel %vm1979_vm6, %v1967_v62, %v8950_v37  ;;  %v1871_v63 = vsel %vm446_vm0, %v4983_v9, %v8967_v45  ;;  %v8968_v42 = vld [vmem:[#allocation87_spill] sm:$0xff]  ;;  %v8970_v62 = vld [vmem:[#allocation45_spill] sm:$0xff]  ;;  %v8971_v37 = vld [vmem:[#allocation50_spill] sm:$0xff] }
 0x256   : > { %v2095_v35 = vsel %vm2078_vm9, %v2062_v13, %v1785_v56  ;;  %v2094_v14 = vsel %vm2078_vm9, %v2061_v29, %v1783_v57  ;;  %v1999_v13 = vsel %vm1979_vm6, %v1966_v27, %v8951_v36  ;;  %v8952_v29 = vmov 0.0   ;;  %v8953_v56 = vld [vmem:[#allocation139_spill] sm:$0xff] }
 0x257   : > { %4886 = vmatmul.mubr.msk.f32.gmra.mxu0 %vm2116_vm10, %v2094_v14  ;;  %2558 = vst.msk [vmem:[#allocation3 + $0x28] sm:$0x3] %vm2554_vm11, %v8952_v29  ;;  %2555 = vst.msk [vmem:[#allocation3 + $0x10] sm:$0x3] %vm2554_vm11, %v8952_v29  ;;  %v2033_v57 = vsel %vm2012_vm7, %v2000_v53, %v8953_v56  ;;  %v1904_v16 = vsel %vm1880_vm2, %v1871_v63, %v8968_v42  ;;  %v4984_v27 = vld [vmem:[#allocation2 + $0x120] sm:$0xff] }
 0x258   : > { %4888 = vmatprep.mubr.msk.f32.mxu0 %vm2116_vm10, %v2095_v35  ;;  %2561 = vst.msk [vmem:[#allocation3 + $0x40] sm:$0x3] %vm2554_vm11, %v8952_v29  ;;  %2564 = vst.msk [vmem:[#allocation3 + $0x58] sm:$0x3] %vm2554_vm11, %v8952_v29  ;;  %v8954_v35 = vld [vmem:[#allocation142_spill] sm:$0xff]  ;;  %v1872_v53 = vsel %vm446_vm0, %v4984_v27, %v8971_v37  ;;  %v8972_v36 = vld [vmem:[#allocation123_spill] sm:$0xff] }
 0x259   : > { %v1661_v38 = vpop.permute.xlu0 %1660  ;;  %v1659_v30 = vpop.permute.xlu1 %1658  ;;  %2567 = vst.msk [vmem:[#allocation3 + $0x70] sm:$0x3] %vm2554_vm11, %v8952_v29  ;;  %2570 = vst.msk [vmem:[#allocation3 + $0x88] sm:$0x3] %vm2554_vm11, %v8952_v29  ;;  %v2032_v14 = vsel %vm2012_vm7, %v1999_v13, %v8954_v35  ;;  %v8974_v35 = vld [vmem:[#allocation103_spill] sm:$0xff] }
 0x25a   : > { %v2064_v20 = vsel %vm2045_vm8, %v2031_v11, %v1661_v38  ;;  %v2063_v15 = vsel %vm2045_vm8, %v2030_v22, %v1659_v30  ;;  %2573 = vst.msk [vmem:[#allocation3 + $0xa0] sm:$0x3] %vm2554_vm11, %v8952_v29  ;;  %2576 = vst.msk [vmem:[#allocation3 + $0xb8] sm:$0x3] %vm2554_vm11, %v8952_v29  ;;  %v8958_v38 = vld [vmem:[#allocation85_spill] sm:$0xff]  ;;  %v8963_v22 = vld [vmem:[#allocation118_spill] sm:$0xff] }
 0x25b   : > { %2579 = vst.msk [vmem:[#allocation3 + $0xd0] sm:$0x3] %vm2554_vm11, %v8952_v29  ;;  %2582 = vst.msk [vmem:[#allocation3 + $0xe8] sm:$0x3] %vm2554_vm11, %v8952_v29  ;;  %v1902_v30 = vsel %vm1880_vm2, %v1869_v25, %v8958_v38  ;;  %v1873_v38 = vsel %vm446_vm0, %v4985_v19, %v8977_v43 }
 0x25c   : > { %2585 = vst.msk [vmem:[#allocation3 + $0x100] sm:$0x3] %vm2554_vm11, %v8952_v29  ;;  %2588 = vst.msk [vmem:[#allocation3 + $0x118] sm:$0x3] %vm2554_vm11, %v8952_v29  ;;  %v1935_v18 = vsel %vm1913_vm4, %v1902_v30, %v8960_v17  ;;  %v8978_v30 = vld [vmem:[#allocation89_spill] sm:$0xff] }
 0x25d   : > { %v1789_v21 = vpop.permute.xlu0 %1788  ;;  %v1787_v32 = vpop.permute.xlu1 %1786  ;;  %2591 = vst.msk [vmem:[#allocation3 + $0x130] sm:$0x3] %vm2554_vm11, %v8952_v29  ;;  %2594 = vst.msk [vmem:[#allocation3 + $0x148] sm:$0x3] %vm2554_vm11, %v8952_v29  ;;  %v1968_v11 = vsel %vm1946_vm5, %v1935_v18, %v8962_v55  ;;  %v1906_v8 = vsel %vm1880_vm2, %v1873_v38, %v8978_v30  ;;  %v8981_v55 = vld [vmem:[#allocation54_spill] sm:$0xff] }
 0x25e   : > { %v2097_v31 = vsel %vm2078_vm9, %v2064_v20, %v1789_v21  ;;  %v2096_v50 = vsel %vm2078_vm9, %v2063_v15, %v1787_v32  ;;  %2597 = vst.msk [vmem:[#allocation3 + $0x160] sm:$0x3] %vm2554_vm11, %v8952_v29  ;;  %2600 = vst.msk [vmem:[#allocation3 + $0x178] sm:$0x3] %vm2554_vm11, %v8952_v29  ;;  %v2673_v54 = vld [vmem:[#allocation3 + $0x9] sm:$0xff]  ;;  %v2002_v20 = vsel %vm1979_vm6, %v1969_v7, %v8963_v22  ;;  %v8964_v15 = vld [vmem:[#allocation121_spill] sm:$0xff] }
 0x25f   : > { %4889 = vmatmul.mubr.msk.f32.gmra.mxu0 %vm2116_vm10, %v2096_v50  ;;  %2603 = vst.msk [vmem:[#allocation3 + $0x190] sm:$0x3] %vm2554_vm11, %v8952_v29  ;;  %2606 = vst.msk [vmem:[#allocation3 + $0x1a8] sm:$0x3] %vm2554_vm11, %v8952_v29  ;;  %v2001_v21 = vsel %vm1979_vm6, %v1968_v11, %v8964_v15  ;;  %2963 = vrot.lane.b32.xlu1 %v2673_v54, %s5071_s10  ;;  %v8965_v32 = vld [vmem:[#allocation141_spill] sm:$0xff]  ;;  %v8973_v29 = vld [vmem:[#allocation84_spill] sm:$0xff]  ;;  %v1939_v17 = vsel %vm1913_vm4, %v1906_v8, %v8979_v39 }
 0x260   : > { %4891 = vmatprep.mubr.msk.f32.mxu0 %vm2116_vm10, %v2097_v31  ;;  %v2035_v31 = vsel %vm2012_vm7, %v2002_v20, %v8965_v32  ;;  %v8966_v50 = vld [vmem:[#allocation9_spill] sm:$0xff]  ;;  %v1905_v56 = vsel %vm1880_vm2, %v1872_v53, %v8973_v29  ;;  %v4986_v7 = vld [vmem:[#allocation2 + $0x138] sm:$0xff]  ;;  %v8997_v39 = vld [vmem:[#allocation67_spill] sm:$0xff] }
 0x261   : > { %v1665_v51 = vpop.permute.xlu0 %1664  ;;  %v1663_v23 = vpop.permute.xlu1 %1662  ;;  %v2034_v2 = vsel %vm2012_vm7, %v2001_v21, %v8966_v50  ;;  %v1874_v11 = vsel %vm446_vm0, %v4986_v7, %v8981_v55  ;;  %v8982_v54 = vld [vmem:[#allocation125_spill] sm:$0xff]  ;;  %v8983_v20 = vld [vmem:[#allocation86_spill] sm:$0xff] }
 0x262   : > { %v2066_v44 = vsel %vm2045_vm8, %v2033_v57, %v1665_v51  ;;  %v2065_v61 = vsel %vm2045_vm8, %v2032_v14, %v1663_v23  ;;  %v1937_v51 = vsel %vm1913_vm4, %v1904_v16, %v8969_v46  ;;  %v1938_v14 = vsel %vm1913_vm4, %v1905_v56, %v8974_v35  ;;  %v8984_v32 = vld [vmem:[#allocation105_spill] sm:$0xff]  ;;  %v4987_v16 = vld [vmem:[#allocation2 + $0x140] sm:$0xff]  ;;  %v4989_v8 = vld [vmem:[#allocation2 + $0x158] sm:$0xff] }
 0x263   : > { %v1970_v3 = vsel %vm1946_vm5, %v1937_v51, %v8970_v62  ;;  %v1907_v15 = vsel %vm1880_vm2, %v1874_v11, %v8983_v20  ;;  %v8987_v46 = vld [vmem:[#allocation63_spill] sm:$0xff]  ;;  %v4988_v53 = vld [vmem:[#allocation2 + $0x150] sm:$0xff]  ;;  %v4990_v11 = vld [vmem:[#allocation2 + $0x168] sm:$0xff] }
 0x264   : > { %v2003_v13 = vsel %vm1979_vm6, %v1970_v3, %v8972_v36  ;;  %v1875_v51 = vsel %vm446_vm0, %v4987_v16, %v8987_v46  ;;  %v8989_v3 = vld [vmem:[#allocation110_spill] sm:$0xff]  ;;  %v8991_v29 = vld [vmem:[#allocation53_spill] sm:$0xff]  ;;  %v9001_v20 = vld [vmem:[#allocation56_spill] sm:$0xff] }
 0x265   : > { %v1793_v5 = vpop.permute.xlu0 %1792  ;;  %v1791_v12 = vpop.permute.xlu1 %1790  ;;  %v2036_v57 = vsel %vm2012_vm7, %v2003_v13, %v6735_v1  ;;  %v8990_v36 = vld [vmem:[#allocation58_spill] sm:$0xff] }
 0x266   : > { %v2099_v10 = vsel %vm2078_vm9, %v2066_v44, %v1793_v5  ;;  %v2098_v59 = vsel %vm2078_vm9, %v2065_v61, %v1791_v12  ;;  %v8975_v12 = vld [vmem:[#allocation40_spill] sm:$0xff]  ;;  %v1876_v13 = vsel %vm446_vm0, %v4988_v53, %v8990_v36 }
 0x267   : > { %4892 = vmatmul.mubr.msk.f32.gmra.mxu0 %vm2116_vm10, %v2098_v59  ;;  %v9009_v53 = vld [vmem:[#allocation112_spill] sm:$0xff] }
 0x268   : > { %4894 = vmatprep.mubr.msk.f32.mxu0 %vm2116_vm10, %v2099_v10  ;;  %v1971_v10 = vsel %vm1946_vm5, %v1938_v14, %v8975_v12  ;;  %v8993_v14 = vld [vmem:[#allocation127_spill] sm:$0xff] }
 0x269   : > { %v1669_v40 = vpop.permute.xlu0 %1668  ;;  %v1667_v4 = vpop.permute.xlu1 %1666  ;;  %v2004_v0 = vsel %vm1979_vm6, %v1971_v10, %v8976_v6 }
 0x26a   : > { %v2068_v48 = vsel %vm2045_vm8, %v2035_v31, %v1669_v40  ;;  %v2067_v60 = vsel %vm2045_vm8, %v2034_v2, %v1667_v4  ;;  %v8980_v4 = vld [vmem:[#allocation49_spill] sm:$0xff]  ;;  %v1940_v31 = vsel %vm1913_vm4, %v1907_v15, %v8984_v32 }
 0x26b   : > { %v1972_v47 = vsel %vm1946_vm5, %v1939_v17, %v8980_v4  ;;  %v1877_v17 = vsel %vm446_vm0, %v4989_v8, %v8997_v39 }
 0x26c   : > { %v2005_v22 = vsel %vm1979_vm6, %v1972_v47, %v8982_v54  ;;  %v8999_v47 = vld [vmem:[#allocation111_spill] sm:$0xff]  ;;  %v9000_v54 = vld [vmem:[#allocation62_spill] sm:$0xff] }
 0x26d   : > { %v1797_v24 = vpop.permute.xlu0 %1796  ;;  %v1795_v49 = vpop.permute.xlu1 %1794 }
 0x26e   : > { %v2101_v58 = vsel %vm2078_vm9, %v2068_v48, %v1797_v24  ;;  %v2100_v26 = vsel %vm2078_vm9, %v2067_v60, %v1795_v49  ;;  %v8985_v48 = vld [vmem:[#allocation44_spill] sm:$0xff]  ;;  %v8986_v49 = vld [vmem:[#allocation122_spill] sm:$0xff] }
 0x26f   : > { %4895 = vmatmul.mubr.msk.f32.gmra.mxu0 %vm2116_vm10, %v2100_v26  ;;  %v1973_v60 = vsel %vm1946_vm5, %v1940_v31, %v8985_v48  ;;  %v9003_v31 = vld [vmem:[#allocation128_spill] sm:$0xff] }
 0x270   : > { %4897 = vmatprep.mubr.msk.f32.mxu0 %vm2116_vm10, %v2101_v58  ;;  %v2006_v58 = vsel %vm1979_vm6, %v1973_v60, %v8986_v49 }
 0x271   : > { %v1545_v23 = vpop.permute.xlu0 %1544  ;;  %v1671_v34 = vpop.permute.xlu1 %1670 }
 0x272   : > { %v2069_v44 = vsel %vm2045_vm8, %v2036_v57, %v1671_v34  ;;  %v2037_v28 = vsel %vm2012_vm7, %v2004_v0, %v1545_v23  ;;  %v8988_v23 = vld [vmem:[#allocation91_spill] sm:$0xff]  ;;  %v8992_v57 = vld [vmem:[#allocation88_spill] sm:$0xff] }
 0x273   : > { %v1908_v34 = vsel %vm1880_vm2, %v1875_v51, %v8988_v23  ;;  %v1909_v35 = vsel %vm1880_vm2, %v1876_v13, %v8992_v57  ;;  %v9011_v57 = vld [vmem:[#allocation129_spill] sm:$0xff] }
 0x274   : > { %v1941_v27 = vsel %vm1913_vm4, %v1908_v34, %v8989_v3  ;;  %v4991_v34 = vld [vmem:[#allocation2 + $0x170] sm:$0xff] }
 0x275   : > { %v1673_v61 = vpop.permute.xlu0 %1672  ;;  %v1799_v5 = vpop.permute.xlu1 %1798  ;;  %v1974_v56 = vsel %vm1946_vm5, %v1941_v27, %v8991_v29  ;;  %v9008_v27 = vld [vmem:[#allocation92_spill] sm:$0xff]  ;;  %v9010_v29 = vld [vmem:[#allocation57_spill] sm:$0xff] }
 0x276   : > { %v2102_v59 = vsel %vm2078_vm9, %v2069_v44, %v1799_v5  ;;  %v2070_v1 = vsel %vm2045_vm8, %v2037_v28, %v1673_v61  ;;  %v2007_v44 = vsel %vm1979_vm6, %v1974_v56, %v8993_v14  ;;  %v8994_v61 = vld [vmem:[#allocation107_spill] sm:$0xff] }
 0x277   : > { %4898 = vmatmul.mubr.msk.f32.gmra.mxu0 %vm2116_vm10, %v2102_v59  ;;  %v1942_v5 = vsel %vm1913_vm4, %v1909_v35, %v8994_v61  ;;  %v8995_v59 = vld [vmem:[#allocation48_spill] sm:$0xff] }
 0x278   : > { %v1975_v6 = vsel %vm1946_vm5, %v1942_v5, %v8995_v59  ;;  %v7262_v59 = vld [vmem:[%s8580_s7] ss:$0 sm:$0xff] }
 0x279   : > { %v1801_v41 = vpop.permute.xlu0 %1800  ;;  %v1547_v52 = vpop.permute.xlu1 %1546 }
 0x27a   : > { %v2103_v25 = vsel %vm2078_vm9, %v2070_v1, %v1801_v41  ;;  %v2038_v21 = vsel %vm2012_vm7, %v2005_v22, %v1547_v52  ;;  %v8996_v1 = vld [vmem:[#allocation124_spill] sm:$0xff]  ;;  %v1878_v22 = vsel %vm446_vm0, %v4990_v11, %v9000_v54 }
 0x27b   : > { %4900 = vmatprep.mubr.msk.f32.mxu0 %vm2116_vm10, %v2103_v25  ;;  %v2008_v41 = vsel %vm1979_vm6, %v1975_v6, %v8996_v1 }
 0x27d   : > { %v1549_v18 = vpop.permute.xlu0 %1548  ;;  %v1675_v40 = vpop.permute.xlu1 %1674 }
 0x27e   : > { %v2071_v50 = vsel %vm2045_vm8, %v2038_v21, %v1675_v40  ;;  %v2039_v26 = vsel %vm2012_vm7, %v2006_v58, %v1549_v18  ;;  %v8998_v18 = vld [vmem:[#allocation7_spill] sm:$0xff]  ;;  %v9002_v21 = vld [vmem:[#allocation90_spill] sm:$0xff] }
 0x27f   : > { %v1910_v40 = vsel %vm1880_vm2, %v1877_v17, %v8998_v18  ;;  %v1911_v32 = vsel %vm1880_vm2, %v1878_v22, %v9002_v21 }
 0x280   : > { %v1943_v7 = vsel %vm1913_vm4, %v1910_v40, %v8999_v47 }
 0x281   : > { %v1677_v2 = vpop.permute.xlu0 %1676  ;;  %v1803_v33 = vpop.permute.xlu1 %1802  ;;  %v1976_v15 = vsel %vm1946_vm5, %v1943_v7, %v9001_v20 }
 0x282   : > { %v2104_v24 = vsel %vm2078_vm9, %v2071_v50, %v1803_v33  ;;  %v2072_v9 = vsel %vm2045_vm8, %v2039_v26, %v1677_v2  ;;  %v2009_v50 = vsel %vm1979_vm6, %v1976_v15, %v9003_v31  ;;  %v9004_v2 = vld [vmem:[#allocation109_spill] sm:$0xff] }
 0x283   : > { %4901 = vmatmul.mubr.msk.f32.gmra.mxu0 %vm2116_vm10, %v2104_v24  ;;  %v1944_v33 = vsel %vm1913_vm4, %v1911_v32, %v9004_v2  ;;  %v9005_v24 = vld [vmem:[#allocation52_spill] sm:$0xff] }
 0x284   : > { %v1977_v49 = vsel %vm1946_vm5, %v1944_v33, %v9005_v24 }
 0x285   : > { %v1805_v45 = vpop.permute.xlu0 %1804  ;;  %v1551_v63 = vpop.permute.xlu1 %1550 }
 0x286   : > { %v2105_v42 = vsel %vm2078_vm9, %v2072_v9, %v1805_v45  ;;  %v2040_v12 = vsel %vm2012_vm7, %v2007_v44, %v1551_v63  ;;  %v9006_v9 = vld [vmem:[#allocation126_spill] sm:$0xff] }
 0x287   : > { %4903 = vmatprep.mubr.msk.f32.mxu0 %vm2116_vm10, %v2105_v42  ;;  %v2010_v45 = vsel %vm1979_vm6, %v1977_v49, %v9006_v9 }
 0x289   : > { %v1553_v62 = vpop.permute.xlu0 %1552 }
 0x28a   : > { %v1679_v37 = vpop.permute.xlu1 %1678  ;;  %v2041_v25 = vsel %vm2012_vm7, %v2008_v41, %v1553_v62  ;;  %v9007_v62 = vld [vmem:[#allocation70_spill] sm:$0xff] }
 0x28b   : > { %v2073_v0 = vsel %vm2045_vm8, %v2040_v12, %v1679_v37  ;;  %v1879_v3 = vsel %vm446_vm0, %v4991_v34, %v9007_v62  ;;  %v7257_v12 = vld [vmem:[%s8579_s6] ss:$0 sm:$0xff] }
 0x28c   : > { %v1912_v37 = vsel %vm1880_vm2, %v1879_v3, %v9008_v27 }
 0x28d   : > { %v1681_v10 = vpop.permute.xlu0 %1680  ;;  %v1945_v36 = vsel %vm1913_vm4, %v1912_v37, %v9009_v53 }
 0x28e   : > { %v1807_v28 = vpop.permute.xlu1 %1806  ;;  %v2074_v19 = vsel %vm2045_vm8, %v2041_v25, %v1681_v10  ;;  %v1978_v56 = vsel %vm1946_vm5, %v1945_v36, %v9010_v29 }
 0x28f   : > { %v2106_v52 = vsel %vm2078_vm9, %v2073_v0, %v1807_v28  ;;  %v2011_v35 = vsel %vm1979_vm6, %v1978_v56, %v9011_v57 }
 0x290   : > { %4904 = vmatmul.mubr.msk.f32.gmra.mxu0 %vm2116_vm10, %v2106_v52 }
 0x291   : > { %v1809_v43 = vpop.permute.xlu0 %1808 }
 0x292   : > { %v2107_v38 = vsel %vm2078_vm9, %v2074_v19, %v1809_v43  ;;  %v1555_v30 = vpop.permute.xlu1 %1554 }
 0x293   : > { %4906 = vmatprep.mubr.msk.f32.mxu0 %vm2116_vm10, %v2107_v38  ;;  %v2042_v48 = vsel %vm2012_vm7, %v2009_v50, %v1555_v30 }
 0x295   : > { %v1557_v4 = vpop.permute.xlu0 %1556 }
 0x296   : > { %v1683_v55 = vpop.permute.xlu1 %1682  ;;  %v2043_v42 = vsel %vm2012_vm7, %v2010_v45, %v1557_v4 }
 0x297   : > { %v2075_v58 = vsel %vm2045_vm8, %v2042_v48, %v1683_v55 }
 0x299   : > { %v1685_v60 = vpop.permute.xlu0 %1684 }
 0x29a   : > { %v1811_v26 = vpop.permute.xlu1 %1810  ;;  %v2076_v16 = vsel %vm2045_vm8, %v2043_v42, %v1685_v60 }
 0x29b   : > { %v2108_v63 = vsel %vm2078_vm9, %v2075_v58, %v1811_v26 }
 0x29c   : > { %4907 = vmatmul.mubr.msk.f32.gmra.mxu0 %vm2116_vm10, %v2108_v63 }
 0x29d   : > { %v1813_v46 = vpop.permute.xlu0 %1812 }
 0x29e   : > { %v2109_v51 = vsel %vm2078_vm9, %v2076_v16, %v1813_v46  ;;  %v1559_v23 = vpop.permute.xlu1 %1558 }
 0x29f   : > { %4909 = vmatprep.mubr.msk.f32.mxu0 %vm2116_vm10, %v2109_v51  ;;  %v2044_v14 = vsel %vm2012_vm7, %v2011_v35, %v1559_v23 }
 0x2a2   : > { %v1687_v13 = vpop.permute.xlu1 %1686 }
 0x2a3   : > { %v2077_v44 = vsel %vm2045_vm8, %v2044_v14, %v1687_v13 }
 0x2a6   : > { %v1815_v61 = vpop.permute.xlu1 %1814 }
 0x2a7   : > { %v2110_v5 = vsel %vm2078_vm9, %v2077_v44, %v1815_v61 }
 0x2a8   : > { %4910 = vmatmul.mubr.msk.f32.gmra.mxu0 %vm2116_vm10, %v2110_v5 }
 0x2df   : > { %v4866_v10 = vpop.f32.mrf.mxu0 }
 0x2e0   : > { %v2450_v6 = vmul.f32 %v4866_v10, %v7257_v12 }
 0x2e1   : > { %v2283_v0 = vpop.f32.mrf.mxu0 }
 0x2e2   : > { %v2489_v28 = vadd.f32 %v7262_v59, %v2450_v6  ;;  %v2449_v1 = vmul.f32 %v7257_v12, %v2283_v0 }
 0x2e4   : > { %v2521_v41 = vmax.f32 %v2489_v28, 0.0  ;;  %v2488_v52 = vadd.f32 %v7262_v59, %v2449_v1 }
 0x2e6   : > { %2609 = vst.msk [vmem:[#allocation3 + $0x21] sm:$0xff] %vm1880_vm2, %v2521_v41  ;;  %v2520_v25 = vmax.f32 %v2488_v52, 0.0 }
 0x2e7   : > { %v4869_v19 = vpop.f32.mrf.mxu0 }
 0x2e8   : > { %2608 = vst.msk [vmem:[#allocation3 + $0x19] sm:$0xff] %vm1880_vm2, %v2520_v25  ;;  %v2452_v43 = vmul.f32 %v4869_v19, %v7257_v12 }
 0x2e9   : > { %v2293_v38 = vpop.f32.mrf.mxu0 }
 0x2ea   : > { %v2491_v30 = vadd.f32 %v7262_v59, %v2452_v43  ;;  %v2451_v8 = vmul.f32 %v7257_v12, %v2293_v38 }
 0x2ec   : > { %v2523_v39 = vmax.f32 %v2491_v30, 0.0  ;;  %v2490_v17 = vadd.f32 %v7262_v59, %v2451_v8 }
 0x2ed   : > { %v2675_v18 = vld [vmem:[#allocation3 + $0x21] sm:$0xff] }
 0x2ee   : > { %2611 = vst.msk [vmem:[#allocation3 + $0x39] sm:$0xff] %vm1880_vm2, %v2523_v39  ;;  %v2522_v40 = vmax.f32 %v2490_v17, 0.0  ;;  %2967 = vrot.lane.b32.xlu1 %v2675_v18, %s5071_s10 }
 0x2ef   : > { %v4872_v4 = vpop.f32.mrf.mxu0  ;;  %v2674_v47 = vld [vmem:[#allocation3 + $0x19] sm:$0xff] }
 0x2f0   : > { %2610 = vst.msk [vmem:[#allocation3 + $0x31] sm:$0xff] %vm1880_vm2, %v2522_v40  ;;  %v2454_v7 = vmul.f32 %v4872_v4, %v7257_v12  ;;  %2965 = vrot.lane.b32.xlu0 %v2674_v47, %s5071_s10 }
 0x2f1   : > { %v2303_v55 = vpop.f32.mrf.mxu0 }
 0x2f2   : > { %v2493_v11 = vadd.f32 %v7262_v59, %v2454_v7  ;;  %v2453_v54 = vmul.f32 %v7257_v12, %v2303_v55 }
 0x2f4   : > { %v2525_v22 = vmax.f32 %v2493_v11, 0.0  ;;  %v2492_v20 = vadd.f32 %v7262_v59, %v2453_v54 }
 0x2f5   : > { %v2677_v15 = vld [vmem:[#allocation3 + $0x39] sm:$0xff] }
 0x2f6   : > { %2613 = vst.msk [vmem:[#allocation3 + $0x51] sm:$0xff] %vm1880_vm2, %v2525_v22  ;;  %v2524_v21 = vmax.f32 %v2492_v20, 0.0  ;;  %2971 = vrot.lane.b32.xlu1 %v2677_v15, %s5071_s10 }
 0x2f7   : > { %v4875_v32 = vpop.f32.mrf.mxu0  ;;  %v2676_v31 = vld [vmem:[#allocation3 + $0x31] sm:$0xff] }
 0x2f8   : > { %2612 = vst.msk [vmem:[#allocation3 + $0x49] sm:$0xff] %vm1880_vm2, %v2524_v21  ;;  %v2456_v50 = vmul.f32 %v4875_v32, %v7257_v12  ;;  %2969 = vrot.lane.b32.xlu0 %v2676_v31, %s5071_s10 }
 0x2f9   : > { %v2313_v2 = vpop.f32.mrf.mxu0 }
 0x2fa   : > { %v2495_v33 = vadd.f32 %v7262_v59, %v2456_v50  ;;  %v2455_v48 = vmul.f32 %v7257_v12, %v2313_v2 }
 0x2fc   : > { %v2527_v60 = vmax.f32 %v2495_v33, 0.0  ;;  %v2494_v24 = vadd.f32 %v7262_v59, %v2455_v48 }
 0x2fd   : > { %v2679_v49 = vld [vmem:[#allocation3 + $0x51] sm:$0xff] }
 0x2fe   : > { %2615 = vst.msk [vmem:[#allocation3 + $0x69] sm:$0xff] %vm1880_vm2, %v2527_v60  ;;  %v2526_v58 = vmax.f32 %v2494_v24, 0.0  ;;  %2975 = vrot.lane.b32.xlu1 %v2679_v49, %s5071_s10 }
 0x2ff   : > { %v4878_v26 = vpop.f32.mrf.mxu0  ;;  %v2678_v9 = vld [vmem:[#allocation3 + $0x49] sm:$0xff] }
 0x300   : > { %2614 = vst.msk [vmem:[#allocation3 + $0x61] sm:$0xff] %vm1880_vm2, %v2526_v58  ;;  %v2458_v45 = vmul.f32 %v4878_v26, %v7257_v12  ;;  %2973 = vrot.lane.b32.xlu0 %v2678_v9, %s5071_s10 }
 0x301   : > { %v2323_v63 = vpop.f32.mrf.mxu0 }
 0x302   : > { %v2497_v42 = vadd.f32 %v7262_v59, %v2458_v45  ;;  %v2457_v16 = vmul.f32 %v7257_v12, %v2323_v63 }
 0x304   : > { %v2529_v46 = vmax.f32 %v2497_v42, 0.0  ;;  %v2496_v51 = vadd.f32 %v7262_v59, %v2457_v16 }
 0x305   : > { %v2681_v23 = vld [vmem:[#allocation3 + $0x69] sm:$0xff] }
 0x306   : > { %2617 = vst.msk [vmem:[#allocation3 + $0x81] sm:$0xff] %vm1880_vm2, %v2529_v46  ;;  %v2528_v34 = vmax.f32 %v2496_v51, 0.0  ;;  %2979 = vrot.lane.b32.xlu1 %v2681_v23, %s5071_s10 }
 0x307   : > { %v4881_v62 = vpop.f32.mrf.mxu0  ;;  %v2680_v3 = vld [vmem:[#allocation3 + $0x61] sm:$0xff] }
 0x308   : > { %2616 = vst.msk [vmem:[#allocation3 + $0x79] sm:$0xff] %vm1880_vm2, %v2528_v34  ;;  %v2460_v27 = vmul.f32 %v4881_v62, %v7257_v12  ;;  %2977 = vrot.lane.b32.xlu0 %v2680_v3, %s5071_s10 }
 0x309   : > { %v2333_v37 = vpop.f32.mrf.mxu0 }
 0x30a   : > { %v2499_v53 = vadd.f32 %v7262_v59, %v2460_v27  ;;  %v2459_v36 = vmul.f32 %v7257_v12, %v2333_v37 }
 0x30c   : > { %v2531_v13 = vmax.f32 %v2499_v53, 0.0  ;;  %v2498_v29 = vadd.f32 %v7262_v59, %v2459_v36 }
 0x30d   : > { %v2683_v56 = vld [vmem:[#allocation3 + $0x81] sm:$0xff] }
 0x30e   : > { %2619 = vst.msk [vmem:[#allocation3 + $0x99] sm:$0xff] %vm1880_vm2, %v2531_v13  ;;  %v2530_v57 = vmax.f32 %v2498_v29, 0.0  ;;  %2983 = vrot.lane.b32.xlu1 %v2683_v56, %s5071_s10 }
 0x30f   : > { %v4884_v35 = vpop.f32.mrf.mxu0  ;;  %v2682_v14 = vld [vmem:[#allocation3 + $0x79] sm:$0xff] }
 0x310   : > { %2618 = vst.msk [vmem:[#allocation3 + $0x91] sm:$0xff] %vm1880_vm2, %v2530_v57  ;;  %v2462_v44 = vmul.f32 %v4884_v35, %v7257_v12  ;;  %2981 = vrot.lane.b32.xlu0 %v2682_v14, %s5071_s10 }
 0x311   : > { %v2343_v61 = vpop.f32.mrf.mxu0 }
 0x312   : > { %v2501_v5 = vadd.f32 %v7262_v59, %v2462_v44  ;;  %v2461_v10 = vmul.f32 %v7257_v12, %v2343_v61 }
 0x314   : > { %v2533_v6 = vmax.f32 %v2501_v5, 0.0  ;;  %v2500_v0 = vadd.f32 %v7262_v59, %v2461_v10 }
 0x315   : > { %v2685_v28 = vld [vmem:[#allocation3 + $0x99] sm:$0xff] }
 0x316   : > { %2621 = vst.msk [vmem:[#allocation3 + $0xb1] sm:$0xff] %vm1880_vm2, %v2533_v6  ;;  %v2532_v1 = vmax.f32 %v2500_v0, 0.0  ;;  %2987 = vrot.lane.b32.xlu1 %v2685_v28, %s5071_s10 }
 0x317   : > { %v4887_v41 = vpop.f32.mrf.mxu0  ;;  %v2684_v52 = vld [vmem:[#allocation3 + $0x91] sm:$0xff] }
 0x318   : > { %2620 = vst.msk [vmem:[#allocation3 + $0xa9] sm:$0xff] %vm1880_vm2, %v2532_v1  ;;  %v2464_v25 = vmul.f32 %v4887_v41, %v7257_v12  ;;  %2985 = vrot.lane.b32.xlu0 %v2684_v52, %s5071_s10 }
 0x319   : > { %v2353_v19 = vpop.f32.mrf.mxu0 }
 0x31a   : > { %v2503_v43 = vadd.f32 %v7262_v59, %v2464_v25  ;;  %v2463_v38 = vmul.f32 %v7257_v12, %v2353_v19 }
 0x31c   : > { %v2535_v30 = vmax.f32 %v2503_v43, 0.0  ;;  %v2502_v8 = vadd.f32 %v7262_v59, %v2463_v38 }
 0x31d   : > { %v7322_v39 = vld [vmem:[#allocation3 + $0xb1] sm:$0xff] }
 0x31e   : > { %2623 = vst.msk [vmem:[#allocation3 + $0xc9] sm:$0xff] %vm1880_vm2, %v2535_v30  ;;  %v2534_v17 = vmax.f32 %v2502_v8, 0.0  ;;  %2991 = vrot.lane.b32.xlu1 %v7322_v39, %s5071_s10 }
 0x31f   : > { %v4890_v18 = vpop.f32.mrf.mxu0  ;;  %v7327_v40 = vld [vmem:[#allocation3 + $0xa9] sm:$0xff] }
 0x320   : > { %2622 = vst.msk [vmem:[#allocation3 + $0xc1] sm:$0xff] %vm1880_vm2, %v2534_v17  ;;  %v2466_v4 = vmul.f32 %v4890_v18, %v7257_v12  ;;  %2989 = vrot.lane.b32.xlu0 %v7327_v40, %s5071_s10 }
 0x321   : > { %v2363_v47 = vpop.f32.mrf.mxu0 }
 0x322   : > { %v2505_v7 = vadd.f32 %v7262_v59, %v2466_v4  ;;  %v2465_v55 = vmul.f32 %v7257_v12, %v2363_v47 }
 0x324   : > { %v2537_v11 = vmax.f32 %v2505_v7, 0.0  ;;  %v2504_v54 = vadd.f32 %v7262_v59, %v2465_v55 }
 0x325   : > { %v7336_v22 = vld [vmem:[#allocation3 + $0xc9] sm:$0xff] }
 0x326   : > { %2625 = vst.msk [vmem:[#allocation3 + $0xe1] sm:$0xff] %vm1880_vm2, %v2537_v11  ;;  %v2536_v20 = vmax.f32 %v2504_v54, 0.0  ;;  %2995 = vrot.lane.b32.xlu1 %v7336_v22, %s5071_s10 }
 0x327   : > { %v4893_v15 = vpop.f32.mrf.mxu0  ;;  %v7341_v21 = vld [vmem:[#allocation3 + $0xc1] sm:$0xff] }
 0x328   : > { %2624 = vst.msk [vmem:[#allocation3 + $0xd9] sm:$0xff] %vm1880_vm2, %v2536_v20  ;;  %v2468_v32 = vmul.f32 %v4893_v15, %v7257_v12  ;;  %2993 = vrot.lane.b32.xlu0 %v7341_v21, %s5071_s10 }
 0x329   : > { %v2373_v31 = vpop.f32.mrf.mxu0 }
 0x32a   : > { %v2507_v50 = vadd.f32 %v7262_v59, %v2468_v32  ;;  %v2467_v2 = vmul.f32 %v7257_v12, %v2373_v31 }
 0x32c   : > { %v2539_v33 = vmax.f32 %v2507_v50, 0.0  ;;  %v2506_v48 = vadd.f32 %v7262_v59, %v2467_v2 }
 0x32d   : > { %v7350_v60 = vld [vmem:[#allocation3 + $0xe1] sm:$0xff] }
 0x32e   : > { %2627 = vst.msk [vmem:[#allocation3 + $0xf9] sm:$0xff] %vm1880_vm2, %v2539_v33  ;;  %v2538_v24 = vmax.f32 %v2506_v48, 0.0  ;;  %2999 = vrot.lane.b32.xlu1 %v7350_v60, %s5071_s10 }
 0x32f   : > { %v4896_v49 = vpop.f32.mrf.mxu0  ;;  %v7355_v58 = vld [vmem:[#allocation3 + $0xd9] sm:$0xff] }
 0x330   : > { %2626 = vst.msk [vmem:[#allocation3 + $0xf1] sm:$0xff] %vm1880_vm2, %v2538_v24  ;;  %v2470_v26 = vmul.f32 %v4896_v49, %v7257_v12  ;;  %2997 = vrot.lane.b32.xlu0 %v7355_v58, %s5071_s10 }
 0x331   : > { %v2383_v9 = vpop.f32.mrf.mxu0 }
 0x332   : > { %v2509_v45 = vadd.f32 %v7262_v59, %v2470_v26  ;;  %v2469_v63 = vmul.f32 %v7257_v12, %v2383_v9  ;;  %v2705_v26 = vld [vmem:[#allocation3 + $0xa] sm:$0xff] }
 0x334   : > { %v2541_v42 = vmax.f32 %v2509_v45, 0.0  ;;  %v2508_v16 = vadd.f32 %v7262_v59, %v2469_v63  ;;  %v2704_v63 = vld [vmem:[#allocation3 + $0x2] sm:$0xff] }
 0x335   : > { %v2693_v46 = vld [vmem:[#allocation3 + $0xf9] sm:$0xff] }
 0x336   : > { %2629 = vst.msk [vmem:[#allocation3 + $0x111] sm:$0xff] %vm1880_vm2, %v2541_v42  ;;  %v2540_v51 = vmax.f32 %v2508_v16, 0.0  ;;  %3003 = vrot.lane.b32.xlu1 %v2693_v46, %s5071_s10  ;;  %v2706_v16 = vld [vmem:[#allocation3 + $0x1a] sm:$0xff]  ;;  %v2708_v46 = vld [vmem:[#allocation3 + $0x32] sm:$0xff] }
 0x337   : > { %v4899_v23 = vpop.f32.mrf.mxu0  ;;  %v2692_v34 = vld [vmem:[#allocation3 + $0xf1] sm:$0xff] }
 0x338   : > { %2628 = vst.msk [vmem:[#allocation3 + $0x109] sm:$0xff] %vm1880_vm2, %v2540_v51  ;;  %v2472_v62 = vmul.f32 %v4899_v23, %v7257_v12  ;;  %3001 = vrot.lane.b32.xlu0 %v2692_v34, %s5071_s10  ;;  %v2711_v51 = vld [vmem:[#allocation3 + $0x52] sm:$0xff]  ;;  %v2710_v23 = vld [vmem:[#allocation3 + $0x4a] sm:$0xff] }
 0x339   : > { %v2393_v3 = vpop.f32.mrf.mxu0  ;;  %v2713_v34 = vld [vmem:[#allocation3 + $0x6a] sm:$0xff] }
 0x33a   : > { %v2511_v27 = vadd.f32 %v7262_v59, %v2472_v62  ;;  %v2471_v37 = vmul.f32 %v7257_v12, %v2393_v3  ;;  %v2712_v62 = vld [vmem:[#allocation3 + $0x62] sm:$0xff] }
 0x33b   : > { %v7433_v3 = vld [vmem:[#allocation3 + $0x82] sm:$0xff] }
 0x33c   : > { %v2543_v53 = vmax.f32 %v2511_v27, 0.0  ;;  %v2510_v36 = vadd.f32 %v7262_v59, %v2471_v37  ;;  %v7437_v27 = vld [vmem:[#allocation3 + $0x7a] sm:$0xff] }
 0x33d   : > { %v2695_v13 = vld [vmem:[#allocation3 + $0x111] sm:$0xff]  ;;  %v7441_v37 = vld [vmem:[#allocation3 + $0x9a] sm:$0xff] }
 0x33e   : > { %2631 = vst.msk [vmem:[#allocation3 + $0x129] sm:$0xff] %vm1880_vm2, %v2543_v53  ;;  %v2542_v29 = vmax.f32 %v2510_v36, 0.0  ;;  %3007 = vrot.lane.b32.xlu1 %v2695_v13, %s5071_s10  ;;  %v7445_v53 = vld [vmem:[#allocation3 + $0x92] sm:$0xff]  ;;  %v7453_v13 = vld [vmem:[#allocation3 + $0xaa] sm:$0xff] }
 0x33f   : > { %v2694_v56 = vld [vmem:[#allocation3 + $0x109] sm:$0xff]  ;;  %v7449_v36 = vld [vmem:[#allocation3 + $0xb2] sm:$0xff] }
 0x340   : > { %2630 = vst.msk [vmem:[#allocation3 + $0x121] sm:$0xff] %vm1880_vm2, %v2542_v29  ;;  %3005 = vrot.lane.b32.xlu0 %v2694_v56, %s5071_s10  ;;  %v7457_v29 = vld [vmem:[#allocation3 + $0xca] sm:$0xff]  ;;  %v7461_v56 = vld [vmem:[#allocation3 + $0xc2] sm:$0xff] }
 0x343   : > { %v4902_v57 = vpop.f32.mrf.mxu0 }
 0x344   : > { %v2474_v35 = vmul.f32 %v4902_v57, %v7257_v12  ;;  %v7465_v57 = vld [vmem:[#allocation3 + $0xe2] sm:$0xff] }
 0x345   : > { %v2403_v14 = vpop.f32.mrf.mxu0  ;;  %v2697_v44 = vld [vmem:[#allocation3 + $0x129] sm:$0xff] }
 0x346   : > { %v2513_v61 = vadd.f32 %v7262_v59, %v2474_v35  ;;  %v2473_v5 = vmul.f32 %v7257_v12, %v2403_v14  ;;  %3011 = vrot.lane.b32.xlu1 %v2697_v44, %s5071_s10  ;;  %v7469_v35 = vld [vmem:[#allocation3 + $0xda] sm:$0xff]  ;;  %v2724_v44 = vld [vmem:[#allocation3 + $0xf2] sm:$0xff] }
 0x347   : > { %v2696_v10 = vld [vmem:[#allocation3 + $0x121] sm:$0xff] }
 0x348   : > { %v2545_v6 = vmax.f32 %v2513_v61, 0.0  ;;  %v2512_v0 = vadd.f32 %v7262_v59, %v2473_v5  ;;  %3009 = vrot.lane.b32.xlu0 %v2696_v10, %s5071_s10  ;;  %v2725_v14 = vld [vmem:[#allocation3 + $0xfa] sm:$0xff]  ;;  %v2727_v61 = vld [vmem:[#allocation3 + $0x112] sm:$0xff]  ;;  %v2726_v5 = vld [vmem:[#allocation3 + $0x10a] sm:$0xff] }
 0x349   : > { %v7477_v10 = vld [vmem:[#allocation3 + $0x12a] sm:$0xff] }
 0x34a   : > { %2633 = vst.msk [vmem:[#allocation3 + $0x141] sm:$0xff] %vm1880_vm2, %v2545_v6  ;;  %v2544_v28 = vmax.f32 %v2512_v0, 0.0  ;;  %v7479_v6 = vpop.permute.xlu1 %2963  ;;  %v7483_v0 = vld [vmem:[#allocation3 + $0x122] sm:$0xff] }
 0x34b   : > { %9012 = vst [vmem:[#allocation66_spill] sm:$0xff] %v7479_v6 }
 0x34c   : > { %2632 = vst.msk [vmem:[#allocation3 + $0x139] sm:$0xff] %vm1880_vm2, %v2544_v28  ;;  %v7485_v28 = vpop.permute.xlu0 %2961 }
 0x34d   : > { %9013 = vst [vmem:[#allocation10_spill] sm:$0xff] %v7485_v28  ;;  %v2661_v28 = vld [vmem:[#allocation3 + $0xf8] sm:$0xff] }
 0x350   : > { %v4905_v1 = vpop.f32.mrf.mxu0 }
 0x351   : > { %v2476_v41 = vmul.f32 %v4905_v1, %v7257_v12  ;;  %v7385_v52 = vld [vmem:[#allocation3 + $0x141] sm:$0xff] }
 0x352   : > { %v2413_v25 = vpop.f32.mrf.mxu0  ;;  %3015 = vrot.lane.b32.xlu1 %v7385_v52, %s5071_s10  ;;  %v7489_v1 = vld [vmem:[#allocation3 + $0x142] sm:$0xff] }
 0x353   : > { %v2515_v19 = vadd.f32 %v7262_v59, %v2476_v41  ;;  %v2475_v43 = vmul.f32 %v7257_v12, %v2413_v25  ;;  %v2698_v38 = vld [vmem:[#allocation3 + $0x139] sm:$0xff] }
 0x354   : > { %3013 = vrot.lane.b32.xlu0 %v2698_v38, %s5071_s10  ;;  %v7493_v41 = vld [vmem:[#allocation3 + $0x13a] sm:$0xff] }
 0x355   : > { %v2547_v30 = vmax.f32 %v2515_v19, 0.0  ;;  %v2514_v8 = vadd.f32 %v7262_v59, %v2475_v43 }
 0x357   : > { %2635 = vst.msk [vmem:[#allocation3 + $0x159] sm:$0xff] %vm1880_vm2, %v2547_v30  ;;  %v2546_v17 = vmax.f32 %v2514_v8, 0.0 }
 0x359   : > { %2634 = vst.msk [vmem:[#allocation3 + $0x151] sm:$0xff] %vm1880_vm2, %v2546_v17 }
 0x35c   : > { %v4908_v18 = vpop.f32.mrf.mxu0 }
 0x35d   : > { %v2478_v4 = vmul.f32 %v4908_v18, %v7257_v12 }
 0x35e   : > { %v2423_v47 = vpop.f32.mrf.mxu0  ;;  %v7396_v7 = vld [vmem:[#allocation3 + $0x159] sm:$0xff] }
 0x35f   : > { %v2517_v55 = vadd.f32 %v7262_v59, %v2478_v4  ;;  %v2477_v11 = vmul.f32 %v7257_v12, %v2423_v47  ;;  %3019 = vrot.lane.b32.xlu1 %v7396_v7, %s5071_s10  ;;  %v7499_v19 = vld [vmem:[#allocation3 + $0x15a] sm:$0xff] }
 0x360   : > { %v7402_v54 = vld [vmem:[#allocation3 + $0x151] sm:$0xff]  ;;  %v7495_v25 = vpop.permute.xlu1 %2967  ;;  %v2643_v47 = vld [vmem:[#allocation3 + $0x20] sm:$0xff] }
 0x361   : > { %v2549_v20 = vmax.f32 %v2517_v55, 0.0  ;;  %v2516_v15 = vadd.f32 %v7262_v59, %v2477_v11  ;;  %3017 = vrot.lane.b32.xlu0 %v7402_v54, %s5071_s10  ;;  %9014 = vst [vmem:[#allocation13_spill] sm:$0xff] %v7495_v25  ;;  %v7505_v38 = vld [vmem:[#allocation3 + $0x152] sm:$0xff] }
 0x362   : > { %v7501_v43 = vpop.permute.xlu0 %2965  ;;  %v2642_v11 = vld [vmem:[#allocation3 + $0x18] sm:$0xff] }
 0x363   : > { %2637 = vst.msk [vmem:[#allocation3 + $0x171] sm:$0xff] %vm1880_vm2, %v2549_v20  ;;  %v2548_v32 = vmax.f32 %v2516_v15, 0.0  ;;  %9015 = vst [vmem:[#allocation17_spill] sm:$0xff] %v7501_v43  ;;  %v2645_v15 = vld [vmem:[#allocation3 + $0x38] sm:$0xff] }
 0x365   : > { %2636 = vst.msk [vmem:[#allocation3 + $0x169] sm:$0xff] %vm1880_vm2, %v2548_v32 }
 0x368   : > { %v4911_v31 = vpop.f32.mrf.mxu0  ;;  %v7507_v30 = vpop.permute.xlu1 %2971 }
 0x369   : > { %v2480_v50 = vmul.f32 %v4911_v31, %v7257_v12  ;;  %9016 = vst [vmem:[#allocation69_spill] sm:$0xff] %v7507_v30  ;;  %v2644_v31 = vld [vmem:[#allocation3 + $0x30] sm:$0xff] }
 0x36a   : > { %v2433_v2 = vpop.f32.mrf.mxu0  ;;  %v7410_v33 = vld [vmem:[#allocation3 + $0x171] sm:$0xff]  ;;  %v7513_v17 = vpop.permute.xlu0 %2969 }
 0x36b   : > { %v2519_v48 = vadd.f32 %v7262_v59, %v2480_v50  ;;  %v2479_v24 = vmul.f32 %v7257_v12, %v2433_v2  ;;  %3023 = vrot.lane.b32.xlu1 %v7410_v33, %s5071_s10  ;;  %v2707_v12 = vld [vmem:[#allocation3 + $0x22] sm:$0xff]  ;;  %v7511_v8 = vld [vmem:[#allocation3 + $0x172] sm:$0xff]  ;;  %9017 = vst [vmem:[#allocation72_spill] sm:$0xff] %v7513_v17 }
 0x36c   : > { %v7416_v49 = vld [vmem:[#allocation3 + $0x169] sm:$0xff] }
 0x36d   : > { %v2551_v9 = vmax.f32 %v2519_v48, 0.0  ;;  %v2518_v45 = vadd.f32 %v7262_v59, %v2479_v24  ;;  %3021 = vrot.lane.b32.xlu0 %v7416_v49, %s5071_s10  ;;  %v2709_v59 = vld [vmem:[#allocation3 + $0x3a] sm:$0xff]  ;;  %v7517_v18 = vld [vmem:[#allocation3 + $0x16a] sm:$0xff]  ;;  %s5078_s10 = smov 40  }
 0x36e   : > { %v2647_v2 = vld [vmem:[#allocation3 + $0x50] sm:$0xff]  ;;  %v2646_v24 = vld [vmem:[#allocation3 + $0x48] sm:$0xff] }
 0x36f   : > { %2639 = vst.msk [vmem:[#allocation3 + $0x189] sm:$0xff] %vm1880_vm2, %v2551_v9  ;;  %v2550_v42 = vmax.f32 %v2518_v45, 0.0  ;;  %3091 = vrot.lane.b32.xlu1 %v2705_v26, %s5073_s13  ;;  %v7541_v9 = vld [vmem:[#allocation3 + $0x68] sm:$0xff] }
 0x370   : > { %v7519_v4 = vpop.permute.xlu1 %2975  ;;  %9024 = vst [vmem:[#allocation19_spill] sm:$0xff] %v7541_v9 }
 0x371   : > { %2638 = vst.msk [vmem:[#allocation3 + $0x181] sm:$0xff] %vm1880_vm2, %v2550_v42  ;;  %3089 = vrot.lane.b32.xlu0 %v2704_v63, %s5073_s13  ;;  %9018 = vst [vmem:[#allocation12_spill] sm:$0xff] %v7519_v4  ;;  %v2648_v63 = vld [vmem:[#allocation3 + $0x60] sm:$0xff] }
 0x372   : > { %v7523_v55 = vpop.permute.xlu0 %2973 }
 0x373   : > { %3095 = vrot.lane.b32.xlu1 %v2707_v12, %s5073_s13  ;;  %9019 = vst [vmem:[#allocation16_spill] sm:$0xff] %v7523_v55  ;;  %v7550_v12 = vld [vmem:[#allocation3 + $0x80] sm:$0xff] }
 0x374   : > { %9025 = vst [vmem:[#allocation23_spill] sm:$0xff] %v7550_v12 }
 0x375   : > { %3093 = vrot.lane.b32.xlu0 %v2706_v16, %s5073_s13 }
 0x377   : > { %3099 = vrot.lane.b32.xlu1 %v2709_v59, %s5073_s13  ;;  %v7556_v59 = vld [vmem:[#allocation3 + $0x78] sm:$0xff] }
 0x378   : > { %v7526_v20 = vpop.permute.xlu1 %2979  ;;  %9026 = vst [vmem:[#allocation22_spill] sm:$0xff] %v7556_v59 }
 0x379   : > { %3097 = vrot.lane.b32.xlu0 %v2708_v46, %s5073_s13  ;;  %9020 = vst [vmem:[#allocation25_spill] sm:$0xff] %v7526_v20 }
 0x37a   : > { %v7529_v32 = vpop.permute.xlu0 %2977 }
 0x37b   : > { %3103 = vrot.lane.b32.xlu1 %v2711_v51, %s5073_s13  ;;  %9021 = vst [vmem:[#allocation71_spill] sm:$0xff] %v7529_v32  ;;  %v7562_v51 = vld [vmem:[#allocation3 + $0x98] sm:$0xff] }
 0x37d   : > { %3101 = vrot.lane.b32.xlu0 %v2710_v23, %s5073_s13 }
 0x37f   : > { %3107 = vrot.lane.b32.xlu1 %v2713_v34, %s5073_s13  ;;  %v7568_v34 = vld [vmem:[#allocation3 + $0x90] sm:$0xff] }
 0x380   : > { %v7532_v50 = vpop.permute.xlu1 %2983 }
 0x381   : > { %3105 = vrot.lane.b32.xlu0 %v2712_v62, %s5073_s13  ;;  %9022 = vst [vmem:[#allocation15_spill] sm:$0xff] %v7532_v50 }
 0x382   : > { %v7535_v48 = vpop.permute.xlu0 %2981 }
 0x383   : > { %3111 = vrot.lane.b32.xlu1 %v7433_v3, %s5073_s13  ;;  %9023 = vst [vmem:[#allocation20_spill] sm:$0xff] %v7535_v48 }
 0x385   : > { %3109 = vrot.lane.b32.xlu0 %v7437_v27, %s5073_s13 }
 0x387   : > { %3115 = vrot.lane.b32.xlu1 %v7441_v37, %s5073_s13 }
 0x388   : > { %v7538_v26 = vpop.permute.xlu1 %2987 }
 0x389   : > { %3113 = vrot.lane.b32.xlu0 %v7445_v53, %s5073_s13 }
 0x38a   : > { %v7543_v45 = vpop.permute.xlu0 %2985 }
 0x38b   : > { %3119 = vrot.lane.b32.xlu1 %v7449_v36, %s5073_s13 }
 0x38d   : > { %3117 = vrot.lane.b32.xlu0 %v7453_v13, %s5073_s13 }
 0x38f   : > { %3123 = vrot.lane.b32.xlu1 %v7457_v29, %s5073_s13 }
 0x390   : > { %v7547_v42 = vpop.permute.xlu1 %2991 }
 0x391   : > { %3121 = vrot.lane.b32.xlu0 %v7461_v56, %s5073_s13 }
 0x392   : > { %v7552_v16 = vpop.permute.xlu0 %2989 }
 0x393   : > { %3127 = vrot.lane.b32.xlu1 %v7465_v57, %s5073_s13 }
 0x395   : > { %3125 = vrot.lane.b32.xlu0 %v7469_v35, %s5073_s13 }
 0x397   : > { %3131 = vrot.lane.b32.xlu1 %v2725_v14, %s5073_s13  ;;  %v7574_v14 = vld [vmem:[#allocation3 + $0xb0] sm:$0xff] }
 0x398   : > { %v7558_v46 = vpop.permute.xlu1 %2995 }
 0x399   : > { %3129 = vrot.lane.b32.xlu0 %v2724_v44, %s5073_s13  ;;  %9027 = vst [vmem:[#allocation27_spill] sm:$0xff] %v7558_v46  ;;  %v2660_v46 = vld [vmem:[#allocation3 + $0xf0] sm:$0xff] }
 0x39a   : > { %v7564_v23 = vpop.permute.xlu0 %2993 }
 0x39b   : > { %3135 = vrot.lane.b32.xlu1 %v2727_v61, %s5073_s13  ;;  %9028 = vst [vmem:[#allocation61_spill] sm:$0xff] %v7564_v23  ;;  %v7580_v61 = vld [vmem:[#allocation3 + $0xa8] sm:$0xff] }
 0x39d   : > { %3133 = vrot.lane.b32.xlu0 %v2726_v5, %s5073_s13 }
 0x39f   : > { %3139 = vrot.lane.b32.xlu1 %v7477_v10, %s5073_s13 }
 0x3a0   : > { %v7570_v62 = vpop.permute.xlu1 %2999 }
 0x3a1   : > { %3137 = vrot.lane.b32.xlu0 %v7483_v0, %s5073_s13  ;;  %9029 = vst [vmem:[#allocation130_spill] sm:$0xff] %v7570_v62  ;;  %v2662_v62 = vld [vmem:[#allocation3 + $0x108] sm:$0xff] }
 0x3a2   : > { %v7576_v44 = vpop.permute.xlu0 %2997 }
 0x3a3   : > { %3143 = vrot.lane.b32.xlu1 %v7489_v1, %s5073_s13  ;;  %9030 = vst [vmem:[#allocation132_spill] sm:$0xff] %v7576_v44  ;;  %v2663_v44 = vld [vmem:[#allocation3 + $0x110] sm:$0xff] }
 0x3a5   : > { %3141 = vrot.lane.b32.xlu0 %v7493_v41, %s5073_s13 }
 0x3a7   : > { %3147 = vrot.lane.b32.xlu1 %v7499_v19, %s5073_s13 }
 0x3a8   : > { %v7582_v5 = vpop.permute.xlu1 %3003 }
 0x3a9   : > { %3145 = vrot.lane.b32.xlu0 %v7505_v38, %s5073_s13  ;;  %9031 = vst [vmem:[#allocation26_spill] sm:$0xff] %v7582_v5  ;;  %v7640_v5 = vld [vmem:[#allocation3 + $0x138] sm:$0xff] }
 0x3ab   : > { %3151 = vrot.lane.b32.xlu1 %v7511_v8, %s5073_s13 }
 0x3ad   : > { %3149 = vrot.lane.b32.xlu0 %v7517_v18, %s5073_s13  ;;  %s5079_s13 = smov 48  }
 0x3af   : > { %3219 = vrot.lane.b32.xlu1 %v2643_v47, %s5075_s18  ;;  %v7586_v47 = vld [vmem:[#allocation3 + $0xc8] sm:$0xff] }
 0x3b1   : > { %3217 = vrot.lane.b32.xlu0 %v2642_v11, %s5075_s18  ;;  %v7588_v11 = vpop.permute.xlu0 %3001 }
 0x3b2   : > { %9032 = vst [vmem:[#allocation31_spill] sm:$0xff] %v7588_v11  ;;  %v7622_v11 = vld [vmem:[#allocation3 + $0x128] sm:$0xff] }
 0x3b3   : > { %3223 = vrot.lane.b32.xlu1 %v2645_v15, %s5075_s18  ;;  %v7592_v15 = vld [vmem:[#allocation3 + $0xc0] sm:$0xff]  ;;  %9039 = vst [vmem:[#allocation60_spill] sm:$0xff] %v7622_v11 }
 0x3b5   : > { %3221 = vrot.lane.b32.xlu0 %v2644_v31, %s5075_s18  ;;  %v7594_v31 = vpop.permute.xlu1 %3007 }
 0x3b6   : > { %9033 = vst [vmem:[#allocation73_spill] sm:$0xff] %v7594_v31  ;;  %v7652_v31 = vld [vmem:[#allocation3 + $0x150] sm:$0xff] }
 0x3b7   : > { %3227 = vrot.lane.b32.xlu1 %v2647_v2, %s5075_s18  ;;  %v7598_v2 = vld [vmem:[#allocation3 + $0xe0] sm:$0xff] }
 0x3b9   : > { %3225 = vrot.lane.b32.xlu0 %v2646_v24, %s5075_s18  ;;  %v7600_v24 = vpop.permute.xlu0 %3005  ;;  %v7606_v23 = vpop.permute.xlu1 %3011 }
 0x3ba   : > { %9034 = vst [vmem:[#allocation75_spill] sm:$0xff] %v7600_v24  ;;  %9035 = vst [vmem:[#allocation8_spill] sm:$0xff] %v7606_v23  ;;  %v7646_v24 = vld [vmem:[#allocation3 + $0x158] sm:$0xff]  ;;  %v2864_v23 = vld [vmem:[#allocation3 + $0x1a0] sm:$0xff] }
 0x3bb   : > { %3231 = vrot.lane.b32.xlu1 %v7541_v9, %s5075_s18 }
 0x3bd   : > { %3229 = vrot.lane.b32.xlu0 %v2648_v63, %s5075_s18  ;;  %v7604_v63 = vld [vmem:[#allocation3 + $0xd8] sm:$0xff]  ;;  %v7610_v6 = vpop.permute.xlu0 %3009 }
 0x3be   : > { %9036 = vst [vmem:[#allocation94_spill] sm:$0xff] %v7610_v6  ;;  %v7664_v6 = vld [vmem:[#allocation3 + $0x168] sm:$0xff] }
 0x3bf   : > { %3235 = vrot.lane.b32.xlu1 %v7550_v12, %s5075_s18  ;;  %v2863_v12 = vld [vmem:[#allocation3 + $0x198] sm:$0xff] }
 0x3c1   : > { %3233 = vrot.lane.b32.xlu0 %v7556_v59, %s5075_s18 }
 0x3c3   : > { %3239 = vrot.lane.b32.xlu1 %v7562_v51, %s5075_s18 }
 0x3c4   : > { %v7613_v43 = vpop.permute.xlu1 %3015 }
 0x3c5   : > { %3237 = vrot.lane.b32.xlu0 %v7568_v34, %s5075_s18  ;;  %9037 = vst [vmem:[#allocation11_spill] sm:$0xff] %v7613_v43 }
 0x3c6   : > { %v7616_v25 = vpop.permute.xlu0 %3013 }
 0x3c7   : > { %3243 = vrot.lane.b32.xlu1 %v7574_v14, %s5075_s18  ;;  %9038 = vst [vmem:[#allocation21_spill] sm:$0xff] %v7616_v25  ;;  %v7710_v25 = vld [vmem:[#allocation3 + $0x181] sm:$0xff] }
 0x3c9   : > { %3241 = vrot.lane.b32.xlu0 %v7580_v61, %s5075_s18 }
 0x3cb   : > { %3247 = vrot.lane.b32.xlu1 %v7586_v47, %s5075_s18 }
 0x3cd   : > { %3245 = vrot.lane.b32.xlu0 %v7592_v15, %s5075_s18 }
 0x3cf   : > { %3251 = vrot.lane.b32.xlu1 %v7598_v2, %s5075_s18 }
 0x3d1   : > { %3249 = vrot.lane.b32.xlu0 %v7604_v63, %s5075_s18  ;;  %v7619_v17 = vpop.permute.xlu1 %3019 }
 0x3d3   : > { %3255 = vrot.lane.b32.xlu1 %v2661_v28, %s5075_s18  ;;  %v7624_v30 = vpop.permute.xlu0 %3017  ;;  %v7628_v28 = vld [vmem:[#allocation3 + $0x120] sm:$0xff] }
 0x3d4   : > { %9040 = vst [vmem:[#allocation65_spill] sm:$0xff] %v7628_v28 }
 0x3d5   : > { %3253 = vrot.lane.b32.xlu0 %v2660_v46, %s5075_s18 }
 0x3d7   : > { %3259 = vrot.lane.b32.xlu1 %v2663_v44, %s5075_s18  ;;  %v7634_v44 = vld [vmem:[#allocation3 + $0x140] sm:$0xff] }
 0x3d9   : > { %3257 = vrot.lane.b32.xlu0 %v2662_v62, %s5075_s18 }
 0x3db   : > { %3263 = vrot.lane.b32.xlu1 %v7622_v11, %s5075_s18 }
 0x3dd   : > { %v7630_v46 = vpop.permute.xlu1 %3023  ;;  %3261 = vrot.lane.b32.xlu0 %v7628_v28, %s5075_s18  ;;  %v7658_v28 = vld [vmem:[#allocation3 + $0x188] sm:$0xff] }
 0x3df   : > { %3267 = vrot.lane.b32.xlu1 %v7634_v44, %s5075_s18  ;;  %v7638_v62 = vpop.permute.xlu0 %3021 }
 0x3e1   : > { %v7642_v55 = vpop.permute.xlu1 %3091  ;;  %3265 = vrot.lane.b32.xlu0 %v7640_v5, %s5075_s18 }
 0x3e2   : > { %9041 = vst [vmem:[#allocation131_spill] sm:$0xff] %v7642_v55 }
 0x3e3   : > { %3271 = vrot.lane.b32.xlu1 %v7646_v24, %s5075_s18  ;;  %v7650_v4 = vpop.permute.xlu0 %3089 }
 0x3e4   : > { %9042 = vst [vmem:[#allocation134_spill] sm:$0xff] %v7650_v4 }
 0x3e5   : > { %v7654_v32 = vpop.permute.xlu1 %3095  ;;  %3269 = vrot.lane.b32.xlu0 %v7652_v31, %s5075_s18 }
 0x3e6   : > { %9043 = vst [vmem:[#allocation30_spill] sm:$0xff] %v7654_v32  ;;  %v7674_v32 = vld [vmem:[#allocation3 + $0x189] sm:$0xff] }
 0x3e7   : > { %v7660_v55 = vpop.permute.xlu0 %3093  ;;  %3279 = vrot.lane.b32.xlu1 %v7658_v28, %s5075_s18 }
 0x3e8   : > { %9044 = vst [vmem:[#allocation35_spill] sm:$0xff] %v7660_v55 }
 0x3e9   : > { %v7666_v9 = vpop.permute.xlu1 %3099  ;;  %3273 = vrot.lane.b32.xlu0 %v7664_v6, %s5075_s18 }
 0x3ea   : > { %9045 = vst [vmem:[#allocation74_spill] sm:$0xff] %v7666_v9  ;;  %v7684_v9 = vld [vmem:[#allocation3 + $0x18a] sm:$0xff] }
 0x3eb   : > { %v7670_v4 = vpop.permute.xlu0 %3097  ;;  %3375 = vrot.lane.b32.xlu1 %v7336_v22, %s5077_s20 }
 0x3ec   : > { %9046 = vst [vmem:[#allocation77_spill] sm:$0xff] %v7670_v4  ;;  %v7690_v4 = vld [vmem:[#allocation3 + $0x180] sm:$0xff] }
 0x3ed   : > { %v7676_v20 = vpop.permute.xlu1 %3103  ;;  %3407 = vrot.lane.b32.xlu0 %v7674_v32, %s5077_s20 }
 0x3ee   : > { %9047 = vst [vmem:[#allocation93_spill] sm:$0xff] %v7676_v20 }
 0x3ef   : > { %v7680_v55 = vpop.permute.xlu0 %3101  ;;  %3503 = vrot.lane.b32.xlu1 %v7457_v29, %s5078_s10 }
 0x3f0   : > { %9048 = vst [vmem:[#allocation96_spill] sm:$0xff] %v7680_v55  ;;  %v2896_v55 = vld [vmem:[#allocation3 + $0x1a1] sm:$0xff] }
 0x3f1   : > { %v7686_v11 = vpop.permute.xlu1 %3107  ;;  %3535 = vrot.lane.b32.xlu0 %v7684_v9, %s5078_s10 }
 0x3f2   : > { %9049 = vst [vmem:[#allocation14_spill] sm:$0xff] %v7686_v11 }
 0x3f3   : > { %v7692_v20 = vpop.permute.xlu0 %3105  ;;  %3277 = vrot.lane.b32.xlu1 %v7690_v4, %s5075_s18 }
 0x3f4   : > { %9050 = vst [vmem:[#allocation24_spill] sm:$0xff] %v7692_v20 }
 0x3f5   : > { %v7696_v59 = vpop.permute.xlu1 %3111  ;;  %3663 = vrot.lane.b32.xlu0 %v2864_v23, %s5079_s13  ;;  %v2928_v23 = vld [vmem:[#allocation3 + $0x1a2] sm:$0xff] }
 0x3f6   : > { %9051 = vst [vmem:[#allocation64_spill] sm:$0xff] %v7696_v59 }
 0x3f7   : > { %v7699_v48 = vpop.permute.xlu0 %3109  ;;  %3791 = vrot.lane.b32.xlu1 %v2896_v55, %s5080_s25 }
 0x3f8   : > { %9052 = vst [vmem:[#allocation113_spill] sm:$0xff] %v7699_v48 }
 0x3f9   : > { %v7702_v11 = vpop.permute.xlu1 %3115  ;;  %3631 = vrot.lane.b32.xlu0 %v7598_v2, %s5079_s13 }
 0x3fb   : > { %v7706_v20 = vpop.permute.xlu0 %3113  ;;  %3759 = vrot.lane.b32.xlu1 %v7350_v60, %s5080_s25  ;;  %v2830_v60 = vld [vmem:[#allocation3 + $0x182] sm:$0xff] }
 0x3fc   : > { %9053 = vst [vmem:[#allocation133_spill] sm:$0xff] %v7706_v20 }
 0x3fd   : > { %v7712_v59 = vpop.permute.xlu1 %3119  ;;  %3405 = vrot.lane.b32.xlu0 %v7710_v25, %s5077_s20 }
 0x3ff   : > { %v7716_v48 = vpop.permute.xlu0 %3117  ;;  %3373 = vrot.lane.b32.xlu1 %v7341_v21, %s5077_s20 }
 0x401   : > { %v7720_v55 = vpop.permute.xlu1 %3123  ;;  %3919 = vrot.lane.b32.xlu0 %v2928_v23, %s5081_s26 }
 0x402   : > { %9054 = vst [vmem:[#allocation136_spill] sm:$0xff] %v7720_v55  ;;  %v2895_v55 = vld [vmem:[#allocation3 + $0x199] sm:$0xff] }
 0x403   : > { %v7723_v2 = vpop.permute.xlu0 %3121  ;;  %3887 = vrot.lane.b32.xlu1 %v7465_v57, %s5081_s26  ;;  %v7741_v57 = vld [vmem:[#allocation3 + $0x170] sm:$0xff] }
 0x404   : > { %9055 = vst [vmem:[#allocation34_spill] sm:$0xff] %v7723_v2 }
 0x405   : > { %v7727_v50 = vpop.permute.xlu1 %3127  ;;  %3533 = vrot.lane.b32.xlu0 %v2830_v60, %s5078_s10 }
 0x406   : > { %9056 = vst [vmem:[#allocation39_spill] sm:$0xff] %v7727_v50 }
 0x407   : > { %v7730_v43 = vpop.permute.xlu0 %3125  ;;  %3661 = vrot.lane.b32.xlu1 %v2863_v12, %s5079_s13  ;;  %v2927_v12 = vld [vmem:[#allocation3 + $0x19a] sm:$0xff] }
 0x408   : > { %9057 = vst [vmem:[#allocation76_spill] sm:$0xff] %v7730_v43 }
 0x409   : > { %v7733_v20 = vpop.permute.xlu1 %3131  ;;  %3501 = vrot.lane.b32.xlu0 %v7461_v56, %s5078_s10 }
 0x40a   : > { %9058 = vst [vmem:[#allocation79_spill] sm:$0xff] %v7733_v20 }
 0x40b   : > { %v7737_v23 = vpop.permute.xlu0 %3129  ;;  %3629 = vrot.lane.b32.xlu1 %v7604_v63, %s5079_s13 }
 0x40c   : > { %9059 = vst [vmem:[#allocation95_spill] sm:$0xff] %v7737_v23 }
 0x40d   : > { %v7743_v2 = vpop.permute.xlu1 %3135  ;;  %3275 = vrot.lane.b32.xlu0 %v7741_v57, %s5075_s18 }
 0x40e   : > { %9060 = vst [vmem:[#allocation98_spill] sm:$0xff] %v7743_v2 }
 0x40f   : > { %v7747_v43 = vpop.permute.xlu0 %3133  ;;  %3403 = vrot.lane.b32.xlu1 %v7410_v33, %s5077_s20 }
 0x410   : > { %9061 = vst [vmem:[#allocation18_spill] sm:$0xff] %v7747_v43 }
 0x411   : > { %v7751_v50 = vpop.permute.xlu1 %3139  ;;  %3789 = vrot.lane.b32.xlu0 %v2895_v55, %s5080_s25 }
 0x413   : > { %v7754_v23 = vpop.permute.xlu0 %3137  ;;  %3917 = vrot.lane.b32.xlu1 %v2927_v12, %s5081_s26 }
 0x414   : > { %9062 = vst [vmem:[#allocation29_spill] sm:$0xff] %v7754_v23 }
 0x415   : > { %v7757_v63 = vpop.permute.xlu1 %3143  ;;  %3757 = vrot.lane.b32.xlu0 %v7355_v58, %s5080_s25 }
 0x417   : > { %v7761_v20 = vpop.permute.xlu0 %3141  ;;  %3531 = vrot.lane.b32.xlu1 %v7511_v8, %s5078_s10 }
 0x419   : > { %v7765_v43 = vpop.permute.xlu1 %3147  ;;  %3371 = vrot.lane.b32.xlu0 %v7322_v39, %s5077_s20 }
 0x41b   : > { %v7769_v55 = vpop.permute.xlu0 %3145  ;;  %3499 = vrot.lane.b32.xlu1 %v7449_v36, %s5078_s10 }
 0x41d   : > { %v7773_v12 = vpop.permute.xlu1 %3151  ;;  %3885 = vrot.lane.b32.xlu0 %v7469_v35, %s5081_s26 }
 0x41f   : > { %v7777_v58 = vpop.permute.xlu0 %3149  ;;  %3627 = vrot.lane.b32.xlu1 %v7586_v47, %s5079_s13 }
 0x421   : > { %v7781_v2 = vpop.permute.xlu1 %3219  ;;  %3659 = vrot.lane.b32.xlu0 %v7658_v28, %s5079_s13 }
 0x422   : > { %9063 = vst [vmem:[#allocation68_spill] sm:$0xff] %v7781_v2 }
 0x423   : > { %v7785_v39 = vpop.permute.xlu0 %3217  ;;  %3401 = vrot.lane.b32.xlu1 %v7416_v49, %s5077_s20 }
 0x424   : > { %9064 = vst [vmem:[#allocation115_spill] sm:$0xff] %v7785_v39 }
 0x425   : > { %v7789_v23 = vpop.permute.xlu1 %3223  ;;  %3787 = vrot.lane.b32.xlu0 %v7674_v32, %s5080_s25 }
 0x426   : > { %9065 = vst [vmem:[#allocation135_spill] sm:$0xff] %v7789_v23 }
 0x427   : > { %v7793_v35 = vpop.permute.xlu0 %3221  ;;  %3915 = vrot.lane.b32.xlu1 %v7684_v9, %s5081_s26 }
 0x428   : > { %9066 = vst [vmem:[#allocation138_spill] sm:$0xff] %v7793_v35 }
 0x429   : > { %v7797_v47 = vpop.permute.xlu1 %3227  ;;  %3755 = vrot.lane.b32.xlu0 %v7336_v22, %s5080_s25 }
 0x42a   : > { %9067 = vst [vmem:[#allocation38_spill] sm:$0xff] %v7797_v47 }
 0x42b   : > { %v7801_v28 = vpop.permute.xlu0 %3225  ;;  %3529 = vrot.lane.b32.xlu1 %v7517_v18, %s5078_s10 }
 0x42c   : > { %9068 = vst [vmem:[#allocation43_spill] sm:$0xff] %v7801_v28 }
 0x42d   : > { %v7805_v39 = vpop.permute.xlu1 %3231  ;;  %3369 = vrot.lane.b32.xlu0 %v7327_v40, %s5077_s20 }
 0x42e   : > { %9069 = vst [vmem:[#allocation78_spill] sm:$0xff] %v7805_v39 }
 0x42f   : > { %v7809_v32 = vpop.permute.xlu0 %3229  ;;  %3497 = vrot.lane.b32.xlu1 %v7453_v13, %s5078_s10 }
 0x430   : > { %9070 = vst [vmem:[#allocation81_spill] sm:$0xff] %v7809_v32 }
 0x431   : > { %v7813_v9 = vpop.permute.xlu1 %3235  ;;  %3883 = vrot.lane.b32.xlu0 %v7457_v29, %s5081_s26 }
 0x432   : > { %9071 = vst [vmem:[#allocation97_spill] sm:$0xff] %v7813_v9 }
 0x433   : > { %v7817_v22 = vpop.permute.xlu0 %3233  ;;  %3625 = vrot.lane.b32.xlu1 %v7592_v15, %s5079_s13 }
 0x434   : > { %9072 = vst [vmem:[#allocation100_spill] sm:$0xff] %v7817_v22  ;;  %v7912_v22 = vld [vmem:[#allocation3 + $0x81] sm:$0xff] }
 0x435   : > { %v7821_v2 = vpop.permute.xlu1 %3239  ;;  %3657 = vrot.lane.b32.xlu0 %v7690_v4, %s5079_s13 }
 0x437   : > { %v7825_v40 = vpop.permute.xlu0 %3237  ;;  %3399 = vrot.lane.b32.xlu1 %v7396_v7, %s5077_s20  ;;  %v7844_v7 = vld [vmem:[#allocation3 + $0x99] sm:$0xff] }
 0x439   : > { %v7829_v35 = vpop.permute.xlu1 %3243  ;;  %3785 = vrot.lane.b32.xlu0 %v7710_v25, %s5080_s25 }
 0x43b   : > { %v7833_v29 = vpop.permute.xlu0 %3241  ;;  %3913 = vrot.lane.b32.xlu1 %v2830_v60, %s5081_s26 }
 0x43d   : > { %v7836_v15 = vpop.permute.xlu1 %3247  ;;  %3753 = vrot.lane.b32.xlu0 %v7341_v21, %s5080_s25 }
 0x43f   : > { %v7840_v4 = vpop.permute.xlu0 %3245  ;;  %3527 = vrot.lane.b32.xlu1 %v7499_v19, %s5078_s10 }
 0x441   : > { %v7846_v23 = vpop.permute.xlu1 %3251  ;;  %3367 = vrot.lane.b32.xlu0 %v7844_v7, %s5077_s20 }
 0x442   : > { %9073 = vst [vmem:[#allocation28_spill] sm:$0xff] %v7846_v23 }
 0x443   : > { %v7850_v25 = vpop.permute.xlu0 %3249  ;;  %3495 = vrot.lane.b32.xlu1 %v7441_v37, %s5078_s10 }
 0x444   : > { %9074 = vst [vmem:[#allocation33_spill] sm:$0xff] %v7850_v25 }
 0x445   : > { %v7854_v60 = vpop.permute.xlu1 %3255  ;;  %3881 = vrot.lane.b32.xlu0 %v7461_v56, %s5081_s26 }
 0x446   : > { %9075 = vst [vmem:[#allocation114_spill] sm:$0xff] %v7854_v60 }
 0x447   : > { %v7858_v21 = vpop.permute.xlu0 %3253  ;;  %3623 = vrot.lane.b32.xlu1 %v7574_v14, %s5079_s13 }
 0x448   : > { %9076 = vst [vmem:[#allocation117_spill] sm:$0xff] %v7858_v21  ;;  %v2876_v21 = vld [vmem:[#allocation3 + $0xb1] sm:$0xff] }
 0x449   : > { %v7862_v28 = vpop.permute.xlu1 %3259  ;;  %3655 = vrot.lane.b32.xlu0 %v7741_v57, %s5079_s13 }
 0x44a   : > { %9077 = vst [vmem:[#allocation137_spill] sm:$0xff] %v7862_v28 }
 0x44b   : > { %v7866_v23 = vpop.permute.xlu0 %3257  ;;  %3397 = vrot.lane.b32.xlu1 %v7402_v54, %s5077_s20  ;;  %v7885_v54 = vld [vmem:[#allocation3 + $0x91] sm:$0xff] }
 0x44c   : > { %9078 = vst [vmem:[#allocation140_spill] sm:$0xff] %v7866_v23 }
 0x44d   : > { %v7870_v25 = vpop.permute.xlu1 %3263  ;;  %3783 = vrot.lane.b32.xlu0 %v7410_v33, %s5080_s25 }
 0x44e   : > { %9079 = vst [vmem:[#allocation42_spill] sm:$0xff] %v7870_v25 }
 0x44f   : > { %v7874_v56 = vpop.permute.xlu0 %3261  ;;  %3911 = vrot.lane.b32.xlu1 %v7511_v8, %s5081_s26 }
 0x450   : > { %9080 = vst [vmem:[#allocation47_spill] sm:$0xff] %v7874_v56 }
 0x451   : > { %v7878_v60 = vpop.permute.xlu1 %3267  ;;  %3751 = vrot.lane.b32.xlu0 %v2876_v21, %s5080_s25 }
 0x452   : > { %9081 = vst [vmem:[#allocation80_spill] sm:$0xff] %v7878_v60 }
 0x453   : > { %v7881_v47 = vpop.permute.xlu0 %3265  ;;  %3525 = vrot.lane.b32.xlu1 %v7505_v38, %s5078_s10 }
 0x454   : > { %9082 = vst [vmem:[#allocation83_spill] sm:$0xff] %v7881_v47 }
 0x455   : > { %v7887_v23 = vpop.permute.xlu1 %3271  ;;  %3365 = vrot.lane.b32.xlu0 %v7885_v54, %s5077_s20 }
 0x457   : > { %v7891_v33 = vpop.permute.xlu0 %3269  ;;  %3493 = vrot.lane.b32.xlu1 %v7445_v53, %s5078_s10 }
 0x459   : > { %3879 = vrot.lane.b32.xlu0 %v7449_v36, %s5081_s26  ;;  %v3280_v8 = vpop.permute.xlu1 %3279  ;;  %v2875_v36 = vld [vmem:[#allocation3 + $0xa9] sm:$0xff] }
 0x45b   : > { %v7897_v21 = vpop.permute.xlu0 %3273  ;;  %3621 = vrot.lane.b32.xlu1 %v7580_v61, %s5079_s13 }
 0x45d   : > { %3653 = vrot.lane.b32.xlu0 %v7664_v6, %s5079_s13  ;;  %v3376_v28 = vpop.permute.xlu1 %3375 }
 0x45f   : > { %v3408_v32 = vpop.permute.xlu0 %3407  ;;  %3395 = vrot.lane.b32.xlu1 %v7385_v52, %s5077_s20 }
 0x461   : > { %3781 = vrot.lane.b32.xlu0 %v7416_v49, %s5080_s25  ;;  %v3504_v53 = vpop.permute.xlu1 %3503  ;;  %v3984_v49 = vsel %vm1880_vm2, %v7741_v57, %v7630_v46 }
 0x463   : > { %v3536_v56 = vpop.permute.xlu0 %3535  ;;  %3909 = vrot.lane.b32.xlu1 %v7517_v18, %s5081_s26  ;;  %v4016_v18 = vsel %vm1946_vm5, %v3984_v49, %v7773_v12 }
 0x464   : > { %v4048_v9 = vsel %vm2012_vm7, %v4016_v18, %v3280_v8 }
 0x465   : > { %3749 = vrot.lane.b32.xlu0 %v2875_v36, %s5080_s25  ;;  %v3278_v39 = vpop.permute.xlu1 %3277  ;;  %v3968_v36 = vsel %vm1880_vm2, %v7574_v14, %v7547_v42  ;;  %v4080_v57 = vsel %vm2078_vm9, %v4048_v9, %v3408_v32  ;;  %v7943_v9 = vld [vmem:[#allocation3 + $0x139] sm:$0xff] }
 0x466   : > { %v4000_v46 = vsel %vm1946_vm5, %v3968_v36, %v7712_v59  ;;  %v4113_v12 = vsel %vm4081_vm13, %v4080_v57, %v3536_v56 }
 0x467   : > { %v3664_v25 = vpop.permute.xlu0 %3663  ;;  %3523 = vrot.lane.b32.xlu1 %v7489_v1, %s5078_s10 }
 0x469   : > { %3363 = vrot.lane.b32.xlu0 %v7912_v22, %s5077_s20  ;;  %v3792_v52 = vpop.permute.xlu1 %3791 }
 0x46b   : > { %v3632_v47 = vpop.permute.xlu0 %3631  ;;  %3491 = vrot.lane.b32.xlu1 %v7433_v3, %s5078_s10  ;;  %v4032_v3 = vsel %vm2012_vm7, %v4000_v46, %v7836_v15  ;;  %v7963_v46 = vld [vmem:[#allocation3 + $0x79] sm:$0xff] }
 0x46c   : > { %v4064_v42 = vsel %vm2078_vm9, %v4032_v3, %v3376_v28 }
 0x46d   : > { %3877 = vrot.lane.b32.xlu0 %v7453_v13, %s5081_s26  ;;  %v3760_v60 = vpop.permute.xlu1 %3759  ;;  %v4146_v13 = vsel %vm4114_vm12, %v4113_v12, %v3664_v25  ;;  %v4097_v14 = vsel %vm4081_vm13, %v4064_v42, %v3504_v53  ;;  %v2890_v25 = vld [vmem:[#allocation3 + $0x159] sm:$0xff]  ;;  %v7983_v42 = vld [vmem:[#allocation3 + $0x129] sm:$0xff] }
 0x46e   : > { %v4130_v32 = vsel %vm4114_vm12, %v4097_v14, %v3632_v47  ;;  %v4179_v15 = vsel %vm4147_vm14, %v4146_v13, %v3792_v52 }
 0x46f   : > { %v3406_v49 = vpop.permute.xlu0 %3405  ;;  %3619 = vrot.lane.b32.xlu1 %v7562_v51, %s5079_s13  ;;  %v4163_v8 = vsel %vm4147_vm14, %v4130_v32, %v3760_v60  ;;  %v3983_v60 = vsel %vm1880_vm2, %v7664_v6, %v7638_v62  ;;  %v2889_v32 = vld [vmem:[#allocation3 + $0x151] sm:$0xff] }
 0x470   : > { %v4015_v57 = vsel %vm1946_vm5, %v3983_v60, %v7777_v58  ;;  %v2840_v60 = vld [vmem:[#allocation3 + $0x80] sm:$0xff] }
 0x471   : > { %3651 = vrot.lane.b32.xlu0 %v7646_v24, %s5079_s13  ;;  %v3374_v59 = vpop.permute.xlu1 %3373 }
 0x473   : > { %v3920_v56 = vpop.permute.xlu0 %3919  ;;  %3393 = vrot.lane.b32.xlu1 %v7943_v9, %s5077_s20 }
 0x474   : > { %v4212_v28 = vsel %vm4180_vm15, %v4179_v15, %v3920_v56 }
 0x475   : > { %3779 = vrot.lane.b32.xlu0 %v2890_v25, %s5080_s25  ;;  %4820 = vmatprep.subr.msk.mxu0 %vm4385_vm1, %v4212_v28  ;;  %v3888_v53 = vpop.permute.xlu1 %3887 }
 0x476   : > { %v4196_v47 = vsel %vm4180_vm15, %v4163_v8, %v3888_v53 }
 0x477   : > { %v3534_v18 = vpop.permute.xlu0 %3533  ;;  %3907 = vrot.lane.b32.xlu1 %v7499_v19, %s5081_s26  ;;  %4821 = vmatpush3.xpose.msk.msra.mxu0 %vm4385_vm1, %v4196_v47  ;;  %v8010_v47 = vld [vmem:[#allocation3 + $0x69] sm:$0xff] }
 0x479   : > { %3747 = vrot.lane.b32.xlu0 %v7844_v7, %s5080_s25  ;;  %v3662_v52 = vpop.permute.xlu1 %3661  ;;  %v4047_v7 = vsel %vm2012_vm7, %v4015_v57, %v3278_v39 }
 0x47a   : > { %v4079_v3 = vsel %vm2078_vm9, %v4047_v7, %v3406_v49 }
 0x47b   : > { %v3502_v36 = vpop.permute.xlu0 %3501  ;;  %3521 = vrot.lane.b32.xlu1 %v7493_v41, %s5078_s10  ;;  %v4112_v41 = vsel %vm4081_vm13, %v4079_v3, %v3534_v18 }
 0x47c   : > { %v4145_v62 = vsel %vm4114_vm12, %v4112_v41, %v3662_v52  ;;  %v8031_v41 = vld [vmem:[#allocation3 + $0x121] sm:$0xff] }
 0x47d   : > { %3361 = vrot.lane.b32.xlu0 %v7963_v46, %s5077_s20  ;;  %v3630_v19 = vpop.permute.xlu1 %3629 }
 0x47f   : > { %v3276_v12 = vpop.permute.xlu0 %3275  ;;  %3489 = vrot.lane.b32.xlu1 %v7437_v27, %s5078_s10 }
 0x481   : > { %3875 = vrot.lane.b32.xlu0 %v7441_v37, %s5081_s26  ;;  %v3404_v6 = vpop.permute.xlu1 %3403  ;;  %v3967_v37 = vsel %vm1880_vm2, %v7580_v61, %v7552_v16 }
 0x482   : > { %v3999_v14 = vsel %vm1946_vm5, %v3967_v37, %v7716_v48 }
 0x483   : > { %v3790_v58 = vpop.permute.xlu0 %3789  ;;  %3617 = vrot.lane.b32.xlu1 %v7568_v34, %s5079_s13  ;;  %v4031_v15 = vsel %vm2012_vm7, %v3999_v14, %v7840_v4 }
 0x484   : > { %v4178_v39 = vsel %vm4147_vm14, %v4145_v62, %v3790_v58  ;;  %v4063_v28 = vsel %vm2078_vm9, %v4031_v15, %v3374_v59  ;;  %v3982_v59 = vsel %vm1880_vm2, %v7646_v24, %v7619_v17  ;;  %v2905_v17 = vld [vmem:[#allocation3 + $0x92] sm:$0xff]  ;;  %v8055_v15 = vld [vmem:[#allocation3 + $0x61] sm:$0xff] }
 0x485   : > { %3649 = vrot.lane.b32.xlu0 %v7652_v31, %s5079_s13  ;;  %v3918_v49 = vpop.permute.xlu1 %3917  ;;  %v4096_v16 = vsel %vm4081_vm13, %v4063_v28, %v3502_v36 }
 0x486   : > { %v4211_v27 = vsel %vm4180_vm15, %v4178_v39, %v3918_v49  ;;  %v4129_v48 = vsel %vm4114_vm12, %v4096_v16, %v3630_v19  ;;  %v2888_v39 = vld [vmem:[#allocation3 + $0x141] sm:$0xff] }
 0x487   : > { %v3758_v13 = vpop.permute.xlu0 %3757  ;;  %3391 = vrot.lane.b32.xlu1 %v7983_v42, %s5077_s20  ;;  %4822 = vmatprep.subr.msk.mxu0 %vm4385_vm1, %v4211_v27 }
 0x488   : > { %v4162_v8 = vsel %vm4147_vm14, %v4129_v48, %v3758_v13 }
 0x489   : > { %3777 = vrot.lane.b32.xlu0 %v2889_v32, %s5080_s25  ;;  %v3532_v56 = vpop.permute.xlu1 %3531 }
 0x48b   : > { %v3372_v61 = vpop.permute.xlu0 %3371  ;;  %3905 = vrot.lane.b32.xlu1 %v7505_v38, %s5081_s26  ;;  %v4014_v38 = vsel %vm1946_vm5, %v3982_v59, %v7765_v43 }
 0x48c   : > { %v4046_v18 = vsel %vm2012_vm7, %v4014_v38, %v3276_v12  ;;  %v3965_v38 = vsel %vm1880_vm2, %v7568_v34, %v7543_v45 }
 0x48d   : > { %3745 = vrot.lane.b32.xlu0 %v7885_v54, %s5080_s25  ;;  %v3500_v25 = vpop.permute.xlu1 %3499  ;;  %v4078_v24 = vsel %vm2078_vm9, %v4046_v18, %v3404_v6  ;;  %v3966_v6 = vsel %vm1880_vm2, %v7562_v51, %v7538_v26  ;;  %v9083_v18 = vld [vmem:[#allocation133_spill] sm:$0xff] }
 0x48e   : > { %v4111_v36 = vsel %vm4081_vm13, %v4078_v24, %v3532_v56  ;;  %v3998_v58 = vsel %vm1946_vm5, %v3966_v6, %v7702_v11  ;;  %v8063_v56 = vld [vmem:[#allocation3 + $0x62] sm:$0xff] }
 0x48f   : > { %v3886_v4 = vpop.permute.xlu0 %3885  ;;  %3519 = vrot.lane.b32.xlu1 %v7477_v10, %s5078_s10  ;;  %v8018_v10 = vld [vmem:[#allocation3 + $0x6a] sm:$0xff]  ;;  %v4030_v49 = vsel %vm2012_vm7, %v3998_v58, %v7829_v35 }
 0x490   : > { %v4195_v53 = vsel %vm4180_vm15, %v4162_v8, %v3886_v4  ;;  %v4062_v37 = vsel %vm2078_vm9, %v4030_v49, %v3372_v61  ;;  %v2904_v61 = vld [vmem:[#allocation3 + $0x82] sm:$0xff] }
 0x491   : > { %3359 = vrot.lane.b32.xlu0 %v8010_v47, %s5077_s20  ;;  %4823 = vmatpush3.xpose.msk.msra.mxu0 %vm4385_vm1, %v4195_v53  ;;  %v3628_v54 = vpop.permute.xlu1 %3627  ;;  %v4095_v26 = vsel %vm4081_vm13, %v4062_v37, %v3500_v25  ;;  %v8080_v53 = vld [vmem:[#allocation3 + $0x111] sm:$0xff] }
 0x492   : > { %v4128_v11 = vsel %vm4114_vm12, %v4095_v26, %v3628_v54  ;;  %v2838_v26 = vld [vmem:[#allocation3 + $0x68] sm:$0xff] }
 0x493   : > { %v3660_v52 = vpop.permute.xlu0 %3659  ;;  %3487 = vrot.lane.b32.xlu1 %v8018_v10, %s5078_s10 }
 0x494   : > { %v4144_v57 = vsel %vm4114_vm12, %v4111_v36, %v3660_v52  ;;  %v3997_v52 = vsel %vm1946_vm5, %v3965_v38, %v9083_v18  ;;  %v2919_v36 = vld [vmem:[#allocation3 + $0x13a] sm:$0xff] }
 0x495   : > { %3873 = vrot.lane.b32.xlu0 %v2905_v17, %s5081_s26  ;;  %v3402_v43 = vpop.permute.xlu1 %3401  ;;  %v4029_v17 = vsel %vm2012_vm7, %v3997_v52, %v7833_v29  ;;  %v9088_v18 = vld [vmem:[#allocation21_spill] sm:$0xff] }
 0x496   : > { %v3979_v52 = vsel %vm1880_vm2, %v7640_v5, %v9088_v18  ;;  %v9096_v18 = vld [vmem:[#allocation19_spill] sm:$0xff] }
 0x497   : > { %v3788_v19 = vpop.permute.xlu0 %3787  ;;  %3615 = vrot.lane.b32.xlu1 %v2840_v60, %s5079_s13 }
 0x498   : > { %v4177_v7 = vsel %vm4147_vm14, %v4144_v57, %v3788_v19  ;;  %v8100_v19 = vld [vmem:[#allocation3 + $0x112] sm:$0xff] }
 0x499   : > { %3647 = vrot.lane.b32.xlu0 %v7634_v44, %s5079_s13  ;;  %v3916_v3 = vpop.permute.xlu1 %3915 }
 0x49a   : > { %v4210_v12 = vsel %vm4180_vm15, %v4177_v7, %v3916_v3  ;;  %v8106_v3 = vld [vmem:[#allocation3 + $0x51] sm:$0xff] }
 0x49b   : > { %v3756_v62 = vpop.permute.xlu0 %3755  ;;  %3389 = vrot.lane.b32.xlu1 %v8031_v41, %s5077_s20  ;;  %4824 = vmatprep.subr.msk.mxu0 %vm4385_vm1, %v4210_v12  ;;  %v9084_v12 = vld [vmem:[#allocation11_spill] sm:$0xff] }
 0x49c   : > { %v4161_v14 = vsel %vm4147_vm14, %v4128_v11, %v3756_v62  ;;  %v3980_v6 = vsel %vm1880_vm2, %v7634_v44, %v9084_v12  ;;  %v8114_v62 = vld [vmem:[#allocation3 + $0x52] sm:$0xff]  ;;  %v9090_v12 = vld [vmem:[#allocation22_spill] sm:$0xff] }
 0x49d   : > { %3775 = vrot.lane.b32.xlu0 %v2888_v39, %s5080_s25  ;;  %v3530_v27 = vpop.permute.xlu1 %3529  ;;  %v4012_v58 = vsel %vm1946_vm5, %v3980_v6, %v7757_v63 }
 0x49e   : > { %v4044_v49 = vsel %vm2012_vm7, %v4012_v58, %v7887_v23 }
 0x49f   : > { %v3370_v13 = vpop.permute.xlu0 %3369  ;;  %3903 = vrot.lane.b32.xlu1 %v7489_v1, %s5081_s26 }
 0x4a1   : > { %3743 = vrot.lane.b32.xlu0 %v7912_v22, %s5080_s25  ;;  %v3498_v51 = vpop.permute.xlu1 %3497  ;;  %v3981_v22 = vsel %vm1880_vm2, %v7652_v31, %v7624_v30  ;;  %v2839_v31 = vld [vmem:[#allocation3 + $0x78] sm:$0xff] }
 0x4a2   : > { %v4013_v28 = vsel %vm1946_vm5, %v3981_v22, %v7769_v55  ;;  %v9086_v22 = vld [vmem:[#allocation23_spill] sm:$0xff] }
 0x4a3   : > { %v3884_v35 = vpop.permute.xlu0 %3883  ;;  %3517 = vrot.lane.b32.xlu1 %v7483_v0, %s5078_s10  ;;  %v4045_v16 = vsel %vm2012_vm7, %v4013_v28, %v7897_v21 }
 0x4a4   : > { %v4194_v32 = vsel %vm4180_vm15, %v4161_v14, %v3884_v35  ;;  %v4077_v25 = vsel %vm2078_vm9, %v4045_v16, %v3402_v43  ;;  %v4061_v43 = vsel %vm2078_vm9, %v4029_v17, %v3370_v13  ;;  %v2854_v14 = vld [vmem:[#allocation3 + $0x128] sm:$0xff]  ;;  %v9087_v16 = vld [vmem:[#allocation64_spill] sm:$0xff] }
 0x4a5   : > { %3357 = vrot.lane.b32.xlu0 %v8055_v15, %s5077_s20  ;;  %4825 = vmatpush3.xpose.msk.msra.mxu0 %vm4385_vm1, %v4194_v32  ;;  %v3626_v1 = vpop.permute.xlu1 %3625  ;;  %v4110_v30 = vsel %vm4081_vm13, %v4077_v25, %v3530_v27  ;;  %v4094_v34 = vsel %vm4081_vm13, %v4061_v43, %v3498_v51  ;;  %v2903_v27 = vld [vmem:[#allocation3 + $0x7a] sm:$0xff]  ;;  %v8130_v32 = vld [vmem:[#allocation3 + $0x109] sm:$0xff] }
 0x4a6   : > { %v4127_v57 = vsel %vm4114_vm12, %v4094_v34, %v3626_v1  ;;  %v9085_v1 = vld [vmem:[#allocation15_spill] sm:$0xff] }
 0x4a7   : > { %v3658_v0 = vpop.permute.xlu0 %3657  ;;  %3485 = vrot.lane.b32.xlu1 %v8063_v56, %s5078_s10  ;;  %v3964_v28 = vsel %vm1880_vm2, %v9086_v22, %v9085_v1  ;;  %v8164_v17 = vld [vmem:[#allocation3 + $0x4a] sm:$0xff]  ;;  %v9092_v1 = vld [vmem:[#allocation8_spill] sm:$0xff] }
 0x4a8   : > { %v4143_v8 = vsel %vm4114_vm12, %v4110_v30, %v3658_v0  ;;  %v9093_v22 = vld [vmem:[#allocation60_spill] sm:$0xff] }
 0x4a9   : > { %3871 = vrot.lane.b32.xlu0 %v2904_v61, %s5081_s26  ;;  %v3400_v48 = vpop.permute.xlu1 %3399  ;;  %v3996_v61 = vsel %vm1946_vm5, %v3964_v28, %v9087_v16  ;;  %v3978_v28 = vsel %vm1880_vm2, %v9093_v22, %v9092_v1 }
 0x4aa   : > { %v4076_v37 = vsel %vm2078_vm9, %v4044_v49, %v3400_v48  ;;  %v4028_v25 = vsel %vm2012_vm7, %v3996_v61, %v7821_v2  ;;  %v4010_v16 = vsel %vm1946_vm5, %v3978_v28, %v7751_v50  ;;  %v2785_v28 = vld [vmem:[#allocation3 + $0xe1] sm:$0xff] }
 0x4ab   : > { %v3786_v4 = vpop.permute.xlu0 %3785  ;;  %3613 = vrot.lane.b32.xlu1 %v2839_v31, %s5079_s13  ;;  %v2918_v31 = vld [vmem:[#allocation3 + $0x12a] sm:$0xff] }
 0x4ac   : > { %v4176_v55 = vsel %vm4147_vm14, %v4143_v8, %v3786_v4 }
 0x4ad   : > { %3645 = vrot.lane.b32.xlu0 %v7640_v5, %s5079_s13  ;;  %v3914_v21 = vpop.permute.xlu1 %3913 }
 0x4ae   : > { %v4209_v59 = vsel %vm4180_vm15, %v4176_v55, %v3914_v21 }
 0x4af   : > { %v3754_v54 = vpop.permute.xlu0 %3753  ;;  %3387 = vrot.lane.b32.xlu1 %v8080_v53, %s5077_s20  ;;  %4826 = vmatprep.subr.msk.mxu0 %vm4385_vm1, %v4209_v59  ;;  %v8150_v59 = vld [vmem:[#allocation3 + $0x10a] sm:$0xff] }
 0x4b0   : > { %v4160_v29 = vsel %vm4147_vm14, %v4127_v57, %v3754_v54  ;;  %v8156_v54 = vld [vmem:[#allocation3 + $0x49] sm:$0xff] }
 0x4b1   : > { %3773 = vrot.lane.b32.xlu0 %v7943_v9, %s5080_s25  ;;  %v3528_v24 = vpop.permute.xlu1 %3527 }
 0x4b2   : > { %v4109_v44 = vsel %vm4081_vm13, %v4076_v37, %v3528_v24  ;;  %v4011_v24 = vsel %vm1946_vm5, %v3979_v52, %v7761_v20 }
 0x4b3   : > { %v3368_v45 = vpop.permute.xlu0 %3367  ;;  %3901 = vrot.lane.b32.xlu1 %v2919_v36, %s5081_s26  ;;  %v4043_v36 = vsel %vm2012_vm7, %v4011_v24, %v7891_v33 }
 0x4b4   : > { %v4060_v30 = vsel %vm2078_vm9, %v4028_v25, %v3368_v45  ;;  %v9094_v25 = vld [vmem:[#allocation80_spill] sm:$0xff] }
 0x4b5   : > { %3741 = vrot.lane.b32.xlu0 %v7963_v46, %s5080_s25  ;;  %v3496_v60 = vpop.permute.xlu1 %3495 }
 0x4b6   : > { %v4093_v4 = vsel %vm4081_vm13, %v4060_v30, %v3496_v60  ;;  %v2837_v60 = vld [vmem:[#allocation3 + $0x60] sm:$0xff] }
 0x4b7   : > { %v3882_v9 = vpop.permute.xlu0 %3881  ;;  %3515 = vrot.lane.b32.xlu1 %v8100_v19, %s5078_s10 }
 0x4b8   : > { %v4193_v7 = vsel %vm4180_vm15, %v4160_v29, %v3882_v9  ;;  %v2853_v9 = vld [vmem:[#allocation3 + $0x120] sm:$0xff] }
 0x4b9   : > { %3355 = vrot.lane.b32.xlu0 %v8106_v3, %s5077_s20  ;;  %4827 = vmatpush3.xpose.msk.msra.mxu0 %vm4385_vm1, %v4193_v7  ;;  %v3624_v46 = vpop.permute.xlu1 %3623 }
 0x4ba   : > { %v4126_v21 = vsel %vm4114_vm12, %v4093_v4, %v3624_v46  ;;  %v8181_v46 = vld [vmem:[#allocation3 + $0xf9] sm:$0xff]  ;;  %v2836_v4 = vld [vmem:[#allocation3 + $0x50] sm:$0xff] }
 0x4bb   : > { %v3656_v39 = vpop.permute.xlu0 %3655  ;;  %3483 = vrot.lane.b32.xlu1 %v8114_v62, %s5078_s10 }
 0x4bc   : > { %v4142_v51 = vsel %vm4114_vm12, %v4109_v44, %v3656_v39  ;;  %v9091_v39 = vld [vmem:[#allocation113_spill] sm:$0xff] }
 0x4bd   : > { %3869 = vrot.lane.b32.xlu0 %v2903_v27, %s5081_s26  ;;  %v3398_v13 = vpop.permute.xlu1 %3397  ;;  %v2917_v44 = vld [vmem:[#allocation3 + $0x122] sm:$0xff] }
 0x4be   : > { %v4075_v45 = vsel %vm2078_vm9, %v4043_v36, %v3398_v13 }
 0x4bf   : > { %v3784_v11 = vpop.permute.xlu0 %3783  ;;  %3611 = vrot.lane.b32.xlu1 %v2838_v26, %s5079_s13 }
 0x4c0   : > { %v4175_v63 = vsel %vm4147_vm14, %v4142_v51, %v3784_v11 }
 0x4c1   : > { %3643 = vrot.lane.b32.xlu0 %v2854_v14, %s5079_s13  ;;  %v3912_v23 = vpop.permute.xlu1 %3911  ;;  %v8201_v14 = vld [vmem:[#allocation3 + $0xfa] sm:$0xff] }
 0x4c2   : > { %v4208_v35 = vsel %vm4180_vm15, %v4175_v63, %v3912_v23 }
 0x4c3   : > { %v3752_v0 = vpop.permute.xlu0 %3751  ;;  %3385 = vrot.lane.b32.xlu1 %v8130_v32, %s5077_s20  ;;  %4828 = vmatprep.subr.msk.mxu0 %vm4385_vm1, %v4208_v35  ;;  %v8207_v35 = vld [vmem:[#allocation3 + $0x39] sm:$0xff] }
 0x4c4   : > { %v4159_v2 = vsel %vm4147_vm14, %v4126_v21, %v3752_v0  ;;  %v8215_v0 = vld [vmem:[#allocation3 + $0x3a] sm:$0xff] }
 0x4c5   : > { %3771 = vrot.lane.b32.xlu0 %v7983_v42, %s5080_s25  ;;  %v3526_v48 = vpop.permute.xlu1 %3525 }
 0x4c6   : > { %v4108_v5 = vsel %vm4081_vm13, %v4075_v45, %v3526_v48  ;;  %v4042_v48 = vsel %vm2012_vm7, %v4010_v16, %v9094_v25  ;;  %v9098_v45 = vld [vmem:[#allocation97_spill] sm:$0xff] }
 0x4c7   : > { %v3366_v8 = vpop.permute.xlu0 %3365  ;;  %3899 = vrot.lane.b32.xlu1 %v2918_v31, %s5081_s26  ;;  %v4992_v16 = vld [vmem:[#allocation3 + $0x60] sm:$0xff] }
 0x4c9   : > { %3739 = vrot.lane.b32.xlu0 %v8010_v47, %s5080_s25  ;;  %v3494_v55 = vpop.permute.xlu1 %3493 }
 0x4cb   : > { %v3880_v42 = vpop.permute.xlu0 %3879  ;;  %3513 = vrot.lane.b32.xlu1 %v8150_v59, %s5078_s10 }
 0x4cc   : > { %v4192_v38 = vsel %vm4180_vm15, %v4159_v2, %v3880_v42  ;;  %v2852_v2 = vld [vmem:[#allocation3 + $0x110] sm:$0xff] }
 0x4cd   : > { %3353 = vrot.lane.b32.xlu0 %v8156_v54, %s5077_s20  ;;  %4829 = vmatpush3.xpose.msk.msra.mxu0 %vm4385_vm1, %v4192_v38  ;;  %v3622_v47 = vpop.permute.xlu1 %3621 }
 0x4cf   : > { %v3654_v43 = vpop.permute.xlu0 %3653  ;;  %3481 = vrot.lane.b32.xlu1 %v8164_v17, %s5078_s10 }
 0x4d0   : > { %v4141_v57 = vsel %vm4114_vm12, %v4108_v5, %v3654_v43  ;;  %v9097_v43 = vld [vmem:[#allocation14_spill] sm:$0xff] }
 0x4d1   : > { %3867 = vrot.lane.b32.xlu0 %v8018_v10, %s5081_s26  ;;  %v3396_v34 = vpop.permute.xlu1 %3395  ;;  %v9089_v10 = vld [vmem:[#allocation20_spill] sm:$0xff] }
 0x4d2   : > { %v3963_v6 = vsel %vm1880_vm2, %v9090_v12, %v9089_v10  ;;  %v4074_v30 = vsel %vm2078_vm9, %v4042_v48, %v3396_v34  ;;  %v8259_v12 = vld [vmem:[#allocation3 + $0x31] sm:$0xff] }
 0x4d3   : > { %v3782_v29 = vpop.permute.xlu0 %3781  ;;  %3609 = vrot.lane.b32.xlu1 %v2837_v60, %s5079_s13  ;;  %v3995_v49 = vsel %vm1946_vm5, %v3963_v6, %v9091_v39  ;;  %v9100_v6 = vld [vmem:[#allocation65_spill] sm:$0xff]  ;;  %v8267_v39 = vld [vmem:[#allocation3 + $0x32] sm:$0xff] }
 0x4d4   : > { %v4174_v20 = vsel %vm4147_vm14, %v4141_v57, %v3782_v29  ;;  %v4027_v27 = vsel %vm2012_vm7, %v3995_v49, %v7825_v40  ;;  %v9101_v49 = vld [vmem:[#allocation29_spill] sm:$0xff]  ;;  %v9104_v48 = vld [vmem:[#allocation24_spill] sm:$0xff] }
 0x4d5   : > { %3641 = vrot.lane.b32.xlu0 %v2853_v9, %s5079_s13  ;;  %v3910_v33 = vpop.permute.xlu1 %3909  ;;  %v4059_v13 = vsel %vm2078_vm9, %v4027_v27, %v3366_v8 }
 0x4d6   : > { %v4207_v7 = vsel %vm4180_vm15, %v4174_v20, %v3910_v33  ;;  %v4092_v51 = vsel %vm4081_vm13, %v4059_v13, %v3494_v55  ;;  %v8253_v33 = vld [vmem:[#allocation3 + $0xf2] sm:$0xff] }
 0x4d7   : > { %v3750_v58 = vpop.permute.xlu0 %3749  ;;  %3383 = vrot.lane.b32.xlu1 %v8181_v46, %s5077_s20  ;;  %4830 = vmatprep.subr.msk.mxu0 %vm4385_vm1, %v4207_v7  ;;  %v4125_v63 = vsel %vm4114_vm12, %v4092_v51, %v3622_v47  ;;  %v8232_v47 = vld [vmem:[#allocation3 + $0xf1] sm:$0xff] }
 0x4d8   : > { %v4158_v40 = vsel %vm4147_vm14, %v4125_v63, %v3750_v58  ;;  %v9102_v13 = vld [vmem:[#allocation83_spill] sm:$0xff]  ;;  %v2835_v63 = vld [vmem:[#allocation3 + $0x48] sm:$0xff] }
 0x4d9   : > { %3769 = vrot.lane.b32.xlu0 %v8031_v41, %s5080_s25  ;;  %v3524_v37 = vpop.permute.xlu1 %3523 }
 0x4da   : > { %v4107_v8 = vsel %vm4081_vm13, %v4074_v30, %v3524_v37 }
 0x4db   : > { %v3364_v26 = vpop.permute.xlu0 %3363  ;;  %3897 = vrot.lane.b32.xlu1 %v2917_v44, %s5081_s26 }
 0x4dd   : > { %3737 = vrot.lane.b32.xlu0 %v8055_v15, %s5080_s25  ;;  %v3492_v11 = vpop.permute.xlu1 %3491 }
 0x4df   : > { %v3878_v41 = vpop.permute.xlu0 %3877  ;;  %3511 = vrot.lane.b32.xlu1 %v8201_v14, %s5078_s10 }
 0x4e0   : > { %v4191_v23 = vsel %vm4180_vm15, %v4158_v40, %v3878_v41 }
 0x4e1   : > { %3351 = vrot.lane.b32.xlu0 %v8207_v35, %s5077_s20  ;;  %4831 = vmatpush3.xpose.msk.msra.mxu0 %vm4385_vm1, %v4191_v23  ;;  %v3620_v15 = vpop.permute.xlu1 %3619 }
 0x4e3   : > { %v3652_v61 = vpop.permute.xlu0 %3651  ;;  %3479 = vrot.lane.b32.xlu1 %v8215_v0, %s5078_s10 }
 0x4e4   : > { %v4140_v55 = vsel %vm4114_vm12, %v4107_v8, %v3652_v61 }
 0x4e5   : > { %3865 = vrot.lane.b32.xlu0 %v8063_v56, %s5081_s26  ;;  %v3394_v31 = vpop.permute.xlu1 %3393  ;;  %v9095_v56 = vld [vmem:[#allocation25_spill] sm:$0xff] }
 0x4e6   : > { %v3962_v52 = vsel %vm1880_vm2, %v9096_v18, %v9095_v56 }
 0x4e7   : > { %v3780_v21 = vpop.permute.xlu0 %3779  ;;  %3607 = vrot.lane.b32.xlu1 %v2836_v4, %s5079_s13  ;;  %v3994_v36 = vsel %vm1946_vm5, %v3962_v52, %v9097_v43  ;;  %v2769_v52 = vld [vmem:[#allocation3 + $0x21] sm:$0xff] }
 0x4e8   : > { %v4173_v50 = vsel %vm4147_vm14, %v4140_v55, %v3780_v21  ;;  %v4026_v34 = vsel %vm2012_vm7, %v3994_v36, %v9098_v45  ;;  %v9106_v43 = vld [vmem:[#allocation73_spill] sm:$0xff]  ;;  %v9107_v45 = vld [vmem:[#allocation98_spill] sm:$0xff] }
 0x4e9   : > { %3639 = vrot.lane.b32.xlu0 %v2852_v2, %s5079_s13  ;;  %v3908_v42 = vpop.permute.xlu1 %3907  ;;  %v4058_v60 = vsel %vm2078_vm9, %v4026_v34, %v3364_v26  ;;  %v2801_v36 = vld [vmem:[#allocation3 + $0x22] sm:$0xff] }
 0x4ea   : > { %v4206_v38 = vsel %vm4180_vm15, %v4173_v50, %v3908_v42  ;;  %v4091_v29 = vsel %vm4081_vm13, %v4058_v60, %v3492_v11  ;;  %v9108_v60 = vld [vmem:[#allocation42_spill] sm:$0xff] }
 0x4eb   : > { %v3748_v24 = vpop.permute.xlu0 %3747  ;;  %3381 = vrot.lane.b32.xlu1 %v8232_v47, %s5077_s20  ;;  %4832 = vmatprep.subr.msk.mxu0 %vm4385_vm1, %v4206_v38  ;;  %v4124_v9 = vsel %vm4114_vm12, %v4091_v29, %v3620_v15  ;;  %v2851_v15 = vld [vmem:[#allocation3 + $0x108] sm:$0xff] }
 0x4ec   : > { %v4157_v7 = vsel %vm4147_vm14, %v4124_v9, %v3748_v24  ;;  %v2817_v38 = vld [vmem:[#allocation3 + $0xe2] sm:$0xff]  ;;  %v4993_v24 = vld [vmem:[#allocation3 + $0x110] sm:$0xff] }
 0x4ed   : > { %3767 = vrot.lane.b32.xlu0 %v8080_v53, %s5080_s25  ;;  %v3522_v5 = vpop.permute.xlu1 %3521 }
 0x4ef   : > { %v3362_v57 = vpop.permute.xlu0 %3361  ;;  %3895 = vrot.lane.b32.xlu1 %v8100_v19, %s5081_s26 }
 0x4f1   : > { %3735 = vrot.lane.b32.xlu0 %v8106_v3, %s5080_s25  ;;  %v3490_v20 = vpop.permute.xlu1 %3489  ;;  %v9099_v3 = vld [vmem:[#allocation94_spill] sm:$0xff] }
 0x4f2   : > { %v3977_v58 = vsel %vm1880_vm2, %v9100_v6, %v9099_v3  ;;  %v2850_v3 = vld [vmem:[#allocation3 + $0xf8] sm:$0xff] }
 0x4f3   : > { %v3876_v53 = vpop.permute.xlu0 %3875  ;;  %3509 = vrot.lane.b32.xlu1 %v8253_v33, %s5078_s10  ;;  %v4009_v27 = vsel %vm1946_vm5, %v3977_v58, %v9101_v49  ;;  %v2784_v49 = vld [vmem:[#allocation3 + $0xd9] sm:$0xff] }
 0x4f4   : > { %v4190_v10 = vsel %vm4180_vm15, %v4157_v7, %v3876_v53  ;;  %v4041_v44 = vsel %vm2012_vm7, %v4009_v27, %v9102_v13  ;;  %v2834_v7 = vld [vmem:[#allocation3 + $0x38] sm:$0xff]  ;;  %v4994_v27 = vld [vmem:[#allocation3 + $0x50] sm:$0xff] }
 0x4f5   : > { %3349 = vrot.lane.b32.xlu0 %v8259_v12, %s5077_s20  ;;  %4833 = vmatpush3.xpose.msk.msra.mxu0 %vm4385_vm1, %v4190_v10  ;;  %v3618_v19 = vpop.permute.xlu1 %3617  ;;  %v4073_v26 = vsel %vm2078_vm9, %v4041_v44, %v3394_v31  ;;  %v9105_v31 = vld [vmem:[#allocation100_spill] sm:$0xff]  ;;  %v9110_v44 = vld [vmem:[#allocation93_spill] sm:$0xff] }
 0x4f6   : > { %v4106_v11 = vsel %vm4081_vm13, %v4073_v26, %v3522_v5 }
 0x4f7   : > { %v3650_v37 = vpop.permute.xlu0 %3649  ;;  %3477 = vrot.lane.b32.xlu1 %v8267_v39, %s5078_s10 }
 0x4f8   : > { %v4139_v40 = vsel %vm4114_vm12, %v4106_v11, %v3650_v37 }
 0x4f9   : > { %3863 = vrot.lane.b32.xlu0 %v8114_v62, %s5081_s26  ;;  %v3392_v51 = vpop.permute.xlu1 %3391  ;;  %v9103_v62 = vld [vmem:[#allocation71_spill] sm:$0xff] }
 0x4fa   : > { %v3961_v61 = vsel %vm1880_vm2, %v4992_v16, %v9103_v62  ;;  %v2768_v62 = vld [vmem:[#allocation3 + $0x19] sm:$0xff] }
 0x4fb   : > { %v3778_v41 = vpop.permute.xlu0 %3777  ;;  %3605 = vrot.lane.b32.xlu1 %v2835_v63, %s5079_s13  ;;  %v3993_v30 = vsel %vm1946_vm5, %v3961_v61, %v9104_v48  ;;  %v4995_v61 = vld [vmem:[#allocation3 + $0x108] sm:$0xff]  ;;  %v2800_v48 = vld [vmem:[#allocation3 + $0x1a] sm:$0xff] }
 0x4fc   : > { %v4172_v23 = vsel %vm4147_vm14, %v4139_v40, %v3778_v41  ;;  %v4025_v8 = vsel %vm2012_vm7, %v3993_v30, %v9105_v31  ;;  %v9113_v30 = vld [vmem:[#allocation18_spill] sm:$0xff] }
 0x4fd   : > { %3637 = vrot.lane.b32.xlu0 %v2851_v15, %s5079_s13  ;;  %v3906_v1 = vpop.permute.xlu1 %3905  ;;  %v4057_v55 = vsel %vm2078_vm9, %v4025_v8, %v3362_v57 }
 0x4fe   : > { %v4205_v22 = vsel %vm4180_vm15, %v4172_v23, %v3906_v1  ;;  %v4090_v50 = vsel %vm4081_vm13, %v4057_v55, %v3490_v20 }
 0x4ff   : > { %v3746_v25 = vpop.permute.xlu0 %3745  ;;  %3379 = vrot.lane.b32.xlu1 %v2785_v28, %s5077_s20  ;;  %4834 = vmatprep.subr.msk.mxu0 %vm4385_vm1, %v4205_v22  ;;  %v4123_v42 = vsel %vm4114_vm12, %v4090_v50, %v3618_v19  ;;  %v2816_v22 = vld [vmem:[#allocation3 + $0xda] sm:$0xff] }
 0x500   : > { %v4156_v56 = vsel %vm4147_vm14, %v4123_v42, %v3746_v25  ;;  %v9112_v25 = vld [vmem:[#allocation75_spill] sm:$0xff] }
 0x501   : > { %3765 = vrot.lane.b32.xlu0 %v8130_v32, %s5080_s25  ;;  %v3520_v4 = vpop.permute.xlu1 %3519  ;;  %v2833_v42 = vld [vmem:[#allocation3 + $0x30] sm:$0xff] }
 0x503   : > { %v3360_v21 = vpop.permute.xlu0 %3359  ;;  %3893 = vrot.lane.b32.xlu1 %v8150_v59, %s5081_s26 }
 0x505   : > { %3733 = vrot.lane.b32.xlu0 %v8156_v54, %s5080_s25  ;;  %v3488_v2 = vpop.permute.xlu1 %3487  ;;  %v3976_v54 = vsel %vm1880_vm2, %v4993_v24, %v9106_v43  ;;  %v4996_v43 = vld [vmem:[#allocation3 + $0x48] sm:$0xff] }
 0x506   : > { %v4008_v34 = vsel %vm1946_vm5, %v3976_v54, %v9107_v45  ;;  %v9115_v54 = vld [vmem:[#allocation16_spill] sm:$0xff] }
 0x507   : > { %v3874_v18 = vpop.permute.xlu0 %3873  ;;  %3507 = vrot.lane.b32.xlu1 %v2817_v38, %s5078_s10  ;;  %v4040_v57 = vsel %vm2012_vm7, %v4008_v34, %v9108_v60  ;;  %v4214_v38 = vld [vmem:[%s8576_s3] sm:$0xff]  ;;  %v9116_v34 = vld [vmem:[#allocation96_spill] sm:$0xff]  ;;  %v9117_v60 = vld [vmem:[#allocation81_spill] sm:$0xff] }
 0x508   : > { %v4189_v32 = vsel %vm4180_vm15, %v4156_v56, %v3874_v18  ;;  %v4072_v29 = vsel %vm2078_vm9, %v4040_v57, %v3392_v51  ;;  %v9111_v51 = vld [vmem:[#allocation78_spill] sm:$0xff]  ;;  %v8361_v56 = vld [vmem:[%s8575_s2] sm:$0xff]  ;;  %4818 = vmatprep.mubr.msk.f32.mxu1 %vm446_vm0, %v4214_v38 }
 0x509   : > { %3347 = vrot.lane.b32.xlu0 %v2769_v52, %s5077_s20  ;;  %4835 = vmatpush3.xpose.msk.msra.mxu0 %vm4385_vm1, %v4189_v32  ;;  %v3616_v59 = vpop.permute.xlu1 %3615  ;;  %v4105_v9 = vsel %vm4081_vm13, %v4072_v29, %v3520_v4  ;;  %v9114_v4 = vld [vmem:[#allocation47_spill] sm:$0xff] }
 0x50a   : > { %v2849_v52 = vld [vmem:[#allocation3 + $0xf0] sm:$0xff]  ;;  %4819 = vmatmul.mubr.msk.f32.vlgmr.msra.gmra.mxu1 %vm446_vm0, %v4214_v38  ;;  %4852 = vmatprep.mubr.msk.f32.mxu0 %vm4385_vm1, %v8361_v56 }
 0x50b   : > { %v3648_v5 = vpop.permute.xlu0 %3647  ;;  %3475 = vrot.lane.b32.xlu1 %v2801_v36, %s5078_s10  ;;  %v3959_v36 = vsel %vm1880_vm2, %v4996_v43, %v9115_v54 }
 0x50c   : > { %v4138_v53 = vsel %vm4114_vm12, %v4105_v9, %v3648_v5  ;;  %v3991_v5 = vsel %vm1946_vm5, %v3959_v36, %v9116_v34 }
 0x50d   : > { %3861 = vrot.lane.b32.xlu0 %v8164_v17, %s5081_s26  ;;  %v3390_v20 = vpop.permute.xlu1 %3389  ;;  %v9109_v17 = vld [vmem:[#allocation12_spill] sm:$0xff]  ;;  %v4023_v57 = vsel %vm2012_vm7, %v3991_v5, %v9117_v60  ;;  %v5000_v5 = vld [vmem:[#allocation3 + $0x30] sm:$0xff] }
 0x50e   : > { %v3960_v37 = vsel %vm1880_vm2, %v4994_v27, %v9109_v17  ;;  %v9127_v60 = vld [vmem:[#allocation72_spill] sm:$0xff] }
 0x50f   : > { %v3776_v10 = vpop.permute.xlu0 %3775  ;;  %3603 = vrot.lane.b32.xlu1 %v2834_v7, %s5079_s13  ;;  %v3992_v26 = vsel %vm1946_vm5, %v3960_v37, %v9110_v44 }
 0x510   : > { %v4171_v19 = vsel %vm4147_vm14, %v4138_v53, %v3776_v10  ;;  %v4024_v11 = vsel %vm2012_vm7, %v3992_v26, %v9111_v51 }
 0x511   : > { %3635 = vrot.lane.b32.xlu0 %v2850_v3, %s5079_s13  ;;  %v3904_v6 = vpop.permute.xlu1 %3903  ;;  %v4056_v40 = vsel %vm2078_vm9, %v4024_v11, %v3360_v21 }
 0x512   : > { %v4204_v58 = vsel %vm4180_vm15, %v4171_v19, %v3904_v6  ;;  %v4089_v23 = vsel %vm4081_vm13, %v4056_v40, %v3488_v2  ;;  %v4997_v6 = vld [vmem:[#allocation3 + $0xf8] sm:$0xff] }
 0x513   : > { %v3744_v13 = vpop.permute.xlu0 %3743  ;;  %3377 = vrot.lane.b32.xlu1 %v2784_v49, %s5077_s20  ;;  %4836 = vmatprep.subr.msk.mxu0 %vm4385_vm1, %v4204_v58  ;;  %v4122_v1 = vsel %vm4114_vm12, %v4089_v23, %v3616_v59  ;;  %v9118_v58 = vld [vmem:[#allocation26_spill] sm:$0xff]  ;;  %v9119_v49 = vld [vmem:[#allocation79_spill] sm:$0xff]  ;;  %v4998_v23 = vld [vmem:[#allocation3 + $0x38] sm:$0xff] }
 0x514   : > { %v4155_v28 = vsel %vm4147_vm14, %v4122_v1, %v3744_v13 }
 0x515   : > { %3763 = vrot.lane.b32.xlu0 %v8181_v46, %s5080_s25  ;;  %v3518_v63 = vpop.permute.xlu1 %3517 }
 0x517   : > { %v3358_v41 = vpop.permute.xlu0 %3357  ;;  %3891 = vrot.lane.b32.xlu1 %v8201_v14, %s5081_s26 }
 0x519   : > { %3731 = vrot.lane.b32.xlu0 %v8207_v35, %s5080_s25  ;;  %v3486_v15 = vpop.permute.xlu1 %3485  ;;  %v3975_v35 = vsel %vm1880_vm2, %v4995_v61, %v9112_v25 }
 0x51a   : > { %v4007_v31 = vsel %vm1946_vm5, %v3975_v35, %v9113_v30 }
 0x51b   : > { %v3872_v16 = vpop.permute.xlu0 %3871  ;;  %3505 = vrot.lane.b32.xlu1 %v2816_v22, %s5078_s10  ;;  %v4039_v55 = vsel %vm2012_vm7, %v4007_v31, %v9114_v4 }
 0x51c   : > { %v4188_v46 = vsel %vm4180_vm15, %v4155_v28, %v3872_v16  ;;  %v4071_v21 = vsel %vm2078_vm9, %v4039_v55, %v3390_v20  ;;  %v4055_v20 = vsel %vm2078_vm9, %v4023_v57, %v3358_v41  ;;  %v9122_v28 = vld [vmem:[#allocation74_spill] sm:$0xff]  ;;  %v3957_v57 = vsel %vm1880_vm2, %v5000_v5, %v9127_v60 }
 0x51d   : > { %3345 = vrot.lane.b32.xlu0 %v2768_v62, %s5077_s20  ;;  %4837 = vmatpush3.xpose.msk.msra.mxu0 %vm4385_vm1, %v4188_v46  ;;  %v3614_v14 = vpop.permute.xlu1 %3613  ;;  %v4104_v2 = vsel %vm4081_vm13, %v4071_v21, %v3518_v63  ;;  %v9123_v46 = vld [vmem:[#allocation38_spill] sm:$0xff]  ;;  %v4999_v21 = vld [vmem:[#allocation3 + $0xf0] sm:$0xff]  ;;  %s296_s20 = sand.u32 1, %s5059_s28  }
 0x51e   : > { %s4636_s21 = sshll.u32 %s296_s20, 4 }
 0x51f   : > { %v3646_v8 = vpop.permute.xlu0 %3645  ;;  %3473 = vrot.lane.b32.xlu1 %v2800_v48, %s5078_s10  ;;  %s298_s23 = scalar_lea.vmem [#allocation4], %s4636_s21 }
 0x520   : > { %v4137_v18 = vsel %vm4114_vm12, %v4104_v2, %v3646_v8  ;;  %s4573_s24 = sshll.u32 %s298_s23, 4  ;;  %s4574_s24 = int_to_ptr.vmem [resolvable:$true] %s4573_s24 }
 0x521   : > { %3859 = vrot.lane.b32.xlu0 %v8215_v0, %s5081_s26  ;;  %v3388_v50 = vpop.permute.xlu1 %3387  ;;  %s5007_s18 = scalar_lea.vmem %s4574_s24, 256  ;;  %p5014_p0 = scmp.lt.s32.totalorder %s4574_s24, %s5012_s12 }
 0x522   : > { %p5008_p11 = scmp.ne.s32.totalorder %s4574_s24, %s5007_s18  ;;  %p5015_p1 = scmp.lt.s32.totalorder %s5013_s17, %s5007_s18 }
 0x523   : > { %v3774_v32 = vpop.permute.xlu0 %3773  ;;  %3601 = vrot.lane.b32.xlu1 %v2833_v42, %s5079_s13  ;;  %v9125_v42 = vld [vmem:[#allocation95_spill] sm:$0xff] }
 0x524   : > { %v4170_v0 = vsel %vm4147_vm14, %v4137_v18, %v3774_v32  ;;  %v9126_v32 = vld [vmem:[#allocation140_spill] sm:$0xff]  ;;  %p5009_p12 = pnand %p5008_p11, %p5166_p5  ;;  %p5016_p2 = por %p5015_p1, %p5014_p0 }
 0x525   : > { %3633 = vrot.lane.b32.xlu0 %v2849_v52, %s5079_s13  ;;  %v3902_v59 = vpop.permute.xlu1 %3901 }
 0x526   : > { %v4203_v24 = vsel %vm4180_vm15, %v4170_v0, %v3902_v59  ;;  %p5010_p13 = pneg %p5009_p12 }
 0x527   : > { %v3742_v45 = vpop.permute.xlu0 %3741  ;;  %3729 = vrot.lane.b32.xlu1 %v8259_v12, %s5080_s25  ;;  %4838 = vmatprep.subr.msk.mxu0 %vm4385_vm1, %v4203_v24  ;;  %v4088_v12 = vsel %vm4081_vm13, %v4055_v20, %v3486_v15  ;;  %v9121_v15 = vld [vmem:[#allocation69_spill] sm:$0xff] }
 0x528   : > { %v4121_v53 = vsel %vm4114_vm12, %v4088_v12, %v3614_v14  ;;  %v3958_v1 = vsel %vm1880_vm2, %v4998_v23, %v9121_v15  ;;  %v9128_v20 = vld [vmem:[#allocation77_spill] sm:$0xff]  ;;  %v9129_v12 = vld [vmem:[#allocation43_spill] sm:$0xff]  ;;  %p5017_p3 = pnand %p5016_p2, %p5010_p13 }
 0x529   : > { %3761 = vrot.lane.b32.xlu0 %v8232_v47, %s5080_s25  ;;  %v3516_v29 = vpop.permute.xlu1 %3515  ;;  %v4154_v10 = vsel %vm4147_vm14, %v4121_v53, %v3742_v45  ;;  %v3990_v16 = vsel %vm1946_vm5, %v3958_v1, %v9122_v28  ;;  %s4571_s25 = scalar_lea.hbm %s8581_s8, %s4748_s22 }
 0x52a   : > { %v4022_v62 = vsel %vm2012_vm7, %v3990_v16, %v9123_v46  ;;  %v5002_v16 = vld [vmem:[#allocation3 + $0x20] sm:$0xff] }
 0x52b   : > { %v3356_v9 = vpop.permute.xlu0 %3355  ;;  %3857 = vrot.lane.b32.xlu1 %v8267_v39, %s5081_s26  ;;  %v3974_v39 = vsel %vm1880_vm2, %v4997_v6, %v9118_v58  ;;  %v9133_v46 = vld [vmem:[#allocation13_spill] sm:$0xff] }
 0x52c   : > { %v4006_v27 = vsel %vm1946_vm5, %v3974_v39, %v9119_v49  ;;  %v4054_v61 = vsel %vm2078_vm9, %v4022_v62, %v3356_v9  ;;  %v3989_v9 = vsel %vm1946_vm5, %v3957_v57, %v9128_v20  ;;  %v3956_v62 = vsel %vm1880_vm2, %v5002_v16, %v9133_v46 }
 0x52d   : > { %3889 = vrot.lane.b32.xlu0 %v8253_v33, %s5081_s26  ;;  %v3484_v7 = vpop.permute.xlu1 %3483  ;;  %v9120_v33 = vld [vmem:[#allocation137_spill] sm:$0xff]  ;;  %s4559_s26 = scalar_lea.sflag [#allocation5], %s296_s20 }
 0x52e   : > { %v4038_v37 = vsel %vm2012_vm7, %v4006_v27, %v9120_v33  ;;  %v4087_v35 = vsel %vm4081_vm13, %v4054_v61, %v3484_v7  ;;  %v4021_v7 = vsel %vm2012_vm7, %v3989_v9, %v9129_v12  ;;  %v9130_v33 = vld [vmem:[#allocation130_spill] sm:$0xff]  ;;  %v5004_v9 = vld [vmem:[#allocation3 + $0x18] sm:$0xff]  ;;  %v9139_v12 = vld [vmem:[#allocation17_spill] sm:$0xff] }
 0x52f   : > { %v3870_v19 = vpop.permute.xlu0 %3869  ;;  %v4070_v13 = vsel %vm2078_vm9, %v4038_v37, %v3388_v50  ;;  %v9124_v50 = vld [vmem:[#allocation31_spill] sm:$0xff]  ;;  %v9134_v61 = vld [vmem:[#allocation30_spill] sm:$0xff] }
 0x530   : > { %v4187_v47 = vsel %vm4180_vm15, %v4154_v10, %v3870_v19  ;;  %v4103_v26 = vsel %vm4081_vm13, %v4070_v13, %v3516_v29  ;;  %v3973_v2 = vsel %vm1880_vm2, %v4999_v21, %v9124_v50  ;;  %v9131_v13 = vld [vmem:[#allocation39_spill] sm:$0xff] }
 0x531   : > { %4839 = vmatpush3.xpose.msk.msra.mxu0 %vm4385_vm1, %v4187_v47  ;;  %v3612_v3 = vpop.permute.xlu1 %3611  ;;  %v4005_v38 = vsel %vm1946_vm5, %v3973_v2, %v9125_v42 }
 0x532   : > { %v4120_v30 = vsel %vm4114_vm12, %v4087_v35, %v3612_v3  ;;  %v4037_v0 = vsel %vm2012_vm7, %v4005_v38, %v9126_v32  ;;  %v9135_v35 = vld [vmem:[#allocation135_spill] sm:$0xff]  ;;  %v9136_v32 = vld [vmem:[#allocation132_spill] sm:$0xff] }
 0x533   : > { %v3644_v17 = vpop.permute.xlu0 %3643 }
 0x534   : > { %v4136_v51 = vsel %vm4114_vm12, %v4103_v26, %v3644_v17  ;;  %v5001_v17 = vld [vmem:[#allocation3 + $0xe0] sm:$0xff] }
 0x535   : > { %v3386_v44 = vpop.permute.xlu1 %3385  ;;  %v3972_v37 = vsel %vm1880_vm2, %v5001_v17, %v9130_v33 }
 0x536   : > { %v4069_v52 = vsel %vm2078_vm9, %v4037_v0, %v3386_v44  ;;  %v4004_v44 = vsel %vm1946_vm5, %v3972_v37, %v9131_v13 }
 0x537   : > { %v3772_v11 = vpop.permute.xlu0 %3771 }
 0x538   : > { %v4169_v63 = vsel %vm4147_vm14, %v4136_v51, %v3772_v11  ;;  %v9132_v51 = vld [vmem:[#allocation114_spill] sm:$0xff] }
 0x539   : > { %v3900_v40 = vpop.permute.xlu1 %3899  ;;  %v4036_v11 = vsel %vm2012_vm7, %v4004_v44, %v9132_v51  ;;  %v9142_v51 = vld [vmem:[#allocation27_spill] sm:$0xff] }
 0x53a   : > { %v4202_v41 = vsel %vm4180_vm15, %v4169_v63, %v3900_v40 }
 0x53b   : > { %v3740_v22 = vpop.permute.xlu0 %3739  ;;  %4840 = vmatprep.subr.msk.mxu0 %vm4385_vm1, %v4202_v41 }
 0x53c   : > { %v4153_v31 = vsel %vm4147_vm14, %v4120_v30, %v3740_v22 }
 0x53d   : > { %v3514_v14 = vpop.permute.xlu1 %3513 }
 0x53e   : > { %v4102_v24 = vsel %vm4081_vm13, %v4069_v52, %v3514_v14  ;;  %v9137_v52 = vld [vmem:[#allocation76_spill] sm:$0xff] }
 0x53f   : > { %v3354_v25 = vpop.permute.xlu0 %3353 }
 0x540   : > { %v4053_v10 = vsel %vm2078_vm9, %v4021_v7, %v3354_v25  ;;  %v3988_v25 = vsel %vm1946_vm5, %v3956_v62, %v9134_v61  ;;  %v3955_v7 = vsel %vm1880_vm2, %v5004_v9, %v9139_v12  ;;  %v2641_v62 = vld [vmem:[#allocation3 + $0x8] sm:$0xff]  ;;  %v9152_v12 = vld [vmem:[#allocation115_spill] sm:$0xff] }
 0x541   : > { %v3482_v48 = vpop.permute.xlu1 %3481 }
 0x542   : > { %v4086_v47 = vsel %vm4081_vm13, %v4053_v10, %v3482_v48  ;;  %v4020_v48 = vsel %vm2012_vm7, %v3988_v25, %v9135_v35  ;;  %v9140_v10 = vld [vmem:[#allocation35_spill] sm:$0xff]  ;;  %v9145_v35 = vld [vmem:[#allocation66_spill] sm:$0xff] }
 0x543   : > { %v3868_v8 = vpop.permute.xlu0 %3867 }
 0x544   : > { %v4186_v4 = vsel %vm4180_vm15, %v4153_v31, %v3868_v8 }
 0x545   : > { %4841 = vmatpush3.xpose.msk.msra.mxu0 %vm4385_vm1, %v4186_v4  ;;  %v3610_v55 = vpop.permute.xlu1 %3609 }
 0x546   : > { %v4119_v6 = vsel %vm4114_vm12, %v4086_v47, %v3610_v55  ;;  %v9141_v47 = vld [vmem:[#allocation138_spill] sm:$0xff] }
 0x547   : > { %v3642_v18 = vpop.permute.xlu0 %3641 }
 0x548   : > { %v4135_v43 = vsel %vm4114_vm12, %v4102_v24, %v3642_v18  ;;  %v5003_v18 = vld [vmem:[#allocation3 + $0xd8] sm:$0xff] }
 0x549   : > { %v3384_v59 = vpop.permute.xlu1 %3383  ;;  %v3971_v0 = vsel %vm1880_vm2, %v5003_v18, %v9136_v32 }
 0x54a   : > { %v4068_v63 = vsel %vm2078_vm9, %v4036_v11, %v3384_v59  ;;  %v4003_v59 = vsel %vm1946_vm5, %v3971_v0, %v9137_v52 }
 0x54b   : > { %v3770_v54 = vpop.permute.xlu0 %3769 }
 0x54c   : > { %v4168_v36 = vsel %vm4147_vm14, %v4135_v43, %v3770_v54  ;;  %v9138_v43 = vld [vmem:[#allocation117_spill] sm:$0xff] }
 0x54d   : > { %v3898_v45 = vpop.permute.xlu1 %3897  ;;  %v4035_v54 = vsel %vm2012_vm7, %v4003_v59, %v9138_v43  ;;  %v2640_v59 = vld [vmem:[#allocation3] sm:$0xff] }
 0x54e   : > { %v4201_v34 = vsel %vm4180_vm15, %v4168_v36, %v3898_v45 }
 0x54f   : > { %v3738_v29 = vpop.permute.xlu0 %3737  ;;  %4842 = vmatprep.subr.msk.mxu0 %vm4385_vm1, %v4201_v34 }
 0x550   : > { %v4152_v58 = vsel %vm4147_vm14, %v4119_v6, %v3738_v29 }
 0x551   : > { %v3512_v53 = vpop.permute.xlu1 %3511 }
 0x552   : > { %v4101_v41 = vsel %vm4081_vm13, %v4068_v63, %v3512_v53  ;;  %v9143_v63 = vld [vmem:[#allocation136_spill] sm:$0xff] }
 0x553   : > { %v3352_v19 = vpop.permute.xlu0 %3351 }
 0x554   : > { %v4052_v31 = vsel %vm2078_vm9, %v4020_v48, %v3352_v19  ;;  %v3987_v19 = vsel %vm1946_vm5, %v3955_v7, %v9140_v10  ;;  %v3954_v48 = vsel %vm1880_vm2, %v2641_v62, %v9145_v35 }
 0x555   : > { %v3480_v3 = vpop.permute.xlu1 %3479 }
 0x556   : > { %v4085_v4 = vsel %vm4081_vm13, %v4052_v31, %v3480_v3  ;;  %v4019_v3 = vsel %vm2012_vm7, %v3987_v19, %v9141_v47  ;;  %v9146_v31 = vld [vmem:[#allocation131_spill] sm:$0xff] }
 0x557   : > { %v3866_v39 = vpop.permute.xlu0 %3865 }
 0x558   : > { %v4185_v49 = vsel %vm4180_vm15, %v4152_v58, %v3866_v39 }
 0x559   : > { %4843 = vmatpush3.xpose.msk.msra.mxu0 %vm4385_vm1, %v4185_v49  ;;  %v3608_v27 = vpop.permute.xlu1 %3607 }
 0x55a   : > { %v4118_v21 = vsel %vm4114_vm12, %v4085_v4, %v3608_v27  ;;  %v9147_v4 = vld [vmem:[#allocation68_spill] sm:$0xff] }
 0x55b   : > { %v3640_v26 = vpop.permute.xlu0 %3639 }
 0x55c   : > { %v4134_v23 = vsel %vm4114_vm12, %v4101_v41, %v3640_v26  ;;  %v5005_v26 = vld [vmem:[#allocation3 + $0xc8] sm:$0xff] }
 0x55d   : > { %v3382_v40 = vpop.permute.xlu1 %3381  ;;  %v3970_v11 = vsel %vm1880_vm2, %v5005_v26, %v9142_v51 }
 0x55e   : > { %v4067_v36 = vsel %vm2078_vm9, %v4035_v54, %v3382_v40  ;;  %v4002_v40 = vsel %vm1946_vm5, %v3970_v11, %v9143_v63  ;;  %v9148_v54 = vld [vmem:[#allocation10_spill] sm:$0xff] }
 0x55f   : > { %v3768_v15 = vpop.permute.xlu0 %3767 }
 0x560   : > { %v4167_v1 = vsel %vm4147_vm14, %v4134_v23, %v3768_v15  ;;  %v9144_v23 = vld [vmem:[#allocation28_spill] sm:$0xff] }
 0x561   : > { %v3896_v22 = vpop.permute.xlu1 %3895  ;;  %v4034_v15 = vsel %vm2012_vm7, %v4002_v40, %v9144_v23 }
 0x562   : > { %v4200_v28 = vsel %vm4180_vm15, %v4167_v1, %v3896_v22 }
 0x563   : > { %v3736_v14 = vpop.permute.xlu0 %3735  ;;  %4844 = vmatprep.subr.msk.mxu0 %vm4385_vm1, %v4200_v28 }
 0x564   : > { %v4151_v50 = vsel %vm4147_vm14, %v4118_v21, %v3736_v14 }
 0x565   : > { %v3510_v30 = vpop.permute.xlu1 %3509 }
 0x566   : > { %v4100_v34 = vsel %vm4081_vm13, %v4067_v36, %v3510_v30  ;;  %v3953_v36 = vsel %vm1880_vm2, %v2640_v59, %v9148_v54 }
 0x567   : > { %v3350_v8 = vpop.permute.xlu0 %3349 }
 0x568   : > { %v4051_v58 = vsel %vm2078_vm9, %v4019_v3, %v3350_v8  ;;  %v3986_v8 = vsel %vm1946_vm5, %v3954_v48, %v9146_v31 }
 0x569   : > { %v3478_v55 = vpop.permute.xlu1 %3477 }
 0x56a   : > { %v4084_v49 = vsel %vm4081_vm13, %v4051_v58, %v3478_v55  ;;  %v4018_v55 = vsel %vm2012_vm7, %v3986_v8, %v9147_v4 }
 0x56b   : > { %v3864_v2 = vpop.permute.xlu0 %3863 }
 0x56c   : > { %v4184_v42 = vsel %vm4180_vm15, %v4151_v50, %v3864_v2 }
 0x56d   : > { %4845 = vmatpush3.xpose.msk.msra.mxu0 %vm4385_vm1, %v4184_v42  ;;  %v3606_v38 = vpop.permute.xlu1 %3605 }
 0x56e   : > { %v4117_v17 = vsel %vm4114_vm12, %v4084_v49, %v3606_v38 }
 0x56f   : > { %v3638_v24 = vpop.permute.xlu0 %3637 }
 0x570   : > { %v4133_v5 = vsel %vm4114_vm12, %v4100_v34, %v3638_v24  ;;  %v9149_v34 = vld [vmem:[#allocation61_spill] sm:$0xff] }
 0x571   : > { %v3380_v45 = vpop.permute.xlu1 %3379 }
 0x572   : > { %v4066_v1 = vsel %vm2078_vm9, %v4034_v15, %v3380_v45  ;;  %v5006_v45 = vld [vmem:[#allocation3 + $0xc0] sm:$0xff] }
 0x573   : > { %v3766_v60 = vpop.permute.xlu0 %3765 }
 0x574   : > { %v4166_v57 = vsel %vm4147_vm14, %v4133_v5, %v3766_v60  ;;  %v3969_v5 = vsel %vm1880_vm2, %v5006_v45, %v9149_v34  ;;  %v9150_v60 = vld [vmem:[#allocation134_spill] sm:$0xff] }
 0x575   : > { %v3894_v29 = vpop.permute.xlu1 %3893 }
 0x576   : > { %v4199_v20 = vsel %vm4180_vm15, %v4166_v57, %v3894_v29  ;;  %v3985_v57 = vsel %vm1946_vm5, %v3953_v36, %v9150_v60 }
 0x577   : > { %v3734_v53 = vpop.permute.xlu0 %3733  ;;  %4846 = vmatprep.subr.msk.mxu0 %vm4385_vm1, %v4199_v20  ;;  %v9151_v20 = vld [vmem:[#allocation34_spill] sm:$0xff]  ;;  %v4017_v7 = vsel %vm2012_vm7, %v3985_v57, %v9152_v12 }
 0x578   : > { %v4150_v33 = vsel %vm4147_vm14, %v4117_v17, %v3734_v53  ;;  %v4001_v9 = vsel %vm1946_vm5, %v3969_v5, %v9151_v20  ;;  %v9153_v53 = vld [vmem:[#allocation33_spill] sm:$0xff] }
 0x579   : > { %v3508_v6 = vpop.permute.xlu1 %3507  ;;  %v4033_v10 = vsel %vm2012_vm7, %v4001_v9, %v9153_v53 }
 0x57a   : > { %v4099_v28 = vsel %vm4081_vm13, %v4066_v1, %v3508_v6 }
 0x57b   : > { %v3348_v39 = vpop.permute.xlu0 %3347 }
 0x57c   : > { %v4050_v50 = vsel %vm2078_vm9, %v4018_v55, %v3348_v39 }
 0x57d   : > { %v3476_v27 = vpop.permute.xlu1 %3475 }
 0x57e   : > { %v4083_v42 = vsel %vm4081_vm13, %v4050_v50, %v3476_v27 }
 0x57f   : > { %v3862_v37 = vpop.permute.xlu0 %3861 }
 0x580   : > { %v4183_v13 = vsel %vm4180_vm15, %v4150_v33, %v3862_v37 }
 0x581   : > { %4847 = vmatpush3.xpose.msk.msra.mxu0 %vm4385_vm1, %v4183_v13  ;;  %v3604_v44 = vpop.permute.xlu1 %3603 }
 0x582   : > { %v4116_v18 = vsel %vm4114_vm12, %v4083_v42, %v3604_v44 }
 0x583   : > { %v3636_v41 = vpop.permute.xlu0 %3635 }
 0x584   : > { %v4132_v16 = vsel %vm4114_vm12, %v4099_v28, %v3636_v41 }
 0x585   : > { %v3378_v22 = vpop.permute.xlu1 %3377 }
 0x586   : > { %v4065_v3 = vsel %vm2078_vm9, %v4033_v10, %v3378_v22 }
 0x587   : > { %v3764_v46 = vpop.permute.xlu0 %3763 }
 0x588   : > { %v4165_v14 = vsel %vm4147_vm14, %v4132_v16, %v3764_v46 }
 0x589   : > { %v3892_v61 = vpop.permute.xlu1 %3891 }
 0x58a   : > { %v4198_v25 = vsel %vm4180_vm15, %v4165_v14, %v3892_v61 }
 0x58b   : > { %v3732_v30 = vpop.permute.xlu0 %3731  ;;  %4848 = vmatprep.subr.msk.mxu0 %vm4385_vm1, %v4198_v25 }
 0x58c   : > { %v4149_v32 = vsel %vm4147_vm14, %v4116_v18, %v3732_v30 }
 0x58d   : > { %v3506_v21 = vpop.permute.xlu1 %3505 }
 0x58e   : > { %v4098_v6 = vsel %vm4081_vm13, %v4065_v3, %v3506_v21 }
 0x58f   : > { %v3346_v2 = vpop.permute.xlu0 %3345 }
 0x590   : > { %v4049_v19 = vsel %vm2078_vm9, %v4017_v7, %v3346_v2 }
 0x591   : > { %v3474_v38 = vpop.permute.xlu1 %3473 }
 0x592   : > { %v4082_v58 = vsel %vm4081_vm13, %v4049_v19, %v3474_v38 }
 0x593   : > { %v3860_v0 = vpop.permute.xlu0 %3859 }
 0x594   : > { %v4182_v52 = vsel %vm4180_vm15, %v4149_v32, %v3860_v0 }
 0x595   : > { %4849 = vmatpush3.xpose.msk.msra.mxu0 %vm4385_vm1, %v4182_v52  ;;  %v3602_v24 = vpop.permute.xlu1 %3601 }
 0x596   : > { %v4115_v27 = vsel %vm4114_vm12, %v4082_v58, %v3602_v24 }
 0x597   : > { %v3634_v43 = vpop.permute.xlu0 %3633 }
 0x598   : > { %v4131_v39 = vsel %vm4114_vm12, %v4098_v6, %v3634_v43 }
 0x599   : > { %v3730_v29 = vpop.permute.xlu1 %3729 }
 0x59a   : > { %v4148_v37 = vsel %vm4147_vm14, %v4115_v27, %v3730_v29 }
 0x59b   : > { %v3762_v47 = vpop.permute.xlu0 %3761 }
 0x59c   : > { %v4164_v17 = vsel %vm4147_vm14, %v4131_v39, %v3762_v47 }
 0x59d   : > { %v3858_v49 = vpop.permute.xlu1 %3857 }
 0x59e   : > { %v4181_v44 = vsel %vm4180_vm15, %v4148_v37, %v3858_v49 }
 0x59f   : > { %v3890_v33 = vpop.permute.xlu0 %3889 }
 0x5a0   : > { %v4197_v13 = vsel %vm4180_vm15, %v4164_v17, %v3890_v33 }
 0x5a1   : > { %4850 = vmatprep.subr.msk.mxu0 %vm4385_vm1, %v4197_v13 }
 0x5a2   : > { %4851 = vmatpush3.xpose.msk.msra.mxu0 %vm4385_vm1, %v4181_v44 }
 0x5a5   : > { %4853 = vmatmul.mubr.msk.f32.vlgmr.msra.gmra.mxu0 %vm4385_vm1, %v8361_v56 }
 0x5ca   : > { %v4380_v26 = vpop.f32.mrf.mxu1 }
 0x5cc   : > { %v4382_v63 = vpop.f32.mrf.mxu1 }
 0x665   : > { %v4551_v51 = vpop.f32.mrf.mxu0 }
 0x666   : > { %v4552_v11 = vadd.f32 %v4551_v51, %v4380_v26 }
 0x667   : > { %v4553_v40 = vpop.f32.mrf.mxu0 }
 0x668   : > { %4556 = vst [vmem:[%s298_s23] sm:$0xff] %v4552_v11  ;;  %v4554_v41 = vadd.f32 %v4553_v40, %v4382_v63 }
 0x66a   : > { %4557 = vst [vmem:[%s298_s23 + $0x8] sm:$0xff] %v4554_v41 }
 0x66b   : > { %5020 = shalt.err (!%p5017_p3)
}
 0x66c   : > { %s5021_s19 = scalar_lea.hbm %s4571_s25, 256  ;;  %s5025_s22 = scalar_lea.hbm %s8581_s8, 512 }
 0x66d   : > { %p5022_p4 = scmp.ne.s32.totalorder %s4571_s25, %s5021_s19  ;;  %p5026_p9 = scmp.lt.s32.totalorder %s4571_s25, %s8581_s8 }
 0x66e   : > { %p5027_p10 = scmp.lt.s32.totalorder %s5025_s22, %s5021_s19 }
 0x66f   : > { %p5023_p7 = pnand %p5022_p4, %p5166_p5 }
 0x670   : > { %p5028_p11 = por %p5027_p10, %p5026_p9 }
 0x671   : > { %p5024_p8 = pneg %p5023_p7 }
 0x673   : > { %p5029_p12 = pnand %p5028_p11, %p5024_p8 }
 0x675   : > { %5032 = shalt.err (!%p5029_p12)
}
 0x676   : > { %4912 = dma.vmem_to_hbm [thread:$0]  (%p5166_p5), %s4574_s24, 256, %s4571_s25, %s4559_s26  }
 0x677 PF: > { %p4918_p13 = scmp.ge.s32.totalorder %s5067_s30, 2  ;;  %s4585_s13 = sand.u32 1, %s5055_s27  }
 0x678   : > { %s4586_s18 = scalar_lea.sflag [#allocation5], %s4585_s13 }
 0x679   : > { %p4915_p0 = pnand %p4918_p13, %p5170_p6 }
 0x67b   : > { %p4916_p1 = pneg %p4915_p0 }
 0x67d   : > { %5050 = dma.done.wait (%p4916_p1), %s4586_s18, 256  }
 0x67e   : > { %5052 = vsyncadd (%p4916_p1), %s4586_s18, 4294967040  ;;  %p18_p2 = scmp.ge.s32.totalorder %s5153_s11, 4   ;;  %s9154_s27 = smov %s5059_s28 }
 0x67f   : > { %s9155_s28 = smov %s5063_s29  ;;  %s9156_s29 = smov %s5164_s14 }
 0x680   : > { %s9157_s30 = smov %s5153_s11  ;;  %20 = sbr.rel (!%p18_p2) target bundleno = 3 (0x3), region = 91 }
 0x685   :  { %4591 = vsyncpa [#allocation5], 1 }
 0x686   :  { %4593 = vsyncpa [#allocation5 + $0x1], 1 }

</bundles_post_ra>
